<compile_context>
chip_gen: v6e
topology: v6e:2x2x1
jax: 0.10.0
libtpu: 0.0.40
codegen_flags: <defaults>
</compile_context>

<pallas_src>
import functools

import jax
import jax.numpy as jnp
from jax import lax
from jax.experimental import pallas as pl
from jax.experimental.pallas import tpu as pltpu

_INV_SQRT2 = 0.7071067811865476


def _gelu_exact(x):
    # Matches torch.nn.GELU() default (erf-based, not tanh approximation).
    return 0.5 * x * (1.0 + lax.erf(x * _INV_SQRT2))


def _mlp_kernel(x_ref, w1_ref, b1_ref, w2_ref, b2_ref, o_ref, h_ref):
    # Grid = (row tiles i, output-column tiles j); j iterates fastest.
    # x_ref:  (tm, rec)      w1_ref: (rec, llm)   b1_ref: (1, llm)
    # w2_ref: (llm, tn)      b2_ref: (1, tn)      o_ref:  (tm, tn)
    # h_ref:  (tm, llm) VMEM scratch holding gelu(x @ W1 + b1) for this row tile.

    @pl.when(pl.program_id(1) == 0)
    def _():
        # Hidden activation depends only on the row tile: compute once, reuse
        # across all output-column tiles.  MXU accumulates in f32.
        h = jnp.dot(x_ref[...], w1_ref[...], preferred_element_type=jnp.float32)
        h = _gelu_exact(h + b1_ref[...].astype(jnp.float32))
        h_ref[...] = h.astype(h_ref.dtype)

    y = jnp.dot(h_ref[...], w2_ref[...], preferred_element_type=jnp.float32)
    y = y + b2_ref[...].astype(jnp.float32)
    o_ref[...] = y.astype(o_ref.dtype)


def _round_up(x, m):
    return (x + m - 1) // m * m


def _pick_tn(llm_size):
    for cand in (1024, 512, 256, 128):
        if llm_size % cand == 0:
            return cand
    return llm_size  # block equals full dim (allowed even if not %128)


@functools.partial(jax.jit, static_argnames=("tm", "tn", "single_buffer_weights"))
def _item_imbedder_call(x, w1, b1, w2, b2, *, tm, tn, single_buffer_weights):
    n, rec_size = x.shape
    llm_size = w1.shape[1]
    grid = (n // tm, llm_size // tn)

    itemsize = jnp.dtype(x.dtype).itemsize
    w_bufs = 1 if single_buffer_weights else 2
    vmem_needed = (
        2 * tm * rec_size * itemsize            # x tiles (double-buffered)
        + w_bufs * rec_size * llm_size * itemsize   # W1
        + w_bufs * llm_size * itemsize              # b1
        + 2 * llm_size * tn * itemsize          # W2 column tiles
        + 2 * tn * itemsize                     # b2 column tiles
        + 2 * tm * tn * itemsize                # output tiles
        + tm * llm_size * itemsize              # h scratch
    )
    vmem_limit = min(int(vmem_needed) + (8 << 20), 64 << 20)

    const_kw = {"pipeline_mode": pl.Buffered(1)} if single_buffer_weights else {}

    return pl.pallas_call(
        _mlp_kernel,
        out_shape=jax.ShapeDtypeStruct((n, llm_size), x.dtype),
        grid_spec=pltpu.PrefetchScalarGridSpec(
            num_scalar_prefetch=0,
            grid=grid,
            in_specs=[
                pl.BlockSpec((tm, rec_size), lambda i, j: (i, 0)),
                # Constant-index weights/bias: never re-fetched, one buffer.
                pl.BlockSpec((rec_size, llm_size), lambda i, j: (0, 0), **const_kw),
                pl.BlockSpec((1, llm_size), lambda i, j: (0, 0), **const_kw),
                # W2 / b2 / out are column-tiled so full W2 never sits in VMEM.
                pl.BlockSpec((llm_size, tn), lambda i, j: (0, j)),
                pl.BlockSpec((1, tn), lambda i, j: (0, j)),
            ],
            out_specs=pl.BlockSpec((tm, tn), lambda i, j: (i, j)),
            scratch_shapes=[pltpu.VMEM((tm, llm_size), x.dtype)],
        ),
        compiler_params=pltpu.CompilerParams(
            dimension_semantics=("parallel", "arbitrary"),
            vmem_limit_bytes=vmem_limit,
        ),
    )(x, w1, b1, w2, b2)


def item_imbedder_forward(x, w1, b1, w2, b2, *, tm=None, tn=None):
    """x: [N, rec_size] -> [N, llm_size].  Handles ragged N via padding."""
    n, _ = x.shape
    llm_size = w1.shape[1]

    if tm is None:
        tm = min(512, _round_up(max(n, 1), 8))   # big MXU-friendly row tile
    tm = _round_up(tm, 8)
    if tn is None:
        tn = _pick_tn(llm_size)
    assert llm_size % tn == 0, "tn must divide llm_size"

    n_pad = _round_up(max(n, 1), tm)
    x_p = jnp.pad(x, ((0, n_pad - n), (0, 0))) if n_pad != n else x

    try:
        out = _item_imbedder_call(x_p, w1, b1, w2, b2, tm=tm, tn=tn,
                                  single_buffer_weights=True)
    except Exception:
        # Fallback if single-buffered pipeline mode is unsupported in this env.
        out = _item_imbedder_call(x_p, w1, b1, w2, b2, tm=tm, tn=tn,
                                  single_buffer_weights=False)

    return out[:n] if n_pad != n else out


def init_item_imbedder_params(key, rec_size, llm_size, dtype=jnp.float32):
    """Deterministic synthetic init (weights stored [in, out], i.e. transposed)."""
    k1, k2, k3, k4 = jax.random.split(key, 4)
    w1 = (jax.random.normal(k1, (rec_size, llm_size), jnp.float32) /
          jnp.sqrt(rec_size)).astype(dtype)
    b1 = (jax.random.normal(k2, (1, llm_size), jnp.float32) * 0.01).astype(dtype)
    w2 = (jax.random.normal(k3, (llm_size, llm_size), jnp.float32) /
          jnp.sqrt(llm_size)).astype(dtype)
    b2 = (jax.random.normal(k4, (1, llm_size), jnp.float32) * 0.01).astype(dtype)
    return w1, b1, w2, b2


def _reference_forward(x, w1, b1, w2, b2):
    h = x.astype(jnp.float32) @ w1.astype(jnp.float32) + b1.astype(jnp.float32)
    h = _gelu_exact(h)
    return (h @ w2.astype(jnp.float32) + b2.astype(jnp.float32)).astype(x.dtype)


if __name__ == "__main__":
    # Small shapes consistent with the module: rec_size=64 (module default),
    # reduced llm_size=512 for speed, ragged N=300 to exercise padding, and
    # explicit tm=128 / tn=256 so both grid axes and the h-scratch reuse run.
    rec_size, llm_size, n = 64, 512, 300

    key = jax.random.PRNGKey(0)
    kx, kp = jax.random.split(key)
    x = jax.random.normal(kx, (n, rec_size), jnp.float32)
    w1, b1, w2, b2 = init_item_imbedder_params(kp, rec_size, llm_size)

    out = item_imbedder_forward(x, w1, b1, w2, b2, tm=128, tn=256)
    out = jax.block_until_ready(out)

    ref = _reference_forward(x, w1, b1, w2, b2)
    assert out.shape == (n, llm_size)
    assert jnp.allclose(out, ref, atol=2e-4, rtol=2e-4), "mismatch vs reference"

    print("KERNEL_OK")
</pallas_src>

<mosaic_0001>
module attributes {stable_mosaic.version = 11 : i64} {
  func.func @_mlp_kernel(%arg0: i32, %arg1: i32, %arg2: memref<128x64xf32, #tpu.memory_space<vmem>>, %arg3: memref<64x512xf32, #tpu.memory_space<vmem>>, %arg4: memref<1x512xf32, #tpu.memory_space<vmem>>, %arg5: memref<512x256xf32, #tpu.memory_space<vmem>>, %arg6: memref<1x256xf32, #tpu.memory_space<vmem>>, %arg7: memref<128x256xf32, #tpu.memory_space<vmem>>, %arg8: memref<128x512xf32, #tpu.memory_space<vmem>>) attributes {dimension_semantics = [#tpu.dimension_semantics<parallel>, #tpu.dimension_semantics<arbitrary>], iteration_bounds = array<i64: 3, 2>, scalar_prefetch = 0 : i64, scratch_operands = 1 : i64, tpu.core_type = #tpu.core_type<tc>, window_params = [{transform_indices = @transform_0, window_bounds = array<i64: 128, 64>}, {pipeline_mode = #tpu.pipeline_mode<synchronous>, transform_indices = @transform_1, window_bounds = array<i64: 64, 512>}, {pipeline_mode = #tpu.pipeline_mode<synchronous>, transform_indices = @transform_2, window_bounds = array<i64: 1, 512>}, {transform_indices = @transform_3, window_bounds = array<i64: 512, 256>}, {transform_indices = @transform_4, window_bounds = array<i64: 1, 256>}, {transform_indices = @transform_5, window_bounds = array<i64: 128, 256>}]} {
    %c0_i32 = arith.constant 0 : i32
    %0 = arith.cmpi eq, %arg1, %c0_i32 : i32
    %1 = arith.extui %0 : i1 to i32
    %c0_i32_0 = arith.constant 0 : i32
    %2 = arith.cmpi ne, %1, %c0_i32_0 : i32
    scf.if %2 {
      %c0_8 = arith.constant 0 : index
      %c0_9 = arith.constant 0 : index
      %10 = vector.load %arg2[%c0_8, %c0_9] : memref<128x64xf32, #tpu.memory_space<vmem>>, vector<128x64xf32>
      %c0_10 = arith.constant 0 : index
      %c0_11 = arith.constant 0 : index
      %11 = vector.load %arg3[%c0_10, %c0_11] : memref<64x512xf32, #tpu.memory_space<vmem>>, vector<64x512xf32>
      %cst_12 = arith.constant dense<0.000000e+00> : vector<128x512xf32>
      %12 = tpu.matmul %10, %11, %cst_12 {dimension_numbers = #tpu.dot_dimension_numbers<[1], [0], [0], [1], [0, 0, 1, 1], [], []>} : vector<128x64xf32>, vector<64x512xf32>, vector<128x512xf32> -> vector<128x512xf32>
      %c0_13 = arith.constant 0 : index
      %c0_14 = arith.constant 0 : index
      %13 = vector.load %arg4[%c0_13, %c0_14] : memref<1x512xf32, #tpu.memory_space<vmem>>, vector<1x512xf32>
      %14 = vector.broadcast %13 : vector<1x512xf32> to vector<128x512xf32>
      %15 = arith.addf %12, %14 : vector<128x512xf32>
      %cst_15 = arith.constant 5.000000e-01 : f32
      %16 = vector.broadcast %cst_15 : f32 to vector<128x512xf32>
      %17 = arith.mulf %16, %15 : vector<128x512xf32>
      %cst_16 = arith.constant 0.707106769 : f32
      %18 = vector.broadcast %cst_16 : f32 to vector<128x512xf32>
      %19 = arith.mulf %15, %18 : vector<128x512xf32>
      %20 = math.erf %19 : vector<128x512xf32>
      %cst_17 = arith.constant 1.000000e+00 : f32
      %21 = vector.broadcast %cst_17 : f32 to vector<128x512xf32>
      %22 = arith.addf %21, %20 : vector<128x512xf32>
      %23 = arith.mulf %17, %22 : vector<128x512xf32>
      %c0_18 = arith.constant 0 : index
      %c0_19 = arith.constant 0 : index
      %24 = vector.load %arg8[%c0_18, %c0_19] : memref<128x512xf32, #tpu.memory_space<vmem>>, vector<128x512xf32>
      tpu.vector_store %arg8[%c0_18, %c0_19], %23 {strides = array<i32>} : memref<128x512xf32, #tpu.memory_space<vmem>>, vector<128x512xf32>,
    } else {
    }
    %c0 = arith.constant 0 : index
    %c0_1 = arith.constant 0 : index
    %3 = vector.load %arg8[%c0, %c0_1] : memref<128x512xf32, #tpu.memory_space<vmem>>, vector<128x512xf32>
    %c0_2 = arith.constant 0 : index
    %c0_3 = arith.constant 0 : index
    %4 = vector.load %arg5[%c0_2, %c0_3] : memref<512x256xf32, #tpu.memory_space<vmem>>, vector<512x256xf32>
    %cst = arith.constant dense<0.000000e+00> : vector<128x256xf32>
    %5 = tpu.matmul %3, %4, %cst {dimension_numbers = #tpu.dot_dimension_numbers<[1], [0], [0], [1], [0, 0, 1, 1], [], []>} : vector<128x512xf32>, vector<512x256xf32>, vector<128x256xf32> -> vector<128x256xf32>
    %c0_4 = arith.constant 0 : index
    %c0_5 = arith.constant 0 : index
    %6 = vector.load %arg6[%c0_4, %c0_5] : memref<1x256xf32, #tpu.memory_space<vmem>>, vector<1x256xf32>
    %7 = vector.broadcast %6 : vector<1x256xf32> to vector<128x256xf32>
    %8 = arith.addf %5, %7 : vector<128x256xf32>
    %c0_6 = arith.constant 0 : index
    %c0_7 = arith.constant 0 : index
    %9 = vector.load %arg7[%c0_6, %c0_7] : memref<128x256xf32, #tpu.memory_space<vmem>>, vector<128x256xf32>
    tpu.vector_store %arg7[%c0_6, %c0_7], %8 {strides = array<i32>} : memref<128x256xf32, #tpu.memory_space<vmem>>, vector<128x256xf32>,
    return
  }
  func.func @transform_0(%arg0: i32, %arg1: i32) -> (i32, i32) {
    %c0_i32 = arith.constant 0 : i32
    %c0_i32_0 = arith.constant 0 : i32
    return %arg0, %c0_i32 : i32, i32
  }
  func.func @transform_1(%arg0: i32, %arg1: i32) -> (i32, i32) {
    %c0_i32 = arith.constant 0 : i32
    %c0_i32_0 = arith.constant 0 : i32
    %c0_i32_1 = arith.constant 0 : i32
    return %c0_i32, %c0_i32_0 : i32, i32
  }
  func.func @transform_2(%arg0: i32, %arg1: i32) -> (i32, i32) {
    %c0_i32 = arith.constant 0 : i32
    %c0_i32_0 = arith.constant 0 : i32
    %c0_i32_1 = arith.constant 0 : i32
    return %c0_i32, %c0_i32_0 : i32, i32
  }
  func.func @transform_3(%arg0: i32, %arg1: i32) -> (i32, i32) {
    %c0_i32 = arith.constant 0 : i32
    %c0_i32_0 = arith.constant 0 : i32
    return %c0_i32, %arg1 : i32, i32
  }
  func.func @transform_4(%arg0: i32, %arg1: i32) -> (i32, i32) {
    %c0_i32 = arith.constant 0 : i32
    %c0_i32_0 = arith.constant 0 : i32
    return %c0_i32, %arg1 : i32, i32
  }
  func.func @transform_5(%arg0: i32, %arg1: i32) -> (i32, i32) {
    %c0_i32 = arith.constant 0 : i32
    return %arg0, %arg1 : i32, i32
  }
}

module attributes {stable_mosaic.version = 11 : i64} {
  func.func @_mlp_kernel(%arg0: i32, %arg1: i32, %arg2: memref<128x64xf32, #tpu.memory_space<vmem>>, %arg3: memref<64x512xf32, #tpu.memory_space<vmem>>, %arg4: memref<1x512xf32, #tpu.memory_space<vmem>>, %arg5: memref<512x256xf32, #tpu.memory_space<vmem>>, %arg6: memref<1x256xf32, #tpu.memory_space<vmem>>, %arg7: memref<128x256xf32, #tpu.memory_space<vmem>>, %arg8: memref<128x512xf32, #tpu.memory_space<vmem>>) attributes {dimension_semantics = [#tpu.dimension_semantics<parallel>, #tpu.dimension_semantics<arbitrary>], iteration_bounds = array<i64: 3, 2>, scalar_prefetch = 0 : i64, scratch_operands = 1 : i64, tpu.core_type = #tpu.core_type<tc>, window_params = [{transform_indices = @transform_0, window_bounds = array<i64: 128, 64>}, {pipeline_mode = #tpu.pipeline_mode<synchronous>, transform_indices = @transform_1, window_bounds = array<i64: 64, 512>}, {pipeline_mode = #tpu.pipeline_mode<synchronous>, transform_indices = @transform_2, window_bounds = array<i64: 1, 512>}, {transform_indices = @transform_3, window_bounds = array<i64: 512, 256>}, {transform_indices = @transform_4, window_bounds = array<i64: 1, 256>}, {transform_indices = @transform_5, window_bounds = array<i64: 128, 256>}]} {
    %c0_i32 = arith.constant 0 : i32
    %0 = arith.cmpi eq, %arg1, %c0_i32 : i32
    %1 = arith.extui %0 : i1 to i32
    %c0_i32_0 = arith.constant 0 : i32
    %2 = arith.cmpi ne, %1, %c0_i32_0 : i32
    scf.if %2 {
      %c0_8 = arith.constant 0 : index
      %c0_9 = arith.constant 0 : index
      %10 = vector.load %arg2[%c0_8, %c0_9] : memref<128x64xf32, #tpu.memory_space<vmem>>, vector<128x64xf32>
      %c0_10 = arith.constant 0 : index
      %c0_11 = arith.constant 0 : index
      %11 = vector.load %arg3[%c0_10, %c0_11] : memref<64x512xf32, #tpu.memory_space<vmem>>, vector<64x512xf32>
      %cst_12 = arith.constant dense<0.000000e+00> : vector<128x512xf32>
      %12 = tpu.matmul %10, %11, %cst_12 {dimension_numbers = #tpu.dot_dimension_numbers<[1], [0], [0], [1], [0, 0, 1, 1], [], []>} : vector<128x64xf32>, vector<64x512xf32>, vector<128x512xf32> -> vector<128x512xf32>
      %c0_13 = arith.constant 0 : index
      %c0_14 = arith.constant 0 : index
      %13 = vector.load %arg4[%c0_13, %c0_14] : memref<1x512xf32, #tpu.memory_space<vmem>>, vector<1x512xf32>
      %14 = vector.broadcast %13 : vector<1x512xf32> to vector<128x512xf32>
      %15 = arith.addf %12, %14 : vector<128x512xf32>
      %cst_15 = arith.constant 5.000000e-01 : f32
      %16 = vector.broadcast %cst_15 : f32 to vector<128x512xf32>
      %17 = arith.mulf %16, %15 : vector<128x512xf32>
      %cst_16 = arith.constant 0.707106769 : f32
      %18 = vector.broadcast %cst_16 : f32 to vector<128x512xf32>
      %19 = arith.mulf %15, %18 : vector<128x512xf32>
      %20 = math.erf %19 : vector<128x512xf32>
      %cst_17 = arith.constant 1.000000e+00 : f32
      %21 = vector.broadcast %cst_17 : f32 to vector<128x512xf32>
      %22 = arith.addf %21, %20 : vector<128x512xf32>
      %23 = arith.mulf %17, %22 : vector<128x512xf32>
      %c0_18 = arith.constant 0 : index
      %c0_19 = arith.constant 0 : index
      %24 = vector.load %arg8[%c0_18, %c0_19] : memref<128x512xf32, #tpu.memory_space<vmem>>, vector<128x512xf32>
      tpu.vector_store %arg8[%c0_18, %c0_19], %23 {strides = array<i32>} : memref<128x512xf32, #tpu.memory_space<vmem>>, vector<128x512xf32>,
    } else {
    }
    %c0 = arith.constant 0 : index
    %c0_1 = arith.constant 0 : index
    %3 = vector.load %arg8[%c0, %c0_1] : memref<128x512xf32, #tpu.memory_space<vmem>>, vector<128x512xf32>
    %c0_2 = arith.constant 0 : index
    %c0_3 = arith.constant 0 : index
    %4 = vector.load %arg5[%c0_2, %c0_3] : memref<512x256xf32, #tpu.memory_space<vmem>>, vector<512x256xf32>
    %cst = arith.constant dense<0.000000e+00> : vector<128x256xf32>
    %5 = tpu.matmul %3, %4, %cst {dimension_numbers = #tpu.dot_dimension_numbers<[1], [0], [0], [1], [0, 0, 1, 1], [], []>} : vector<128x512xf32>, vector<512x256xf32>, vector<128x256xf32> -> vector<128x256xf32>
    %c0_4 = arith.constant 0 : index
    %c0_5 = arith.constant 0 : index
    %6 = vector.load %arg6[%c0_4, %c0_5] : memref<1x256xf32, #tpu.memory_space<vmem>>, vector<1x256xf32>
    %7 = vector.broadcast %6 : vector<1x256xf32> to vector<128x256xf32>
    %8 = arith.addf %5, %7 : vector<128x256xf32>
    %c0_6 = arith.constant 0 : index
    %c0_7 = arith.constant 0 : index
    %9 = vector.load %arg7[%c0_6, %c0_7] : memref<128x256xf32, #tpu.memory_space<vmem>>, vector<128x256xf32>
    tpu.vector_store %arg7[%c0_6, %c0_7], %8 {strides = array<i32>} : memref<128x256xf32, #tpu.memory_space<vmem>>, vector<128x256xf32>,
    return
  }
  func.func @transform_0(%arg0: i32, %arg1: i32) -> (i32, i32) {
    %c0_i32 = arith.constant 0 : i32
    %c0_i32_0 = arith.constant 0 : i32
    return %arg0, %c0_i32 : i32, i32
  }
  func.func @transform_1(%arg0: i32, %arg1: i32) -> (i32, i32) {
    %c0_i32 = arith.constant 0 : i32
    %c0_i32_0 = arith.constant 0 : i32
    %c0_i32_1 = arith.constant 0 : i32
    return %c0_i32, %c0_i32_0 : i32, i32
  }
  func.func @transform_2(%arg0: i32, %arg1: i32) -> (i32, i32) {
    %c0_i32 = arith.constant 0 : i32
    %c0_i32_0 = arith.constant 0 : i32
    %c0_i32_1 = arith.constant 0 : i32
    return %c0_i32, %c0_i32_0 : i32, i32
  }
  func.func @transform_3(%arg0: i32, %arg1: i32) -> (i32, i32) {
    %c0_i32 = arith.constant 0 : i32
    %c0_i32_0 = arith.constant 0 : i32
    return %c0_i32, %arg1 : i32, i32
  }
  func.func @transform_4(%arg0: i32, %arg1: i32) -> (i32, i32) {
    %c0_i32 = arith.constant 0 : i32
    %c0_i32_0 = arith.constant 0 : i32
    return %c0_i32, %arg1 : i32, i32
  }
  func.func @transform_5(%arg0: i32, %arg1: i32) -> (i32, i32) {
    %c0_i32 = arith.constant 0 : i32
    return %arg0, %arg1 : i32, i32
  }
}

</mosaic_0001>

<bundles_post_ra>
// kernel: _item_imbedder_call.1
= control target key start
LH: loop header
LB: loop body
LE: loop exit
PB: predicated region body
PF: predicated region fallthrough
CT: control target
= control target key end

     0   :  { %10 = vsyncpa [#allocation4], 0  ;;  %s3253_s0 = inlined_call_operand.vmem [shape: f32[384,64], index: 0, kind: input, shape index: {}]   ;;  %s3254_s1 = inlined_call_operand.vmem [shape: f32[64,512], index: 1, kind: input, shape index: {}]   ;;  %s3255_s2 = inlined_call_operand.vmem [shape: f32[1,512], index: 2, kind: input, shape index: {}]   ;;  %s3256_s3 = inlined_call_operand.hbm [shape: f32[512,512], index: 3, kind: input, shape index: {}]   ;;  %s3257_s4 = inlined_call_operand.vmem [shape: f32[1,512], index: 4, kind: input, shape index: {}]   ;;  %s3258_s5 = inlined_call_operand.hbm [shape: f32[384,512], index: 5, kind: output, shape index: {}]  }
   0x1   :  { %12 = vsyncpa [#allocation4 + $0x1], 0 }
   0x2   :  { %13 = vsyncpa [#allocation5], 0 }
   0x3   :  { %15 = vsyncpa [#allocation5 + $0x1], 0  ;;  %s2294_s18 = smov 0   ;;  %s2296_s19 = smov 0  }
   0x4   :  { %s2298_s20 = smov 0   ;;  %s2300_s21 = smov 0  }
   0x5   :  { %s2302_s22 = smov 0   ;;  %s2304_s23 = smov 0  }
   0x6   :  { %s2306_s24 = smov 0   ;;  %s2308_s25 = smov 0  }
   0x7   :  { %s2310_s26 = smov 0   ;;  %s2312_s27 = smov 0  }
   0x8   :  { %s2314_s28 = smov 0  }
   0x9 LB: > { %3265 = sst [smem:[#allocation9_spill]] %s2233_s23  ;;  %s1813_s29 = sadd.s32 4294967295, %s2253_s28   ;;  %s2253_s28 = sphi %s2314_s28, %s21_s28   ;;  %s2249_s27 = sphi %s2312_s27, %s3282_s27   ;;  %s2245_s26 = sphi %s2310_s26, %s3281_s26   ;;  %s2241_s25 = sphi %s2308_s25, %s3280_s25   ;;  %s2237_s24 = sphi %s2306_s24, %s3279_s24   ;;  %s2233_s23 = sphi %s2304_s23, %s3278_s23   ;;  %s2229_s22 = sphi %s2302_s22, %s3287_s22   ;;  %s2225_s21 = sphi %s2300_s21, %s3286_s21   ;;  %s2221_s20 = sphi %s2298_s20, %s3285_s20   ;;  %s2217_s19 = sphi %s2296_s19, %s3284_s19   ;;  %s2213_s18 = sphi %s2294_s18, %s3283_s18  }
   0xa   : > { %3266 = sst [smem:[#allocation10_spill]] %s2245_s26  ;;  %s1814_s30 = sadd.s32 4294967294, %s2253_s28  }
   0xb   : > { %3267 = sst [smem:[#allocation11_spill]] %s2249_s27  ;;  %s30_s6 = sadd.s32 1, %s2245_s26 }
   0xc   : > { %s33_s7 = sadd.s32 1, %s2249_s27  ;;  %p31_p0 = scmp.ge.s32.totalorder %s30_s6, 2 }
   0xd   : > { %s108_s8 = sadd.s32 1, %s2233_s23  ;;  %p115_p1 = scmp.ne.s32.totalorder %s2233_s23, %s2229_s22 }
   0xe   : > { %p116_p2 = scmp.eq.s32.totalorder %s2253_s28, 0  ;;  %s3289_s6 = smov (%p31_p0, %s30_s6), 0 }
   0xf   : > { %3268 = sst [smem:[#allocation12_spill]] %s3289_s6  ;;  %s3291_s7 = smov (!%p31_p0, %s33_s7), %s2249_s27 }
  0x10   : > { %s105_s9 = ssub.s32 %s2245_s26, %s3289_s6  ;;  %p2360_p3 = por %p116_p2, %p115_p1 }
  0x11   : > { %p35_p4 = scmp.ge.s32.totalorder %s3291_s7, 3  ;;  %p106_p5 = scmp.eq.s32.totalorder %s105_s9, 0 }
  0x12   : > { %p121_p6 = scmp.ne.s32.totalorder %s2229_s22, %s2225_s21  ;;  %p122_p7 = scmp.eq.s32.totalorder %s1813_s29, 0 }
  0x13   : > { %s3293_s7 = smov (%p35_p4, %s3291_s7), 0  ;;  %s162_s15 = sadd.s32 1, %s2221_s20 }
  0x14   : > { %3270 = sst [smem:[#allocation13_spill]] %s3293_s7  ;;  %p2370_p8 = por %p122_p7, %p121_p6 }
  0x15   : > { %s2368_s11 = scalar_select %p106_p5, %s2233_s23, %s108_s8  }
  0x16   : > { %s157_s13 = ssub.s32 %s2249_s27, %s3293_s7  ;;  %p172_p10 = scmp.ne.s32.totalorder %s2221_s20, %s2217_s19 }
  0x17   : > { %3271 = sst [smem:[#allocation14_spill]] %s2368_s11  ;;  %s159_s14 = sor.u32 %s157_s13, %s105_s9 }
  0x18   : > { %p160_p9 = scmp.eq.s32.totalorder %s159_s14, 0  ;;  %p173_p11 = scmp.eq.s32.totalorder %s1813_s29, 5 }
  0x19   : > { %p178_p12 = scmp.ne.s32.totalorder %s2217_s19, %s2213_s18  ;;  %p179_p0 = scmp.eq.s32.totalorder %s1814_s30, 5 }
  0x1a   : > { %s2382_s16 = scalar_select %p160_p9, %s2221_s20, %s162_s15  }
  0x1b   : > { %p2384_p13 = por %p173_p11, %p172_p10  ;;  %p1880_p1 = scmp.lt.s32.totalorder %s2253_s28, 6 }
  0x1c   : > { %p2389_p2 = por %p179_p0, %p178_p12  ;;  %s214_s8 = sand.u32 1, %s2233_s23  }
  0x1d   : > { %s1817_s9 = sshll.u32 %s214_s8, 10  ;;  %s1866_s13 = sshll.u32 %s2245_s26, 8 }
  0x1e   : > { %s224_s29 = scalar_lea.hbm %s3256_s3, %s1866_s13  ;;  %s218_s6 = scalar_lea.vmem [#allocation3], %s1817_s9 }
  0x1f   : > { %s225_s15 = sshll.u32 %s218_s6, 4  ;;  %p2400_p4 = pnand %p1880_p1, %p2360_p3  ;;  %s226_s15 = int_to_ptr.vmem [resolvable:$true] %s225_s15 }
  0x20   : > { %s215_s30 = scalar_lea.sflag [#allocation4], %s214_s8  ;;  %s2118_s11 = scalar_lea.vmem %s226_s15, 16384 }
  0x21   : > { %p2107_p5 = pneg %p2400_p4  ;;  %p2119_p6 = scmp.ne.s32.totalorder %s226_s15, %s2118_s11 }
  0x22   : > { %s2255_s26 = smov [#allocation3]  }
  0x23   : > { %p2121_p7 = pnand %p2119_p6, %p2107_p5  ;;  %s2123_s23 = sshll.u32 %s2255_s26, 4  ;;  %s2124_s23 = int_to_ptr.vmem [resolvable:$false] %s2123_s23 }
  0x24   : > { %s2125_s7 = scalar_lea.vmem %s2124_s23, 32768  ;;  %p2126_p10 = scmp.lt.s32.totalorder %s226_s15, %s2124_s23 }
  0x25   : > { %p2122_p9 = pneg %p2121_p7  ;;  %p2127_p11 = scmp.lt.s32.totalorder %s2125_s7, %s2118_s11 }
  0x27   : > { %p2128_p12 = por %p2127_p11, %p2126_p10 }
  0x29   : > { %p2129_p0 = pnand %p2128_p12, %p2122_p9 }
  0x2b   : > { %2132 = shalt.err (!%p2129_p0)
}
  0x2c   : > { %s2256_s6 = smov 512   ;;  %s2257_s10 = smov 256  }
  0x2d   : > { %s2258_s8 = smov 16   ;;  %p1820_p3 = scmp.ge.s32.totalorder %s2253_s28, 1 }
  0x2e   : > { %1875 = dma.hbm_to_vmem [thread:$0]  (!%p2400_p4), %s224_s29, 16384, %s226_s15, %s215_s30, %s2256_s6, %s2257_s10, %s2258_s8  }
  0x2f   : > { %p241_p1 = scmp.lt.s32.totalorder %s2253_s28, 7 }
  0x31   : > { %p242_p5 = pnand %p1820_p3, %p241_p1 }
  0x32   : > { %s247_s26 = sand.u32 (!%p242_p5), 1, %s2229_s22  }
  0x33   : > { %245 = sbr.rel (%p242_p5) target bundleno = 730 (0x2da), region = 40  ;;  %s1821_s23 = sshll.u32 (!%p242_p5), %s247_s26, 10 }
  0x34   : > { %s248_s11 = scalar_lea.sflag (!%p242_p5), [#allocation4], %s247_s26  ;;  %s2411_s9 = scalar_lea.vmem (!%p242_p5), [#allocation3], %s1821_s23 }
  0x38   : > { %2204 = dma.done.wait (%p2370_p8), %s248_s11, 16384  }
  0x39   : > { %2206 = vsyncadd (%p2370_p8), %s248_s11, 4294950912  ;;  %s3264_s27 = sand.u32 1, %s2217_s19   ;;  %s1823_s13 = sshll.u32 %s2241_s25, 4 }
  0x3a   : > { %s1822_s14 = sshll.u32 %s3264_s27, 8  ;;  %p288_p4 = scmp.lt.s32.totalorder %s1823_s13, 47 }
  0x3b   : > { %s2422_s29 = sshll.u32 %s2237_s24, 1  ;;  %s2437_s23 = scalar_lea.vmem [#allocation6], %s1822_s14 }
  0x3c   : > { %s3295_s13 = smov (!%p288_p4, %s1823_s13), 47  ;;  %p295_p6 = scmp.lt.s32.totalorder %s2422_s29, 3 }
  0x3d   : > { %s1824_s15 = sshll.u32 %s3295_s13, 3  ;;  %p1826_p8 = scmp.ne.s32.totalorder %s2237_s24, 0 }
  0x3e   : > { %s2428_s12 = scalar_lea.vmem %s3253_s0, %s1824_s15 }
  0x3f   : > { %s2431_s6 = scalar_select %p295_p6, %s2422_s29, 3 }
  0x40   : > { %304 = sbr.rel (%p1826_p8) target bundleno = 390 (0x186), region = 48 }
  0x41   : > { %s297_s26 = scalar_lea.vmem %s3257_s4, %s2431_s6 }
  0x45   : > { %v350_v0 = vld [vmem:[%s3254_s1 + $0xe8] sm:$0xff]  ;;  %v352_v1 = vld [vmem:[%s3254_s1 + $0xf8] sm:$0xff]  ;;  %v349_v2 = vld [vmem:[%s3254_s1 + $0xe0] sm:$0xff]  ;;  %vm375_vm0 = vcmask 523264   ;;  %v2259_v33 = vmov 0.0   ;;  %v355_v49 = vlaneseq }
  0x46   : > { %440 = vmatprep.subr.mxu0 %v350_v0  ;;  %601 = vmatprep.subr.mxu1 %v352_v1  ;;  %v351_v3 = vld [vmem:[%s3254_s1 + $0xf0] sm:$0xff]  ;;  %v346_v4 = vld [vmem:[%s3254_s1 + $0xc8] sm:$0xff]  ;;  %v348_v5 = vld [vmem:[%s3254_s1 + $0xd8] sm:$0xff] }
  0x47   : > { %441 = vmatpush1.msra.mxu0 %v349_v2  ;;  %602 = vmatpush1.msra.mxu1 %v351_v3  ;;  %v345_v6 = vld [vmem:[%s3254_s1 + $0xc0] sm:$0xff]  ;;  %v347_v7 = vld [vmem:[%s3254_s1 + $0xd0] sm:$0xff]  ;;  %v342_v8 = vld [vmem:[%s3254_s1 + $0xa8] sm:$0xff]  ;;  %v356_v50 = vshrl.u32 %v355_v49, 7 }
  0x48   : > { %442 = vmatprep.subr.mxu0 %v346_v4  ;;  %603 = vmatprep.subr.mxu1 %v348_v5  ;;  %v344_v9 = vld [vmem:[%s3254_s1 + $0xb8] sm:$0xff]  ;;  %v341_v10 = vld [vmem:[%s3254_s1 + $0xa0] sm:$0xff]  ;;  %v343_v11 = vld [vmem:[%s3254_s1 + $0xb0] sm:$0xff] }
  0x49   : > { %443 = vmatpush1.msra.mxu0 %v345_v6  ;;  %604 = vmatpush1.msra.mxu1 %v347_v7  ;;  %v338_v12 = vld [vmem:[%s3254_s1 + $0x88] sm:$0xff]  ;;  %v340_v13 = vld [vmem:[%s3254_s1 + $0x98] sm:$0xff]  ;;  %v337_v14 = vld [vmem:[%s3254_s1 + $0x80] sm:$0xff]  ;;  %v357_v51 = vsub.s32 0, %v356_v50  ;;  %v365_v52 = vsub.s32 2, %v356_v50  ;;  %v361_v54 = vsub.s32 1, %v356_v50 }
  0x4a   : > { %444 = vmatprep.subr.mxu0 %v342_v8  ;;  %605 = vmatprep.subr.mxu1 %v344_v9  ;;  %v339_v15 = vld [vmem:[%s3254_s1 + $0x90] sm:$0xff]  ;;  %v334_v16 = vld [vmem:[%s3254_s1 + $0x68] sm:$0xff]  ;;  %v336_v17 = vld [vmem:[%s3254_s1 + $0x78] sm:$0xff]  ;;  %v369_v55 = vsub.s32 3, %v356_v50 }
  0x4b   : > { %445 = vmatpush1.msra.mxu0 %v341_v10  ;;  %606 = vmatpush1.msra.mxu1 %v343_v11  ;;  %v333_v18 = vld [vmem:[%s3254_s1 + $0x60] sm:$0xff]  ;;  %v335_v19 = vld [vmem:[%s3254_s1 + $0x70] sm:$0xff]  ;;  %v330_v20 = vld [vmem:[%s3254_s1 + $0x48] sm:$0xff] }
  0x4c   : > { %446 = vmatprep.subr.mxu0 %v338_v12  ;;  %607 = vmatprep.subr.mxu1 %v340_v13  ;;  %v332_v21 = vld [vmem:[%s3254_s1 + $0x58] sm:$0xff]  ;;  %v329_v22 = vld [vmem:[%s3254_s1 + $0x40] sm:$0xff]  ;;  %v331_v23 = vld [vmem:[%s3254_s1 + $0x50] sm:$0xff] }
  0x4d   : > { %447 = vmatpush1.msra.mxu0 %v337_v14  ;;  %608 = vmatpush1.msra.mxu1 %v339_v15  ;;  %v326_v24 = vld [vmem:[%s3254_s1 + $0x28] sm:$0xff]  ;;  %v328_v25 = vld [vmem:[%s3254_s1 + $0x38] sm:$0xff]  ;;  %v325_v26 = vld [vmem:[%s3254_s1 + $0x20] sm:$0xff] }
  0x4e   : > { %448 = vmatprep.subr.mxu0 %v334_v16  ;;  %609 = vmatprep.subr.mxu1 %v336_v17  ;;  %v327_v27 = vld [vmem:[%s3254_s1 + $0x30] sm:$0xff]  ;;  %v322_v28 = vld [vmem:[%s3254_s1 + $0x8] sm:$0xff]  ;;  %v324_v29 = vld [vmem:[%s3254_s1 + $0x18] sm:$0xff] }
  0x4f   : > { %449 = vmatpush1.msra.mxu0 %v333_v18  ;;  %610 = vmatpush1.msra.mxu1 %v335_v19  ;;  %v321_v30 = vld [vmem:[%s3254_s1] sm:$0xff]  ;;  %v323_v31 = vld [vmem:[%s3254_s1 + $0x10] sm:$0xff]  ;;  %v306_v34 = vld [vmem:[%s2428_s12 + $0x8] sm:$0xff] }
  0x50   : > { %450 = vmatprep.subr.mxu0 %v330_v20  ;;  %611 = vmatprep.subr.mxu1 %v332_v21  ;;  %v305_v32 = vld [vmem:[%s2428_s12] sm:$0xff]  ;;  %v307_v35 = vld [vmem:[%s2428_s12 + $0x10] sm:$0xff]  ;;  %v308_v36 = vld [vmem:[%s2428_s12 + $0x18] sm:$0xff] }
  0x51   : > { %451 = vmatpush1.msra.mxu0 %v329_v22  ;;  %612 = vmatpush1.msra.mxu1 %v331_v23  ;;  %v309_v37 = vld [vmem:[%s2428_s12 + $0x20] sm:$0xff]  ;;  %v310_v38 = vld [vmem:[%s2428_s12 + $0x28] sm:$0xff]  ;;  %v311_v39 = vld [vmem:[%s2428_s12 + $0x30] sm:$0xff] }
  0x52   : > { %452 = vmatprep.subr.mxu0 %v326_v24  ;;  %613 = vmatprep.subr.mxu1 %v328_v25  ;;  %v312_v40 = vld [vmem:[%s2428_s12 + $0x38] sm:$0xff]  ;;  %v313_v41 = vld [vmem:[%s2428_s12 + $0x40] sm:$0xff]  ;;  %v314_v42 = vld [vmem:[%s2428_s12 + $0x48] sm:$0xff] }
  0x53   : > { %453 = vmatpush1.msra.mxu0 %v325_v26  ;;  %614 = vmatpush1.msra.mxu1 %v327_v27  ;;  %v315_v43 = vld [vmem:[%s2428_s12 + $0x50] sm:$0xff]  ;;  %v316_v44 = vld [vmem:[%s2428_s12 + $0x58] sm:$0xff]  ;;  %v317_v45 = vld [vmem:[%s2428_s12 + $0x60] sm:$0xff] }
  0x54   : > { %454 = vmatprep.subr.mxu0 %v322_v28  ;;  %615 = vmatprep.subr.mxu1 %v324_v29  ;;  %v318_v46 = vld [vmem:[%s2428_s12 + $0x68] sm:$0xff]  ;;  %v319_v47 = vld [vmem:[%s2428_s12 + $0x70] sm:$0xff]  ;;  %v320_v48 = vld [vmem:[%s2428_s12 + $0x78] sm:$0xff] }
  0x55   : > { %455 = vmatpush1.msra.mxu0 %v321_v30  ;;  %488 = vmatprep.mubr.f32.mxu0 %v2259_v33  ;;  %v353_v53 = vld [vmem:[%s3255_s2] sm:$0xf] }
  0x56   : > { %616 = vmatpush1.msra.mxu1 %v323_v31  ;;  %649 = vmatprep.mubr.f32.mxu1 %v2259_v33  ;;  %v2619_v56 = vrot.slane %v353_v53, %v357_v51  ;;  %v2621_v57 = vrot.slane %v353_v53, %v365_v52  ;;  %v2623_v60 = vrot.slane %v353_v53, %v361_v54 }
  0x57   : > { %1827 = vmatmul.mubr.msk.f32.vlgmr.msra.gmra.mxu0 %vm375_vm0, %v305_v32  ;;  %1843 = vmatmul.mubr.msk.f32.vlgmr.msra.gmra.mxu1 %vm375_vm0, %v305_v32  ;;  %v2625_v61 = vrot.slane %v353_v53, %v369_v55 }
  0x58   : > { %494 = vmatprep.mubr.f32.mxu0 %v2259_v33  ;;  %655 = vmatprep.mubr.f32.mxu1 %v2259_v33 }
  0x5b   : > { %1828 = vmatmul.mubr.msk.f32.gmra.mxu0 %vm375_vm0, %v306_v34  ;;  %1844 = vmatmul.mubr.msk.f32.gmra.mxu1 %vm375_vm0, %v306_v34 }
  0x5c   : > { %500 = vmatprep.mubr.f32.mxu0 %v2259_v33  ;;  %661 = vmatprep.mubr.f32.mxu1 %v2259_v33 }
  0x5f   : > { %1829 = vmatmul.mubr.msk.f32.gmra.mxu0 %vm375_vm0, %v307_v35  ;;  %1845 = vmatmul.mubr.msk.f32.gmra.mxu1 %vm375_vm0, %v307_v35 }
  0x60   : > { %506 = vmatprep.mubr.f32.mxu0 %v2259_v33  ;;  %667 = vmatprep.mubr.f32.mxu1 %v2259_v33 }
  0x63   : > { %1830 = vmatmul.mubr.msk.f32.gmra.mxu0 %vm375_vm0, %v308_v36  ;;  %1846 = vmatmul.mubr.msk.f32.gmra.mxu1 %vm375_vm0, %v308_v36 }
  0x64   : > { %512 = vmatprep.mubr.f32.mxu0 %v2259_v33  ;;  %673 = vmatprep.mubr.f32.mxu1 %v2259_v33 }
  0x67   : > { %1831 = vmatmul.mubr.msk.f32.gmra.mxu0 %vm375_vm0, %v309_v37  ;;  %1847 = vmatmul.mubr.msk.f32.gmra.mxu1 %vm375_vm0, %v309_v37 }
  0x68   : > { %518 = vmatprep.mubr.f32.mxu0 %v2259_v33  ;;  %679 = vmatprep.mubr.f32.mxu1 %v2259_v33 }
  0x6b   : > { %1832 = vmatmul.mubr.msk.f32.gmra.mxu0 %vm375_vm0, %v310_v38  ;;  %1848 = vmatmul.mubr.msk.f32.gmra.mxu1 %vm375_vm0, %v310_v38 }
  0x6c   : > { %524 = vmatprep.mubr.f32.mxu0 %v2259_v33  ;;  %685 = vmatprep.mubr.f32.mxu1 %v2259_v33 }
  0x6f   : > { %1833 = vmatmul.mubr.msk.f32.gmra.mxu0 %vm375_vm0, %v311_v39  ;;  %1849 = vmatmul.mubr.msk.f32.gmra.mxu1 %vm375_vm0, %v311_v39 }
  0x70   : > { %530 = vmatprep.mubr.f32.mxu0 %v2259_v33  ;;  %691 = vmatprep.mubr.f32.mxu1 %v2259_v33 }
  0x73   : > { %1834 = vmatmul.mubr.msk.f32.gmra.mxu0 %vm375_vm0, %v312_v40  ;;  %1850 = vmatmul.mubr.msk.f32.gmra.mxu1 %vm375_vm0, %v312_v40 }
  0x74   : > { %536 = vmatprep.mubr.f32.mxu0 %v2259_v33  ;;  %697 = vmatprep.mubr.f32.mxu1 %v2259_v33 }
  0x77   : > { %1835 = vmatmul.mubr.msk.f32.gmra.mxu0 %vm375_vm0, %v313_v41  ;;  %1851 = vmatmul.mubr.msk.f32.gmra.mxu1 %vm375_vm0, %v313_v41 }
  0x78   : > { %542 = vmatprep.mubr.f32.mxu0 %v2259_v33  ;;  %703 = vmatprep.mubr.f32.mxu1 %v2259_v33 }
  0x7b   : > { %1836 = vmatmul.mubr.msk.f32.gmra.mxu0 %vm375_vm0, %v314_v42  ;;  %1852 = vmatmul.mubr.msk.f32.gmra.mxu1 %vm375_vm0, %v314_v42 }
  0x7c   : > { %548 = vmatprep.mubr.f32.mxu0 %v2259_v33  ;;  %709 = vmatprep.mubr.f32.mxu1 %v2259_v33 }
  0x7f   : > { %1837 = vmatmul.mubr.msk.f32.gmra.mxu0 %vm375_vm0, %v315_v43  ;;  %1853 = vmatmul.mubr.msk.f32.gmra.mxu1 %vm375_vm0, %v315_v43 }
  0x80   : > { %554 = vmatprep.mubr.f32.mxu0 %v2259_v33  ;;  %715 = vmatprep.mubr.f32.mxu1 %v2259_v33 }
  0x83   : > { %1838 = vmatmul.mubr.msk.f32.gmra.mxu0 %vm375_vm0, %v316_v44  ;;  %1854 = vmatmul.mubr.msk.f32.gmra.mxu1 %vm375_vm0, %v316_v44 }
  0x84   : > { %560 = vmatprep.mubr.f32.mxu0 %v2259_v33  ;;  %721 = vmatprep.mubr.f32.mxu1 %v2259_v33 }
  0x87   : > { %1839 = vmatmul.mubr.msk.f32.gmra.mxu0 %vm375_vm0, %v317_v45  ;;  %1855 = vmatmul.mubr.msk.f32.gmra.mxu1 %vm375_vm0, %v317_v45 }
  0x88   : > { %566 = vmatprep.mubr.f32.mxu0 %v2259_v33  ;;  %727 = vmatprep.mubr.f32.mxu1 %v2259_v33 }
  0x8b   : > { %1840 = vmatmul.mubr.msk.f32.gmra.mxu0 %vm375_vm0, %v318_v46  ;;  %1856 = vmatmul.mubr.msk.f32.gmra.mxu1 %vm375_vm0, %v318_v46 }
  0x8c   : > { %572 = vmatprep.mubr.f32.mxu0 %v2259_v33  ;;  %733 = vmatprep.mubr.f32.mxu1 %v2259_v33 }
  0x8f   : > { %1841 = vmatmul.mubr.msk.f32.gmra.mxu0 %vm375_vm0, %v319_v47  ;;  %1857 = vmatmul.mubr.msk.f32.gmra.mxu1 %vm375_vm0, %v319_v47 }
  0x90   : > { %578 = vmatprep.mubr.f32.mxu0 %v2259_v33  ;;  %739 = vmatprep.mubr.f32.mxu1 %v2259_v33 }
  0x93   : > { %1842 = vmatmul.mubr.msk.f32.gmra.mxu0 %vm375_vm0, %v320_v48  ;;  %1858 = vmatmul.mubr.msk.f32.gmra.mxu1 %vm375_vm0, %v320_v48 }
 0x117   : > { %v490_v58 = vpop.f32.mrf.mxu0  ;;  %v651_v59 = vpop.f32.mrf.mxu1 }
 0x118   : > { %v491_v62 = vadd.f32 %v490_v58, %v2619_v56  ;;  %v652_v63 = vadd.f32 %v651_v59, %v2621_v57 }
 0x119   : > { %v492_v0 = vpop.f32.mrf.mxu0  ;;  %v653_v1 = vpop.f32.mrf.mxu1 }
 0x11a   : > { %v810_v2 = vmul.f32 0.70710677, %v491_v62  ;;  %v812_v3 = vmul.f32 0.70710677, %v652_v63  ;;  %v493_v4 = vadd.f32 %v492_v0, %v2623_v60  ;;  %v654_v5 = vadd.f32 %v653_v1, %v2625_v61 }
 0x11b   : > { %v496_v6 = vpop.f32.mrf.mxu0  ;;  %v657_v7 = vpop.f32.mrf.mxu1  ;;  %v746_v37 = vmul.f32 0.5, %v491_v62  ;;  %v748_v38 = vmul.f32 0.5, %v652_v63 }
 0x11c   : > { %1977 = verf.f32 %v810_v2  ;;  %v497_v8 = vadd.f32 %v496_v6, %v2619_v56  ;;  %v658_v9 = vadd.f32 %v657_v7, %v2621_v57  ;;  %v811_v10 = vmul.f32 0.70710677, %v493_v4 }
 0x11d   : > { %1979 = verf.f32 %v812_v3  ;;  %v498_v11 = vpop.f32.mrf.mxu0  ;;  %v659_v12 = vpop.f32.mrf.mxu1  ;;  %v813_v13 = vmul.f32 0.70710677, %v654_v5  ;;  %v747_v40 = vmul.f32 0.5, %v493_v4  ;;  %v749_v49 = vmul.f32 0.5, %v654_v5 }
 0x11e   : > { %v814_v14 = vmul.f32 0.70710677, %v497_v8  ;;  %1981 = verf.f32 %v811_v10  ;;  %v816_v15 = vmul.f32 0.70710677, %v658_v9  ;;  %v499_v16 = vadd.f32 %v498_v11, %v2623_v60 }
 0x11f   : > { %v660_v17 = vadd.f32 %v659_v12, %v2625_v61  ;;  %v502_v18 = vpop.f32.mrf.mxu0  ;;  %v663_v19 = vpop.f32.mrf.mxu1  ;;  %1983 = verf.f32 %v813_v13  ;;  %v750_v50 = vmul.f32 0.5, %v497_v8  ;;  %v752_v58 = vmul.f32 0.5, %v658_v9 }
 0x120   : > { %v503_v20 = vadd.f32 %v502_v18, %v2619_v56  ;;  %v2637_v21 = vadd.f32 %v663_v19, %v2621_v57  ;;  %1985 = verf.f32 %v814_v14  ;;  %v815_v22 = vmul.f32 0.70710677, %v499_v16 }
 0x121   : > { %v504_v23 = vpop.f32.mrf.mxu0  ;;  %v665_v24 = vpop.f32.mrf.mxu1  ;;  %1987 = verf.f32 %v816_v15  ;;  %v817_v25 = vmul.f32 0.70710677, %v660_v17  ;;  %v751_v63 = vmul.f32 0.5, %v499_v16  ;;  %v753_v0 = vmul.f32 0.5, %v660_v17 }
 0x122   : > { %v818_v26 = vmul.f32 0.70710677, %v503_v20  ;;  %1989 = verf.f32 %v815_v22  ;;  %v820_v27 = vmul.f32 0.70710677, %v2637_v21  ;;  %v2641_v28 = vadd.f32 %v504_v23, %v2623_v60 }
 0x123   : > { %v508_v29 = vpop.f32.mrf.mxu0  ;;  %v669_v30 = vpop.f32.mrf.mxu1  ;;  %1991 = verf.f32 %v817_v25  ;;  %v2644_v31 = vadd.f32 %v665_v24, %v2625_v61  ;;  %v754_v6 = vmul.f32 0.5, %v503_v20 }
 0x124   : > { %v2647_v32 = vadd.f32 %v508_v29, %v2619_v56  ;;  %v2650_v33 = vadd.f32 %v669_v30, %v2621_v57  ;;  %1993 = verf.f32 %v818_v26  ;;  %v819_v34 = vmul.f32 0.70710677, %v2641_v28 }
 0x125   : > { %v510_v35 = vpop.f32.mrf.mxu0  ;;  %v671_v36 = vpop.f32.mrf.mxu1  ;;  %1995 = verf.f32 %v820_v27  ;;  %v821_v39 = vmul.f32 0.70710677, %v2644_v31  ;;  %v756_v29 = vmul.f32 0.5, %v2637_v21 }
 0x126   : > { %1997 = verf.f32 %v819_v34  ;;  %v822_v41 = vmul.f32 0.70710677, %v2647_v32  ;;  %v824_v42 = vmul.f32 0.70710677, %v2650_v33  ;;  %v2657_v45 = vadd.f32 %v510_v35, %v2623_v60 }
 0x127   : > { %v514_v43 = vpop.f32.mrf.mxu0  ;;  %v675_v44 = vpop.f32.mrf.mxu1  ;;  %1999 = verf.f32 %v821_v39  ;;  %v2660_v46 = vadd.f32 %v671_v36, %v2625_v61 }
 0x128   : > { %v2663_v47 = vadd.f32 %v514_v43, %v2619_v56  ;;  %2001 = verf.f32 %v822_v41  ;;  %v2666_v51 = vadd.f32 %v675_v44, %v2621_v57  ;;  %v823_v59 = vmul.f32 0.70710677, %v2657_v45 }
 0x129   : > { %v1978_v48 = vpop.eup %1977  ;;  %v516_v52 = vpop.f32.mrf.mxu0  ;;  %2003 = verf.f32 %v824_v42  ;;  %v825_v1 = vmul.f32 0.70710677, %v2660_v46  ;;  %v757_v44 = vmul.f32 0.5, %v2644_v31 }
 0x12a   : > { %v677_v53 = vpop.f32.mrf.mxu1  ;;  %v1980_v54 = vpop.eup %1979  ;;  %v938_v55 = vadd.f32 1.0, %v1978_v48  ;;  %2005 = verf.f32 %v823_v59  ;;  %v826_v7 = vmul.f32 0.70710677, %v2663_v47  ;;  %v828_v9 = vmul.f32 0.70710677, %v2666_v51 }
 0x12b   : > { %v940_v62 = vadd.f32 1.0, %v1980_v54  ;;  %v520_v2 = vpop.f32.mrf.mxu0  ;;  %v1982_v4 = vpop.eup %1981  ;;  %2007 = verf.f32 %v825_v1  ;;  %v2673_v16 = vadd.f32 %v516_v52, %v2623_v60  ;;  %v2676_v17 = vadd.f32 %v677_v53, %v2625_v61 }
 0x12c   : > { %v681_v3 = vpop.f32.mrf.mxu1  ;;  %v1002_v5 = vmul.f32 %v938_v55, %v746_v37  ;;  %v1984_v8 = vpop.eup %1983  ;;  %v939_v11 = vadd.f32 1.0, %v1982_v4  ;;  %2009 = verf.f32 %v826_v7  ;;  %v2679_v22 = vadd.f32 %v520_v2, %v2619_v56 }
 0x12d   : > { %v1004_v10 = vmul.f32 %v940_v62, %v748_v38  ;;  %v522_v12 = vpop.f32.mrf.mxu0  ;;  %v1986_v14 = vpop.eup %1985  ;;  %v941_v15 = vadd.f32 1.0, %v1984_v8  ;;  %2011 = verf.f32 %v828_v9  ;;  %v827_v30 = vmul.f32 0.70710677, %v2673_v16 }
 0x12e   : > { %v683_v13 = vpop.f32.mrf.mxu1  ;;  %1066 = vst [vmem:[#allocation2 + $0xb0] sm:$0xff] %v1002_v5  ;;  %v1988_v18 = vpop.eup %1987  ;;  %v1003_v19 = vmul.f32 %v939_v11, %v747_v40  ;;  %v942_v20 = vadd.f32 1.0, %v1986_v14  ;;  %v755_v37 = vmul.f32 0.5, %v2641_v28  ;;  %v829_v38 = vmul.f32 0.70710677, %v2676_v17 }
 0x12f   : > { %1068 = vst [vmem:[#allocation2 + $0xd8] sm:$0xff] %v1004_v10  ;;  %v2681_v23 = vpop.f32.mrf.mxu0  ;;  %v1990_v25 = vpop.eup %1989  ;;  %v1005_v26 = vmul.f32 %v941_v15, %v749_v49  ;;  %v944_v27 = vadd.f32 1.0, %v1988_v18  ;;  %2013 = verf.f32 %v827_v30  ;;  %v2701_v31 = vadd.f32 %v522_v12, %v2623_v60 }
 0x130   : > { %v2683_v24 = vpop.f32.mrf.mxu1  ;;  %v1992_v34 = vpop.eup %1991  ;;  %1067 = vst [vmem:[#allocation2 + $0x1b0] sm:$0xff] %v1003_v19  ;;  %v1006_v35 = vmul.f32 %v942_v20, %v750_v50  ;;  %v943_v36 = vadd.f32 1.0, %v1990_v25  ;;  %2015 = verf.f32 %v829_v38  ;;  %v830_v50 = vmul.f32 0.70710677, %v2679_v22 }
 0x131   : > { %v528_v39 = vpop.f32.mrf.mxu0  ;;  %v1994_v41 = vpop.eup %1993  ;;  %1069 = vst [vmem:[#allocation2 + $0x18] sm:$0xff] %v1005_v26  ;;  %v1008_v42 = vmul.f32 %v944_v27, %v752_v58  ;;  %v945_v43 = vadd.f32 1.0, %v1992_v34  ;;  %v2698_v58 = vadd.f32 %v681_v3, %v2621_v57  ;;  %v2704_v1 = vadd.f32 %v683_v13, %v2625_v61 }
 0x132   : > { %v2689_v40 = vpop.f32.mrf.mxu1  ;;  %v1996_v21 = vpop.eup %1995  ;;  %1070 = vst [vmem:[#allocation2 + $0x50] sm:$0xff] %v1006_v35  ;;  %v1007_v48 = vmul.f32 %v943_v36, %v751_v63  ;;  %v946_v49 = vadd.f32 1.0, %v1994_v41  ;;  %2017 = verf.f32 %v830_v50  ;;  %v758_v7 = vmul.f32 0.5, %v2647_v32 }
 0x133   : > { %v2693_v28 = vpop.f32.mrf.mxu0  ;;  %v1998_v53 = vpop.eup %1997  ;;  %1072 = vst [vmem:[#allocation2 + $0x130] sm:$0xff] %v1008_v42  ;;  %v1009_v54 = vmul.f32 %v945_v43, %v753_v0  ;;  %v948_v55 = vadd.f32 1.0, %v1996_v21  ;;  %v832_v8 = vmul.f32 0.70710677, %v2698_v58  ;;  %v760_v9 = vmul.f32 0.5, %v2650_v33 }
 0x134   : > { %v2695_v52 = vpop.f32.mrf.mxu1  ;;  %v2000_v59 = vpop.eup %1999  ;;  %1071 = vst [vmem:[#allocation2 + $0x168] sm:$0xff] %v1007_v48  ;;  %v1010_v62 = vmul.f32 %v946_v49, %v754_v6  ;;  %v947_v63 = vadd.f32 1.0, %v1998_v53  ;;  %v831_v12 = vmul.f32 0.70710677, %v2701_v31  ;;  %v759_v19 = vmul.f32 0.5, %v2657_v45 }
 0x135   : > { %v2706_v2 = vpop.f32.mrf.mxu0  ;;  %v2002_v0 = vpop.eup %2001  ;;  %1073 = vst [vmem:[#allocation2 + $0x48] sm:$0xff] %v1009_v54  ;;  %v1012_v5 = vmul.f32 %v948_v55, %v756_v29  ;;  %v949_v3 = vadd.f32 1.0, %v2000_v59  ;;  %2019 = verf.f32 %v832_v8  ;;  %v833_v25 = vmul.f32 0.70710677, %v2704_v1 }
 0x136   : > { %v2708_v4 = vpop.f32.mrf.mxu1  ;;  %v2004_v10 = vpop.eup %2003  ;;  %1074 = vst [vmem:[#allocation2 + $0x180] sm:$0xff] %v1010_v62  ;;  %v1011_v6 = vmul.f32 %v947_v63, %v755_v37  ;;  %v950_v11 = vadd.f32 1.0, %v2002_v0  ;;  %2021 = verf.f32 %v831_v12  ;;  %v2722_v33 = vadd.f32 %v2681_v23, %v2619_v56 }
 0x137   : > { %v2714_v13 = vpop.f32.mrf.mxu0  ;;  %1076 = vst [vmem:[#allocation2 + $0x118] sm:$0xff] %v1012_v5  ;;  %v1013_v15 = vmul.f32 %v949_v3, %v757_v44  ;;  %v952_v18 = vadd.f32 1.0, %v2004_v10  ;;  %v2006_v32 = vpop.eup %2005  ;;  %v2730_v45 = vadd.f32 %v2683_v24, %v2621_v57  ;;  %v2733_v35 = vadd.f32 %v528_v39, %v2623_v60 }
 0x138   : > { %v2716_v14 = vpop.f32.mrf.mxu1  ;;  %1075 = vst [vmem:[#allocation2 + $0x110] sm:$0xff] %v1011_v6  ;;  %v1014_v20 = vmul.f32 %v950_v11, %v758_v7  ;;  %v2008_v29 = vpop.eup %2007  ;;  %v951_v34 = vadd.f32 1.0, %v2006_v32  ;;  %v761_v23 = vmul.f32 0.5, %v2660_v46  ;;  %2023 = verf.f32 %v833_v25 }
 0x139   : > { %v2724_v26 = vpop.f32.mrf.mxu0  ;;  %1077 = vst [vmem:[#allocation2 + $0x98] sm:$0xff] %v1013_v15  ;;  %v1016_v30 = vmul.f32 %v952_v18, %v760_v9  ;;  %v2010_v36 = vpop.eup %2009  ;;  %v953_v37 = vadd.f32 1.0, %v2008_v29  ;;  %v834_v38 = vmul.f32 0.70710677, %v2722_v33  ;;  %v762_v24 = vmul.f32 0.5, %v2663_v47 }
 0x13a   : > { %v2726_v27 = vpop.f32.mrf.mxu1  ;;  %1078 = vst [vmem:[#allocation2 + $0x120] sm:$0xff] %v1014_v20  ;;  %v2012_v43 = vpop.eup %2011  ;;  %v1015_v44 = vmul.f32 %v951_v34, %v759_v19  ;;  %v954_v21 = vadd.f32 1.0, %v2010_v36  ;;  %v836_v39 = vmul.f32 0.70710677, %v2730_v45  ;;  %v764_v49 = vmul.f32 0.5, %v2666_v51 }
 0x13b   : > { %v2737_v41 = vpop.f32.mrf.mxu0  ;;  %1080 = vst [vmem:[#allocation2 + $0x108] sm:$0xff] %v1016_v30  ;;  %v1017_v48 = vmul.f32 %v953_v37, %v761_v23  ;;  %v956_v46 = vadd.f32 1.0, %v2012_v43  ;;  %2025 = verf.f32 %v834_v38  ;;  %v835_v54 = vmul.f32 0.70710677, %v2733_v35 }
 0x13c   : > { %v2739_v42 = vpop.f32.mrf.mxu1  ;;  %1079 = vst [vmem:[#allocation2 + $0x150] sm:$0xff] %v1015_v44  ;;  %v1018_v53 = vmul.f32 %v954_v21, %v762_v24  ;;  %2027 = verf.f32 %v836_v39  ;;  %v2749_v55 = vadd.f32 %v2689_v40, %v2625_v61  ;;  %v2014_v59 = vpop.eup %2013  ;;  %v2755_v51 = vadd.f32 %v2693_v28, %v2619_v56 }
 0x13d   : > { %v2744_v50 = vpop.f32.mrf.mxu0  ;;  %1081 = vst [vmem:[#allocation2 + $0x60] sm:$0xff] %v1017_v48  ;;  %v1020_v62 = vmul.f32 %v956_v46, %v764_v49  ;;  %v2759_v63 = vadd.f32 %v2695_v52, %v2621_v57  ;;  %v2763_v0 = vadd.f32 %v2706_v2, %v2623_v60  ;;  %v2016_v5 = vpop.eup %2015  ;;  %v763_v40 = vmul.f32 0.5, %v2673_v16 }
 0x13e   : > { %v2751_v47 = vpop.f32.mrf.mxu1  ;;  %1082 = vst [vmem:[#allocation2 + $0xe0] sm:$0xff] %v1018_v53  ;;  %v955_v3 = vadd.f32 1.0, %v2014_v59  ;;  %2029 = verf.f32 %v835_v54  ;;  %v837_v7 = vmul.f32 0.70710677, %v2749_v55  ;;  %v765_v28 = vmul.f32 0.5, %v2676_v17 }
 0x13f   : > { %1084 = vst [vmem:[#allocation2 + $0x138] sm:$0xff] %v1020_v62  ;;  %v957_v8 = vadd.f32 1.0, %v2016_v5  ;;  %v838_v10 = vmul.f32 0.70710677, %v2755_v51  ;;  %v2769_v52 = vpop.f32.mrf.mxu0  ;;  %v2018_v6 = vpop.eup %2017  ;;  %v766_v2 = vmul.f32 0.5, %v2679_v22  ;;  %v2778_v17 = vadd.f32 %v2708_v4, %v2625_v61 }
 0x140   : > { %v1019_v11 = vmul.f32 %v955_v3, %v763_v40  ;;  %2031 = verf.f32 %v837_v7  ;;  %v840_v9 = vmul.f32 0.70710677, %v2759_v63  ;;  %v2773_v16 = vpop.f32.mrf.mxu1  ;;  %v958_v15 = vadd.f32 1.0, %v2018_v6 }
 0x141   : > { %v1021_v12 = vmul.f32 %v957_v8, %v765_v28  ;;  %2033 = verf.f32 %v838_v10  ;;  %v839_v18 = vmul.f32 0.70710677, %v2763_v0  ;;  %v2782_v19 = vadd.f32 %v2714_v13, %v2619_v56  ;;  %v552_v4 = vpop.f32.mrf.mxu0 }
 0x142   : > { %1083 = vst [vmem:[#allocation2 + $0x188] sm:$0xff] %v1019_v11  ;;  %2035 = verf.f32 %v840_v9  ;;  %v2786_v22 = vadd.f32 %v2716_v14, %v2621_v57  ;;  %v2020_v32 = vpop.eup %2019  ;;  %v1022_v20 = vmul.f32 %v958_v15, %v766_v2  ;;  %v768_v25 = vmul.f32 0.5, %v2698_v58  ;;  %v2799_v23 = vpop.f32.mrf.mxu1 }
 0x143   : > { %1085 = vst [vmem:[#allocation2 + $0x140] sm:$0xff] %v1021_v12  ;;  %2037 = verf.f32 %v839_v18  ;;  %v2791_v29 = vadd.f32 %v2724_v26, %v2623_v60  ;;  %v2022_v30 = vpop.eup %2021  ;;  %v960_v34 = vadd.f32 1.0, %v2020_v32  ;;  %v767_v13 = vmul.f32 0.5, %v2701_v31  ;;  %v2807_v48 = vpop.f32.mrf.mxu0 }
 0x144   : > { %v841_v36 = vmul.f32 0.70710677, %v2778_v17  ;;  %v2797_v14 = vadd.f32 %v2726_v27, %v2625_v61  ;;  %1086 = vst [vmem:[#allocation2 + $0x80] sm:$0xff] %v1022_v20  ;;  %v959_v58 = vadd.f32 1.0, %v2022_v30  ;;  %v769_v37 = vmul.f32 0.5, %v2704_v1  ;;  %v2818_v53 = vpop.f32.mrf.mxu1 }
 0x145   : > { %v842_v26 = vmul.f32 0.70710677, %v2782_v19  ;;  %v844_v38 = vmul.f32 0.70710677, %v2786_v22  ;;  %v2024_v43 = vpop.eup %2023  ;;  %v1024_v44 = vmul.f32 %v960_v34, %v768_v25  ;;  %v770_v31 = vmul.f32 0.5, %v2722_v33  ;;  %v558_v10 = vpop.f32.mrf.mxu0 }
 0x146   : > { %2039 = verf.f32 %v841_v36  ;;  %v843_v24 = vmul.f32 0.70710677, %v2791_v29  ;;  %v1023_v21 = vmul.f32 %v959_v58, %v767_v13  ;;  %v961_v27 = vadd.f32 1.0, %v2024_v43  ;;  %v2830_v2 = vpop.f32.mrf.mxu1 }
 0x147   : > { %v772_v39 = vmul.f32 0.5, %v2730_v45  ;;  %2041 = verf.f32 %v842_v26  ;;  %1088 = vst [vmem:[#allocation2 + $0x1b8] sm:$0xff] %v1024_v44  ;;  %v845_v1 = vmul.f32 0.70710677, %v2797_v14  ;;  %v2812_v46 = vadd.f32 %v2737_v41, %v2619_v56  ;;  %v2850_v34 = vpop.f32.mrf.mxu0 }
 0x148   : > { %v2026_v49 = vpop.eup %2025  ;;  %2043 = verf.f32 %v844_v38  ;;  %v2816_v33 = vadd.f32 %v2739_v42, %v2621_v57  ;;  %1087 = vst [vmem:[#allocation2 + $0x1a8] sm:$0xff] %v1023_v21  ;;  %v1025_v45 = vmul.f32 %v961_v27, %v769_v37  ;;  %v2822_v62 = vadd.f32 %v2744_v50, %v2623_v60 }
 0x149   : > { %v2028_v54 = vpop.eup %2027  ;;  %v962_v59 = vadd.f32 1.0, %v2026_v49  ;;  %2045 = verf.f32 %v843_v24  ;;  %v771_v40 = vmul.f32 0.5, %v2733_v35  ;;  %v846_v41 = vmul.f32 0.70710677, %v2812_v46  ;;  %v2865_v27 = vpop.f32.mrf.mxu0 }
 0x14a   : > { %v964_v5 = vadd.f32 1.0, %v2028_v54  ;;  %2047 = verf.f32 %v845_v1  ;;  %1089 = vst [vmem:[#allocation2 + $0x28] sm:$0xff] %v1025_v45  ;;  %v773_v7 = vmul.f32 0.5, %v2749_v55  ;;  %v774_v28 = vmul.f32 0.5, %v2755_v51 }
 0x14b   : > { %v2030_v3 = vpop.eup %2029  ;;  %v1026_v42 = vmul.f32 %v962_v59, %v770_v31  ;;  %v848_v8 = vmul.f32 0.70710677, %v2816_v33  ;;  %2049 = verf.f32 %v846_v41  ;;  %v847_v50 = vmul.f32 0.70710677, %v2822_v62 }
 0x14c   : > { %v1028_v6 = vmul.f32 %v964_v5, %v772_v39  ;;  %v963_v11 = vadd.f32 1.0, %v2030_v3  ;;  %v2834_v9 = vadd.f32 %v2751_v47, %v2625_v61  ;;  %v2838_v55 = vadd.f32 %v2769_v52, %v2619_v56 }
 0x14d   : > { %v2032_v35 = vpop.eup %2031  ;;  %1090 = vst [vmem:[#allocation2 + $0x1e8] sm:$0xff] %v1026_v42  ;;  %2051 = verf.f32 %v848_v8  ;;  %v2842_v51 = vadd.f32 %v2773_v16, %v2621_v57  ;;  %v2845_v32 = vadd.f32 %v552_v4, %v2623_v60  ;;  %v776_v47 = vmul.f32 0.5, %v2759_v63  ;;  %v723_v4 = vpop.f32.mrf.mxu1 }
 0x14e   : > { %v2034_v12 = vpop.eup %2033  ;;  %1092 = vst [vmem:[#allocation2 + $0x160] sm:$0xff] %v1028_v6  ;;  %v1027_v15 = vmul.f32 %v963_v11, %v771_v40  ;;  %v965_v18 = vadd.f32 1.0, %v2032_v35  ;;  %2053 = verf.f32 %v847_v50  ;;  %v775_v30 = vmul.f32 0.5, %v2763_v0  ;;  %v568_v6 = vpop.f32.mrf.mxu0 }
 0x14f   : > { %v2036_v20 = vpop.eup %2035  ;;  %v966_v25 = vadd.f32 1.0, %v2034_v12  ;;  %v849_v52 = vmul.f32 0.70710677, %v2834_v9  ;;  %v777_v58 = vmul.f32 0.5, %v2778_v17  ;;  %v850_v37 = vmul.f32 0.70710677, %v2838_v55  ;;  %v725_v54 = vpop.f32.mrf.mxu1 }
 0x150   : > { %v2038_v16 = vpop.eup %2037  ;;  %1091 = vst [vmem:[#allocation2 + $0xf8] sm:$0xff] %v1027_v15  ;;  %v1029_v13 = vmul.f32 %v965_v18, %v773_v7  ;;  %v968_v36 = vadd.f32 1.0, %v2036_v20  ;;  %v852_v63 = vmul.f32 0.70710677, %v2842_v51  ;;  %v778_v43 = vmul.f32 0.5, %v2782_v19 }
 0x151   : > { %v1030_v26 = vmul.f32 %v966_v25, %v774_v28  ;;  %v967_v38 = vadd.f32 1.0, %v2038_v16  ;;  %2055 = verf.f32 %v849_v52  ;;  %v851_v44 = vmul.f32 0.70710677, %v2845_v32  ;;  %v729_v50 = vpop.f32.mrf.mxu1 }
 0x152   : > { %1093 = vst [vmem:[#allocation2 + $0x30] sm:$0xff] %v1029_v13  ;;  %v1032_v0 = vmul.f32 %v968_v36, %v776_v47  ;;  %2057 = verf.f32 %v850_v37  ;;  %v2859_v17 = vadd.f32 %v2799_v23, %v2625_v61  ;;  %v2863_v21 = vadd.f32 %v2807_v48, %v2619_v56  ;;  %v570_v13 = vpop.f32.mrf.mxu0 }
 0x153   : > { %v2040_v31 = vpop.eup %2039  ;;  %1094 = vst [vmem:[#allocation2 + $0x1e0] sm:$0xff] %v1030_v26  ;;  %v1031_v24 = vmul.f32 %v967_v38, %v775_v30  ;;  %2059 = verf.f32 %v852_v63  ;;  %v780_v49 = vmul.f32 0.5, %v2786_v22  ;;  %v2870_v1 = vadd.f32 %v2818_v53, %v2621_v57  ;;  %v731_v26 = vpop.f32.mrf.mxu1 }
 0x154   : > { %v2042_v39 = vpop.eup %2041  ;;  %1096 = vst [vmem:[#allocation2 + $0xf0] sm:$0xff] %v1032_v0  ;;  %v969_v19 = vadd.f32 1.0, %v2040_v31  ;;  %2061 = verf.f32 %v851_v44  ;;  %v779_v59 = vmul.f32 0.5, %v2791_v29  ;;  %v853_v48 = vmul.f32 0.70710677, %v2859_v17 }
 0x155   : > { %v2044_v45 = vpop.eup %2043  ;;  %1095 = vst [vmem:[#allocation2] sm:$0xff] %v1031_v24  ;;  %v970_v23 = vadd.f32 1.0, %v2042_v39  ;;  %v2875_v5 = vadd.f32 %v558_v10, %v2623_v60  ;;  %v781_v22 = vmul.f32 0.5, %v2797_v14  ;;  %v854_v42 = vmul.f32 0.70710677, %v2863_v21  ;;  %v574_v39 = vpop.f32.mrf.mxu0 }
 0x156   : > { %v2046_v40 = vpop.eup %2045  ;;  %v1033_v41 = vmul.f32 %v969_v19, %v777_v58  ;;  %v972_v3 = vadd.f32 1.0, %v2044_v45  ;;  %2063 = verf.f32 %v853_v48  ;;  %v856_v8 = vmul.f32 0.70710677, %v2870_v1 }
 0x157   : > { %v2048_v53 = vpop.eup %2047  ;;  %v1034_v7 = vmul.f32 %v970_v23, %v778_v43  ;;  %v971_v28 = vadd.f32 1.0, %v2046_v40  ;;  %v782_v10 = vmul.f32 0.5, %v2812_v46  ;;  %2065 = verf.f32 %v854_v42  ;;  %v735_v23 = vpop.f32.mrf.mxu1 }
 0x158   : > { %1097 = vst [vmem:[#allocation2 + $0x8] sm:$0xff] %v1033_v41  ;;  %v1036_v29 = vmul.f32 %v972_v3, %v780_v49  ;;  %v973_v11 = vadd.f32 1.0, %v2048_v53  ;;  %v2050_v35 = vpop.eup %2049  ;;  %2067 = verf.f32 %v856_v8  ;;  %v855_v14 = vmul.f32 0.70710677, %v2875_v5 }
 0x159   : > { %1098 = vst [vmem:[#allocation2 + $0x148] sm:$0xff] %v1034_v7  ;;  %v1035_v12 = vmul.f32 %v971_v28, %v779_v59  ;;  %v2884_v15 = vadd.f32 %v2830_v2, %v2625_v61  ;;  %v974_v25 = vadd.f32 1.0, %v2050_v35  ;;  %v2888_v47 = vadd.f32 %v2850_v34, %v2619_v56  ;;  %v576_v28 = vpop.f32.mrf.mxu0 }
 0x15a   : > { %v2052_v18 = vpop.eup %2051  ;;  %1100 = vst [vmem:[#allocation2 + $0x100] sm:$0xff] %v1036_v29  ;;  %v1037_v20 = vmul.f32 %v973_v11, %v781_v22  ;;  %v2891_v46 = vadd.f32 %v723_v4, %v2621_v57  ;;  %v784_v52 = vmul.f32 0.5, %v2816_v33  ;;  %2069 = verf.f32 %v855_v14  ;;  %v737_v11 = vpop.f32.mrf.mxu1 }
 0x15b   : > { %v2054_v30 = vpop.eup %2053  ;;  %1099 = vst [vmem:[#allocation2 + $0x1d0] sm:$0xff] %v1035_v12  ;;  %v976_v16 = vadd.f32 1.0, %v2052_v18  ;;  %v857_v2 = vmul.f32 0.70710677, %v2884_v15  ;;  %v1038_v36 = vmul.f32 %v974_v25, %v782_v10  ;;  %v783_v58 = vmul.f32 0.5, %v2822_v62 }
 0x15c   : > { %1101 = vst [vmem:[#allocation2 + $0xc8] sm:$0xff] %v1037_v20  ;;  %v975_v37 = vadd.f32 1.0, %v2054_v30  ;;  %v858_v34 = vmul.f32 0.70710677, %v2888_v47  ;;  %v785_v4 = vmul.f32 0.5, %v2834_v9  ;;  %v2901_v43 = vadd.f32 %v2865_v27, %v2623_v60 }
 0x15d   : > { %v1040_v38 = vmul.f32 %v976_v16, %v784_v52  ;;  %2071 = verf.f32 %v857_v2  ;;  %v860_v63 = vmul.f32 0.70710677, %v2891_v46  ;;  %1102 = vst [vmem:[#allocation2 + $0x40] sm:$0xff] %v1038_v36  ;;  %v2904_v62 = vadd.f32 %v725_v54, %v2625_v61 }
 0x15e   : > { %v2056_v33 = vpop.eup %2055  ;;  %v1039_v0 = vmul.f32 %v975_v37, %v783_v58  ;;  %2073 = verf.f32 %v858_v34  ;;  %v2907_v9 = vadd.f32 %v568_v6, %v2619_v56  ;;  %v2910_v24 = vadd.f32 %v729_v50, %v2621_v57 }
 0x15f   : > { %v2058_v44 = vpop.eup %2057  ;;  %1104 = vst [vmem:[#allocation2 + $0x20] sm:$0xff] %v1040_v38  ;;  %v977_v31 = vadd.f32 1.0, %v2056_v33  ;;  %2075 = verf.f32 %v860_v63  ;;  %v786_v49 = vmul.f32 0.5, %v2838_v55  ;;  %v788_v45 = vmul.f32 0.5, %v2842_v51 }
 0x160   : > { %v2060_v19 = vpop.eup %2059  ;;  %1103 = vst [vmem:[#allocation2 + $0x1f8] sm:$0xff] %v1039_v0  ;;  %v978_v27 = vadd.f32 1.0, %v2058_v44  ;;  %v859_v54 = vmul.f32 0.70710677, %v2901_v43  ;;  %v787_v41 = vmul.f32 0.5, %v2845_v32  ;;  %v789_v7 = vmul.f32 0.5, %v2859_v17 }
 0x161   : > { %v2062_v59 = vpop.eup %2061  ;;  %v1041_v48 = vmul.f32 %v977_v31, %v785_v4  ;;  %v980_v40 = vadd.f32 1.0, %v2060_v19  ;;  %v861_v3 = vmul.f32 0.70710677, %v2904_v62  ;;  %v862_v53 = vmul.f32 0.70710677, %v2907_v9 }
 0x162   : > { %v1042_v22 = vmul.f32 %v978_v27, %v786_v49  ;;  %v979_v42 = vadd.f32 1.0, %v2062_v59  ;;  %2077 = verf.f32 %v859_v54  ;;  %v864_v51 = vmul.f32 0.70710677, %v2910_v24 }
 0x163   : > { %1105 = vst [vmem:[#allocation2 + $0x128] sm:$0xff] %v1041_v48  ;;  %v1044_v55 = vmul.f32 %v980_v40, %v788_v45  ;;  %2079 = verf.f32 %v861_v3  ;;  %v2064_v8 = vpop.eup %2063  ;;  %v2921_v32 = vadd.f32 %v570_v13, %v2623_v60  ;;  %v2924_v29 = vadd.f32 %v731_v26, %v2625_v61  ;;  %v580_v13 = vpop.f32.mrf.mxu0 }
 0x164   : > { %1106 = vst [vmem:[#allocation2 + $0x1a0] sm:$0xff] %v1042_v22  ;;  %v1043_v6 = vmul.f32 %v979_v42, %v787_v41  ;;  %2081 = verf.f32 %v862_v53  ;;  %v2066_v10 = vpop.eup %2065  ;;  %v981_v50 = vadd.f32 1.0, %v2064_v8  ;;  %v2927_v17 = vadd.f32 %v574_v39, %v2619_v56 }
 0x165   : > { %1108 = vst [vmem:[#allocation2 + $0xe8] sm:$0xff] %v1044_v55  ;;  %2083 = verf.f32 %v864_v51  ;;  %v2930_v35 = vadd.f32 %v735_v23, %v2621_v57  ;;  %v2068_v12 = vpop.eup %2067  ;;  %v790_v14 = vmul.f32 0.5, %v2863_v21  ;;  %v982_v18 = vadd.f32 1.0, %v2066_v10  ;;  %v741_v21 = vpop.f32.mrf.mxu1 }
 0x166   : > { %1107 = vst [vmem:[#allocation2 + $0x1f0] sm:$0xff] %v1043_v6  ;;  %v792_v20 = vmul.f32 0.5, %v2870_v1  ;;  %v863_v25 = vmul.f32 0.70710677, %v2921_v32  ;;  %v1045_v30 = vmul.f32 %v981_v50, %v789_v7  ;;  %v984_v52 = vadd.f32 1.0, %v2068_v12  ;;  %v582_v45 = vpop.f32.mrf.mxu0 }
 0x167   : > { %v791_v16 = vmul.f32 0.5, %v2875_v5  ;;  %v865_v2 = vmul.f32 0.70710677, %v2924_v29  ;;  %v2070_v36 = vpop.eup %2069  ;;  %v1046_v58 = vmul.f32 %v982_v18, %v790_v14  ;;  %v793_v37 = vmul.f32 0.5, %v2884_v15  ;;  %v743_v48 = vpop.f32.mrf.mxu1 }
 0x168   : > { %2085 = verf.f32 %v863_v25  ;;  %v866_v34 = vmul.f32 0.70710677, %v2927_v17  ;;  %1109 = vst [vmem:[#allocation2 + $0x78] sm:$0xff] %v1045_v30  ;;  %v1048_v26 = vmul.f32 %v984_v52, %v792_v20  ;;  %v983_v1 = vadd.f32 1.0, %v2070_v36 }
 0x169   : > { %2087 = verf.f32 %v865_v2  ;;  %v868_v38 = vmul.f32 0.70710677, %v2930_v35  ;;  %1110 = vst [vmem:[#allocation2 + $0x70] sm:$0xff] %v1046_v58  ;;  %v2941_v5 = vadd.f32 %v576_v28, %v2623_v60  ;;  %v2944_v63 = vadd.f32 %v737_v11, %v2625_v61 }
 0x16a   : > { %v2072_v4 = vpop.eup %2071  ;;  %2089 = verf.f32 %v866_v34  ;;  %v2947_v15 = vadd.f32 %v580_v13, %v2619_v56  ;;  %1112 = vst [vmem:[#allocation2 + $0x1d8] sm:$0xff] %v1048_v26  ;;  %v1047_v0 = vmul.f32 %v983_v1, %v791_v16  ;;  %v2950_v31 = vadd.f32 %v741_v21, %v2621_v57 }
 0x16b   : > { %v2074_v33 = vpop.eup %2073  ;;  %v985_v44 = vadd.f32 1.0, %v2072_v4  ;;  %2091 = verf.f32 %v868_v38  ;;  %v794_v19 = vmul.f32 0.5, %v2888_v47  ;;  %v867_v27 = vmul.f32 0.70710677, %v2941_v5 }
 0x16c   : > { %v2076_v39 = vpop.eup %2075  ;;  %v986_v49 = vadd.f32 1.0, %v2074_v33  ;;  %1111 = vst [vmem:[#allocation2 + $0x90] sm:$0xff] %v1047_v0  ;;  %v796_v56 = vmul.f32 0.5, %v2891_v46  ;;  %v869_v59 = vmul.f32 0.70710677, %v2944_v63  ;;  %v2959_v22 = vadd.f32 %v582_v45, %v2623_v60 }
 0x16d   : > { %v1049_v54 = vmul.f32 %v985_v44, %v793_v37  ;;  %v988_v23 = vadd.f32 1.0, %v2076_v39  ;;  %2093 = verf.f32 %v867_v27  ;;  %v870_v57 = vmul.f32 0.70710677, %v2947_v15 }
 0x16e   : > { %v1050_v40 = vmul.f32 %v986_v49, %v794_v19  ;;  %2095 = verf.f32 %v869_v59  ;;  %v872_v47 = vmul.f32 0.70710677, %v2950_v31  ;;  %v795_v46 = vmul.f32 0.5, %v2901_v43 }
 0x16f   : > { %v2078_v41 = vpop.eup %2077  ;;  %1113 = vst [vmem:[#allocation2 + $0xd0] sm:$0xff] %v1049_v54  ;;  %v1052_v3 = vmul.f32 %v988_v23, %v796_v56  ;;  %2097 = verf.f32 %v870_v57  ;;  %v2963_v55 = vadd.f32 %v743_v48, %v2625_v61  ;;  %v797_v51 = vmul.f32 0.5, %v2904_v62 }
 0x170   : > { %v2080_v42 = vpop.eup %2079  ;;  %1114 = vst [vmem:[#allocation2 + $0xb8] sm:$0xff] %v1050_v40  ;;  %v987_v53 = vadd.f32 1.0, %v2078_v41  ;;  %2099 = verf.f32 %v872_v47  ;;  %v871_v8 = vmul.f32 0.70710677, %v2959_v22  ;;  %v798_v11 = vmul.f32 0.5, %v2907_v9 }
 0x171   : > { %v2082_v7 = vpop.eup %2081  ;;  %1116 = vst [vmem:[#allocation2 + $0xa8] sm:$0xff] %v1052_v3  ;;  %v989_v28 = vadd.f32 1.0, %v2080_v42  ;;  %v873_v43 = vmul.f32 0.70710677, %v2963_v55  ;;  %v800_v12 = vmul.f32 0.5, %v2910_v24  ;;  %v799_v25 = vmul.f32 0.5, %v2921_v32 }
 0x172   : > { %v2084_v6 = vpop.eup %2083  ;;  %v1051_v60 = vmul.f32 %v987_v53, %v795_v46  ;;  %v990_v10 = vadd.f32 1.0, %v2082_v7  ;;  %2101 = verf.f32 %v871_v8  ;;  %v801_v52 = vmul.f32 0.5, %v2924_v29 }
 0x173   : > { %v1053_v50 = vmul.f32 %v989_v28, %v797_v51  ;;  %v992_v61 = vadd.f32 1.0, %v2084_v6  ;;  %2103 = verf.f32 %v873_v43  ;;  %v802_v13 = vmul.f32 0.5, %v2927_v17 }
 0x174   : > { %1115 = vst [vmem:[#allocation2 + $0x88] sm:$0xff] %v1051_v60  ;;  %v1054_v14 = vmul.f32 %v990_v10, %v798_v11  ;;  %v804_v37 = vmul.f32 0.5, %v2930_v35  ;;  %v803_v38 = vmul.f32 0.5, %v2941_v5  ;;  %v805_v33 = vmul.f32 0.5, %v2944_v63 }
 0x175   : > { %v2086_v62 = vpop.eup %2085  ;;  %1117 = vst [vmem:[#allocation2 + $0x1c8] sm:$0xff] %v1053_v50  ;;  %v1056_v18 = vmul.f32 %v992_v61, %v800_v12  ;;  %v806_v35 = vmul.f32 0.5, %v2947_v15  ;;  %v808_v49 = vmul.f32 0.5, %v2950_v31  ;;  %v807_v23 = vmul.f32 0.5, %v2959_v22 }
 0x176   : > { %v2088_v20 = vpop.eup %2087  ;;  %1118 = vst [vmem:[#allocation2 + $0x170] sm:$0xff] %v1054_v14  ;;  %v991_v30 = vadd.f32 1.0, %v2086_v62  ;;  %v809_v63 = vmul.f32 0.5, %v2963_v55 }
 0x177   : > { %v2090_v9 = vpop.eup %2089  ;;  %1120 = vst [vmem:[#allocation2 + $0x68] sm:$0xff] %v1056_v18  ;;  %v993_v16 = vadd.f32 1.0, %v2088_v20 }
 0x178   : > { %v2092_v2 = vpop.eup %2091  ;;  %v1055_v24 = vmul.f32 %v991_v30, %v799_v25  ;;  %v994_v36 = vadd.f32 1.0, %v2090_v9 }
 0x179   : > { %v1057_v58 = vmul.f32 %v993_v16, %v801_v52  ;;  %v996_v34 = vadd.f32 1.0, %v2092_v2 }
 0x17a   : > { %1119 = vst [vmem:[#allocation2 + $0x178] sm:$0xff] %v1055_v24  ;;  %v1058_v21 = vmul.f32 %v994_v36, %v802_v13  ;;  %v2094_v26 = vpop.eup %2093 }
 0x17b   : > { %1121 = vst [vmem:[#allocation2 + $0x190] sm:$0xff] %v1057_v58  ;;  %v1060_v32 = vmul.f32 %v996_v34, %v804_v37  ;;  %v2096_v1 = vpop.eup %2095  ;;  %v995_v29 = vadd.f32 1.0, %v2094_v26 }
 0x17c   : > { %1122 = vst [vmem:[#allocation2 + $0x198] sm:$0xff] %v1058_v21  ;;  %v2098_v4 = vpop.eup %2097  ;;  %v997_v17 = vadd.f32 1.0, %v2096_v1 }
 0x17d   : > { %1124 = vst [vmem:[#allocation2 + $0xc0] sm:$0xff] %v1060_v32  ;;  %v2100_v0 = vpop.eup %2099  ;;  %v1059_v44 = vmul.f32 %v995_v29, %v803_v38  ;;  %v998_v39 = vadd.f32 1.0, %v2098_v4 }
 0x17e   : > { %v1061_v19 = vmul.f32 %v997_v17, %v805_v33  ;;  %v1000_v27 = vadd.f32 1.0, %v2100_v0 }
 0x17f   : > { %v2102_v45 = vpop.eup %2101  ;;  %1123 = vst [vmem:[#allocation2 + $0x38] sm:$0xff] %v1059_v44  ;;  %v1062_v54 = vmul.f32 %v998_v39, %v806_v35 }
 0x180   : > { %v2104_v56 = vpop.eup %2103  ;;  %1125 = vst [vmem:[#allocation2 + $0x1c0] sm:$0xff] %v1061_v19  ;;  %v1064_v5 = vmul.f32 %v1000_v27, %v808_v49  ;;  %v999_v59 = vadd.f32 1.0, %v2102_v45 }
 0x181   : > { %1126 = vst [vmem:[#allocation2 + $0x158] sm:$0xff] %v1062_v54  ;;  %v1001_v48 = vadd.f32 1.0, %v2104_v56 }
 0x182   : > { %1128 = vst [vmem:[#allocation2 + $0x58] sm:$0xff] %v1064_v5  ;;  %v1063_v15 = vmul.f32 %v999_v59, %v807_v23 }
 0x183   : > { %v1065_v40 = vmul.f32 %v1001_v48, %v809_v63 }
 0x184   : > { %1127 = vst [vmem:[#allocation2 + $0x10] sm:$0xff] %v1063_v15 }
 0x185   : > { %1129 = vst [vmem:[#allocation2 + $0xa0] sm:$0xff] %v1065_v40 }
 0x186 PF: > { %v1225_v31 = vld [vmem:[%s2411_s9 + $0xf8] sm:$0xff]  ;;  %v1224_v41 = vld [vmem:[%s2411_s9 + $0xf0] sm:$0xff]  ;;  %v1223_v47 = vld [vmem:[%s2411_s9 + $0xe8] sm:$0xff]  ;;  %s1867_s6 = sshll.u32 %s2241_s25, 6  ;;  %s1705_s10 = sshll.u32 %s2437_s23, 4  ;;  %s3187_s10 = int_to_ptr.vmem [resolvable:$true] %s1705_s10 }
 0x187   : > { %v1289_v57 = vld [vmem:[%s2411_s9 + $0x2f8] sm:$0xff]  ;;  %1334 = vmatprep.subr.mxu0 %v1225_v31  ;;  %v1288_v3 = vld [vmem:[%s2411_s9 + $0x2f0] sm:$0xff]  ;;  %v1287_v22 = vld [vmem:[%s2411_s9 + $0x2e8] sm:$0xff]  ;;  %s3276_s8 = sand.u32 1, %s2217_s19   ;;  %s2133_s11 = scalar_lea.vmem %s3187_s10, 4096 }
 0x188   : > { %1495 = vmatprep.subr.mxu1 %v1289_v57  ;;  %1335 = vmatpush1.msra.mxu0 %v1224_v41  ;;  %v1222_v42 = vld [vmem:[%s2411_s9 + $0xe0] sm:$0xff]  ;;  %v1221_v53 = vld [vmem:[%s2411_s9 + $0xd8] sm:$0xff]  ;;  %v1220_v7 = vld [vmem:[%s2411_s9 + $0xd0] sm:$0xff]  ;;  %s3193_s27 = scalar_lea.sflag [#allocation5], %s3276_s8  ;;  %p2134_p7 = scmp.ne.s32.totalorder %s3187_s10, %s2133_s11 }
 0x189   : > { %1496 = vmatpush1.msra.mxu1 %v1288_v3  ;;  %v1286_v46 = vld [vmem:[%s2411_s9 + $0x2e0] sm:$0xff]  ;;  %1336 = vmatprep.subr.mxu0 %v1223_v47  ;;  %v1285_v55 = vld [vmem:[%s2411_s9 + $0x2d8] sm:$0xff]  ;;  %v1284_v51 = vld [vmem:[%s2411_s9 + $0x2d0] sm:$0xff]  ;;  %s2260_s13 = smov [#allocation6]  }
 0x18a   : > { %1497 = vmatprep.subr.mxu1 %v1287_v22  ;;  %1337 = vmatpush1.msra.mxu0 %v1222_v42  ;;  %v1219_v28 = vld [vmem:[%s2411_s9 + $0xc8] sm:$0xff]  ;;  %v1218_v6 = vld [vmem:[%s2411_s9 + $0xc0] sm:$0xff]  ;;  %v1217_v11 = vld [vmem:[%s2411_s9 + $0xb8] sm:$0xff]  ;;  %p2135_p9 = pnand %p2134_p7, %p2384_p13  ;;  %s2137_s30 = sshll.u32 %s2260_s13, 4  ;;  %s2138_s30 = int_to_ptr.vmem [resolvable:$false] %s2137_s30 }
 0x18b   : > { %1498 = vmatpush1.msra.mxu1 %v1286_v46  ;;  %v1283_v8 = vld [vmem:[%s2411_s9 + $0x2c8] sm:$0xff]  ;;  %1338 = vmatprep.subr.mxu0 %v1221_v53  ;;  %v1282_v60 = vld [vmem:[%s2411_s9 + $0x2c0] sm:$0xff]  ;;  %v1281_v10 = vld [vmem:[%s2411_s9 + $0x2b8] sm:$0xff]  ;;  %s2139_s15 = scalar_lea.vmem %s2138_s30, 8192  ;;  %p2140_p11 = scmp.lt.s32.totalorder %s3187_s10, %s2138_s30 }
 0x18c   : > { %1499 = vmatprep.subr.mxu1 %v1285_v55  ;;  %1339 = vmatpush1.msra.mxu0 %v1220_v7  ;;  %v1216_v43 = vld [vmem:[%s2411_s9 + $0xb0] sm:$0xff]  ;;  %v1215_v12 = vld [vmem:[%s2411_s9 + $0xa8] sm:$0xff]  ;;  %v1214_v14 = vld [vmem:[%s2411_s9 + $0xa0] sm:$0xff]  ;;  %p2136_p10 = pneg %p2135_p9  ;;  %p2141_p12 = scmp.lt.s32.totalorder %s2139_s15, %s2133_s11 }
 0x18d   : > { %1500 = vmatpush1.msra.mxu1 %v1284_v51  ;;  %1340 = vmatprep.subr.mxu0 %v1219_v28  ;;  %v1280_v50 = vld [vmem:[%s2411_s9 + $0x2b0] sm:$0xff]  ;;  %v1279_v61 = vld [vmem:[%s2411_s9 + $0x2a8] sm:$0xff]  ;;  %v1278_v62 = vld [vmem:[%s2411_s9 + $0x2a0] sm:$0xff] }
 0x18e   : > { %1501 = vmatprep.subr.mxu1 %v1283_v8  ;;  %1341 = vmatpush1.msra.mxu0 %v1218_v6  ;;  %v1213_v18 = vld [vmem:[%s2411_s9 + $0x98] sm:$0xff]  ;;  %v1212_v25 = vld [vmem:[%s2411_s9 + $0x90] sm:$0xff]  ;;  %v1211_v9 = vld [vmem:[%s2411_s9 + $0x88] sm:$0xff]  ;;  %p2142_p0 = por %p2141_p12, %p2140_p11 }
 0x18f   : > { %1502 = vmatpush1.msra.mxu1 %v1282_v60  ;;  %1342 = vmatprep.subr.mxu0 %v1217_v11  ;;  %v1277_v20 = vld [vmem:[%s2411_s9 + $0x298] sm:$0xff]  ;;  %v1276_v30 = vld [vmem:[%s2411_s9 + $0x290] sm:$0xff]  ;;  %v1275_v52 = vld [vmem:[%s2411_s9 + $0x288] sm:$0xff] }
 0x190   : > { %1503 = vmatprep.subr.mxu1 %v1281_v10  ;;  %1343 = vmatpush1.msra.mxu0 %v1216_v43  ;;  %v1210_v16 = vld [vmem:[%s2411_s9 + $0x80] sm:$0xff]  ;;  %v1209_v24 = vld [vmem:[%s2411_s9 + $0x78] sm:$0xff]  ;;  %v1208_v36 = vld [vmem:[%s2411_s9 + $0x70] sm:$0xff]  ;;  %p2143_p3 = pnand %p2142_p0, %p2136_p10 }
 0x191   : > { %1504 = vmatpush1.msra.mxu1 %v1280_v50  ;;  %1344 = vmatprep.subr.mxu0 %v1215_v12  ;;  %v1274_v2 = vld [vmem:[%s2411_s9 + $0x280] sm:$0xff]  ;;  %v1273_v13 = vld [vmem:[%s2411_s9 + $0x278] sm:$0xff]  ;;  %v1272_v58 = vld [vmem:[%s2411_s9 + $0x270] sm:$0xff] }
 0x192   : > { %1505 = vmatprep.subr.mxu1 %v1279_v61  ;;  %1345 = vmatpush1.msra.mxu0 %v1214_v14  ;;  %v1207_v37 = vld [vmem:[%s2411_s9 + $0x68] sm:$0xff]  ;;  %v1206_v21 = vld [vmem:[%s2411_s9 + $0x60] sm:$0xff]  ;;  %v1205_v32 = vld [vmem:[%s2411_s9 + $0x58] sm:$0xff] }
 0x193   : > { %1506 = vmatpush1.msra.mxu1 %v1278_v62  ;;  %1346 = vmatprep.subr.mxu0 %v1213_v18  ;;  %v1271_v34 = vld [vmem:[%s2411_s9 + $0x268] sm:$0xff]  ;;  %v1270_v26 = vld [vmem:[%s2411_s9 + $0x260] sm:$0xff]  ;;  %v1269_v1 = vld [vmem:[%s2411_s9 + $0x258] sm:$0xff] }
 0x194   : > { %1507 = vmatprep.subr.mxu1 %v1277_v20  ;;  %1347 = vmatpush1.msra.mxu0 %v1212_v25  ;;  %v1204_v38 = vld [vmem:[%s2411_s9 + $0x50] sm:$0xff]  ;;  %v1203_v4 = vld [vmem:[%s2411_s9 + $0x48] sm:$0xff]  ;;  %v1202_v17 = vld [vmem:[%s2411_s9 + $0x40] sm:$0xff] }
 0x195   : > { %1508 = vmatpush1.msra.mxu1 %v1276_v30  ;;  %1348 = vmatprep.subr.mxu0 %v1211_v9  ;;  %v1268_v29 = vld [vmem:[%s2411_s9 + $0x250] sm:$0xff]  ;;  %v1267_v33 = vld [vmem:[%s2411_s9 + $0x248] sm:$0xff]  ;;  %v1266_v0 = vld [vmem:[%s2411_s9 + $0x240] sm:$0xff] }
 0x196   : > { %1509 = vmatprep.subr.mxu1 %v1275_v52  ;;  %1349 = vmatpush1.msra.mxu0 %v1210_v16  ;;  %v1201_v44 = vld [vmem:[%s2411_s9 + $0x38] sm:$0xff]  ;;  %v1200_v39 = vld [vmem:[%s2411_s9 + $0x30] sm:$0xff]  ;;  %v1199_v49 = vld [vmem:[%s2411_s9 + $0x28] sm:$0xff] }
 0x197   : > { %1510 = vmatpush1.msra.mxu1 %v1274_v2  ;;  %1350 = vmatprep.subr.mxu0 %v1209_v24  ;;  %v1265_v35 = vld [vmem:[%s2411_s9 + $0x238] sm:$0xff]  ;;  %v1264_v19 = vld [vmem:[%s2411_s9 + $0x230] sm:$0xff]  ;;  %v1263_v27 = vld [vmem:[%s2411_s9 + $0x228] sm:$0xff] }
 0x198   : > { %1511 = vmatprep.subr.mxu1 %v1273_v13  ;;  %1351 = vmatpush1.msra.mxu0 %v1208_v36  ;;  %v1198_v45 = vld [vmem:[%s2411_s9 + $0x20] sm:$0xff]  ;;  %v1197_v56 = vld [vmem:[%s2411_s9 + $0x18] sm:$0xff]  ;;  %v1196_v23 = vld [vmem:[%s2411_s9 + $0x10] sm:$0xff] }
 0x199   : > { %1512 = vmatpush1.msra.mxu1 %v1272_v58  ;;  %1352 = vmatprep.subr.mxu0 %v1207_v37  ;;  %v1262_v54 = vld [vmem:[%s2411_s9 + $0x220] sm:$0xff]  ;;  %v1261_v5 = vld [vmem:[%s2411_s9 + $0x218] sm:$0xff]  ;;  %v1260_v59 = vld [vmem:[%s2411_s9 + $0x210] sm:$0xff] }
 0x19a   : > { %1513 = vmatprep.subr.mxu1 %v1271_v34  ;;  %1353 = vmatpush1.msra.mxu0 %v1206_v21  ;;  %v1195_v63 = vld [vmem:[%s2411_s9 + $0x8] sm:$0xff]  ;;  %v1194_v15 = vld [vmem:[%s2411_s9] sm:$0xff]  ;;  %v1257_v31 = vld [vmem:[%s2411_s9 + $0x1f8] sm:$0xff] }
 0x19b   : > { %1514 = vmatpush1.msra.mxu1 %v1270_v26  ;;  %1354 = vmatprep.subr.mxu0 %v1205_v32  ;;  %v1259_v48 = vld [vmem:[%s2411_s9 + $0x208] sm:$0xff]  ;;  %v1258_v40 = vld [vmem:[%s2411_s9 + $0x200] sm:$0xff]  ;;  %v1321_v57 = vld [vmem:[%s2411_s9 + $0x3f8] sm:$0xff] }
 0x19c   : > { %1515 = vmatprep.subr.mxu1 %v1269_v1  ;;  %1355 = vmatpush1.msra.mxu0 %v1204_v38  ;;  %v1256_v41 = vld [vmem:[%s2411_s9 + $0x1f0] sm:$0xff]  ;;  %v1255_v47 = vld [vmem:[%s2411_s9 + $0x1e8] sm:$0xff]  ;;  %v1254_v42 = vld [vmem:[%s2411_s9 + $0x1e0] sm:$0xff] }
 0x19d   : > { %1516 = vmatpush1.msra.mxu1 %v1268_v29  ;;  %1356 = vmatprep.subr.mxu0 %v1203_v4  ;;  %v1320_v3 = vld [vmem:[%s2411_s9 + $0x3f0] sm:$0xff]  ;;  %v1319_v22 = vld [vmem:[%s2411_s9 + $0x3e8] sm:$0xff]  ;;  %v1318_v46 = vld [vmem:[%s2411_s9 + $0x3e0] sm:$0xff] }
 0x19e   : > { %1517 = vmatprep.subr.mxu1 %v1267_v33  ;;  %1357 = vmatpush1.msra.mxu0 %v1202_v17  ;;  %v1253_v53 = vld [vmem:[%s2411_s9 + $0x1d8] sm:$0xff]  ;;  %v1252_v7 = vld [vmem:[%s2411_s9 + $0x1d0] sm:$0xff]  ;;  %v1251_v28 = vld [vmem:[%s2411_s9 + $0x1c8] sm:$0xff] }
 0x19f   : > { %1518 = vmatpush1.msra.mxu1 %v1266_v0  ;;  %1358 = vmatprep.subr.mxu0 %v1201_v44  ;;  %v1317_v55 = vld [vmem:[%s2411_s9 + $0x3d8] sm:$0xff]  ;;  %v1316_v51 = vld [vmem:[%s2411_s9 + $0x3d0] sm:$0xff]  ;;  %v1315_v8 = vld [vmem:[%s2411_s9 + $0x3c8] sm:$0xff] }
 0x1a0   : > { %1519 = vmatprep.subr.mxu1 %v1265_v35  ;;  %1359 = vmatpush1.msra.mxu0 %v1200_v39  ;;  %v1250_v6 = vld [vmem:[%s2411_s9 + $0x1c0] sm:$0xff]  ;;  %v1249_v11 = vld [vmem:[%s2411_s9 + $0x1b8] sm:$0xff]  ;;  %v1248_v43 = vld [vmem:[%s2411_s9 + $0x1b0] sm:$0xff] }
 0x1a1   : > { %1520 = vmatpush1.msra.mxu1 %v1264_v19  ;;  %1360 = vmatprep.subr.mxu0 %v1199_v49  ;;  %v1314_v60 = vld [vmem:[%s2411_s9 + $0x3c0] sm:$0xff]  ;;  %v1313_v10 = vld [vmem:[%s2411_s9 + $0x3b8] sm:$0xff]  ;;  %v1312_v50 = vld [vmem:[%s2411_s9 + $0x3b0] sm:$0xff] }
 0x1a2   : > { %1521 = vmatprep.subr.mxu1 %v1263_v27  ;;  %1361 = vmatpush1.msra.mxu0 %v1198_v45  ;;  %v1247_v12 = vld [vmem:[%s2411_s9 + $0x1a8] sm:$0xff]  ;;  %v1246_v14 = vld [vmem:[%s2411_s9 + $0x1a0] sm:$0xff]  ;;  %v1245_v18 = vld [vmem:[%s2411_s9 + $0x198] sm:$0xff] }
 0x1a3   : > { %1522 = vmatpush1.msra.mxu1 %v1262_v54  ;;  %1362 = vmatprep.subr.mxu0 %v1197_v56  ;;  %v1311_v61 = vld [vmem:[%s2411_s9 + $0x3a8] sm:$0xff]  ;;  %v1310_v62 = vld [vmem:[%s2411_s9 + $0x3a0] sm:$0xff]  ;;  %v1309_v20 = vld [vmem:[%s2411_s9 + $0x398] sm:$0xff] }
 0x1a4   : > { %1523 = vmatprep.subr.mxu1 %v1261_v5  ;;  %1363 = vmatpush1.msra.mxu0 %v1196_v23  ;;  %v1244_v25 = vld [vmem:[%s2411_s9 + $0x190] sm:$0xff]  ;;  %v1243_v9 = vld [vmem:[%s2411_s9 + $0x188] sm:$0xff]  ;;  %v1242_v16 = vld [vmem:[%s2411_s9 + $0x180] sm:$0xff] }
 0x1a5   : > { %1524 = vmatpush1.msra.mxu1 %v1260_v59  ;;  %1364 = vmatprep.subr.mxu0 %v1195_v63  ;;  %v1308_v30 = vld [vmem:[%s2411_s9 + $0x390] sm:$0xff]  ;;  %v1307_v52 = vld [vmem:[%s2411_s9 + $0x388] sm:$0xff]  ;;  %v1306_v2 = vld [vmem:[%s2411_s9 + $0x380] sm:$0xff] }
 0x1a6   : > { %1525 = vmatprep.subr.mxu1 %v1259_v48  ;;  %1365 = vmatpush1.msra.mxu0 %v1194_v15  ;;  %v1241_v24 = vld [vmem:[%s2411_s9 + $0x178] sm:$0xff]  ;;  %v1240_v36 = vld [vmem:[%s2411_s9 + $0x170] sm:$0xff]  ;;  %v1239_v37 = vld [vmem:[%s2411_s9 + $0x168] sm:$0xff] }
 0x1a7   : > { %1526 = vmatpush1.msra.mxu1 %v1258_v40  ;;  %1366 = vmatprep.subr.mxu0 %v1257_v31  ;;  %v1305_v13 = vld [vmem:[%s2411_s9 + $0x378] sm:$0xff]  ;;  %v1304_v58 = vld [vmem:[%s2411_s9 + $0x370] sm:$0xff]  ;;  %v1303_v34 = vld [vmem:[%s2411_s9 + $0x368] sm:$0xff] }
 0x1a8   : > { %1527 = vmatprep.subr.mxu1 %v1321_v57  ;;  %1367 = vmatpush2.msra.mxu0 %v1256_v41  ;;  %v1238_v21 = vld [vmem:[%s2411_s9 + $0x160] sm:$0xff]  ;;  %v1237_v32 = vld [vmem:[%s2411_s9 + $0x158] sm:$0xff]  ;;  %v1236_v38 = vld [vmem:[%s2411_s9 + $0x150] sm:$0xff] }
 0x1a9   : > { %1528 = vmatpush2.msra.mxu1 %v1320_v3  ;;  %1368 = vmatprep.subr.mxu0 %v1255_v47  ;;  %v1302_v26 = vld [vmem:[%s2411_s9 + $0x360] sm:$0xff]  ;;  %v1301_v1 = vld [vmem:[%s2411_s9 + $0x358] sm:$0xff]  ;;  %v1300_v29 = vld [vmem:[%s2411_s9 + $0x350] sm:$0xff] }
 0x1aa   : > { %1529 = vmatprep.subr.mxu1 %v1319_v22  ;;  %1369 = vmatpush2.msra.mxu0 %v1254_v42  ;;  %v1235_v4 = vld [vmem:[%s2411_s9 + $0x148] sm:$0xff]  ;;  %v1234_v17 = vld [vmem:[%s2411_s9 + $0x140] sm:$0xff]  ;;  %v1233_v44 = vld [vmem:[%s2411_s9 + $0x138] sm:$0xff] }
 0x1ab   : > { %1530 = vmatpush2.msra.mxu1 %v1318_v46  ;;  %1370 = vmatprep.subr.mxu0 %v1253_v53  ;;  %v1299_v33 = vld [vmem:[%s2411_s9 + $0x348] sm:$0xff]  ;;  %v1298_v0 = vld [vmem:[%s2411_s9 + $0x340] sm:$0xff]  ;;  %v1297_v35 = vld [vmem:[%s2411_s9 + $0x338] sm:$0xff] }
 0x1ac   : > { %1531 = vmatprep.subr.mxu1 %v1317_v55  ;;  %1371 = vmatpush2.msra.mxu0 %v1252_v7  ;;  %v1232_v39 = vld [vmem:[%s2411_s9 + $0x130] sm:$0xff]  ;;  %v1231_v49 = vld [vmem:[%s2411_s9 + $0x128] sm:$0xff]  ;;  %v1230_v45 = vld [vmem:[%s2411_s9 + $0x120] sm:$0xff] }
 0x1ad   : > { %1532 = vmatpush2.msra.mxu1 %v1316_v51  ;;  %1372 = vmatprep.subr.mxu0 %v1251_v28  ;;  %v1296_v19 = vld [vmem:[%s2411_s9 + $0x330] sm:$0xff]  ;;  %v1295_v27 = vld [vmem:[%s2411_s9 + $0x328] sm:$0xff]  ;;  %v1294_v54 = vld [vmem:[%s2411_s9 + $0x320] sm:$0xff] }
 0x1ae   : > { %1533 = vmatprep.subr.mxu1 %v1315_v8  ;;  %1373 = vmatpush2.msra.mxu0 %v1250_v6  ;;  %v1229_v56 = vld [vmem:[%s2411_s9 + $0x118] sm:$0xff]  ;;  %v1228_v23 = vld [vmem:[%s2411_s9 + $0x110] sm:$0xff]  ;;  %v1227_v63 = vld [vmem:[%s2411_s9 + $0x108] sm:$0xff] }
 0x1af   : > { %1534 = vmatpush2.msra.mxu1 %v1314_v60  ;;  %1374 = vmatprep.subr.mxu0 %v1249_v11  ;;  %v1293_v5 = vld [vmem:[%s2411_s9 + $0x318] sm:$0xff]  ;;  %v1292_v59 = vld [vmem:[%s2411_s9 + $0x310] sm:$0xff]  ;;  %v1291_v48 = vld [vmem:[%s2411_s9 + $0x308] sm:$0xff] }
 0x1b0   : > { %1535 = vmatprep.subr.mxu1 %v1313_v10  ;;  %1375 = vmatpush2.msra.mxu0 %v1248_v43  ;;  %v1226_v15 = vld [vmem:[%s2411_s9 + $0x100] sm:$0xff]  ;;  %v1131_v40 = vld [vmem:[#allocation2 + $0x1b0] sm:$0xff]  ;;  %v1133_v57 = vld [vmem:[#allocation2 + $0x18] sm:$0xff] }
 0x1b1   : > { %1536 = vmatpush2.msra.mxu1 %v1312_v50  ;;  %1376 = vmatprep.subr.mxu0 %v1247_v12  ;;  %v1290_v31 = vld [vmem:[%s2411_s9 + $0x300] sm:$0xff]  ;;  %v1130_v41 = vld [vmem:[#allocation2 + $0xb0] sm:$0xff]  ;;  %v1132_v3 = vld [vmem:[#allocation2 + $0xd8] sm:$0xff] }
 0x1b2   : > { %1537 = vmatprep.subr.mxu1 %v1311_v61  ;;  %1377 = vmatpush2.msra.mxu0 %v1246_v14  ;;  %v1135_v47 = vld [vmem:[#allocation2 + $0x168] sm:$0xff]  ;;  %v1134_v42 = vld [vmem:[#allocation2 + $0x50] sm:$0xff]  ;;  %v1141_v55 = vld [vmem:[#allocation2 + $0x98] sm:$0xff] }
 0x1b3   : > { %1538 = vmatpush2.msra.mxu1 %v1310_v62  ;;  %1378 = vmatprep.subr.mxu0 %v1245_v18  ;;  %v1137_v22 = vld [vmem:[#allocation2 + $0x48] sm:$0xff]  ;;  %v1136_v46 = vld [vmem:[#allocation2 + $0x130] sm:$0xff]  ;;  %v1138_v7 = vld [vmem:[#allocation2 + $0x180] sm:$0xff] }
 0x1b4   : > { %1539 = vmatprep.subr.mxu1 %v1309_v20  ;;  %1379 = vmatpush2.msra.mxu0 %v1244_v25  ;;  %v1139_v53 = vld [vmem:[#allocation2 + $0x110] sm:$0xff]  ;;  %v1140_v51 = vld [vmem:[#allocation2 + $0x118] sm:$0xff]  ;;  %v1145_v8 = vld [vmem:[#allocation2 + $0x60] sm:$0xff] }
 0x1b5   : > { %1540 = vmatpush2.msra.mxu1 %v1308_v30  ;;  %1380 = vmatprep.subr.mxu0 %v1243_v9  ;;  %v1143_v28 = vld [vmem:[#allocation2 + $0x150] sm:$0xff]  ;;  %v1142_v6 = vld [vmem:[#allocation2 + $0x120] sm:$0xff]  ;;  %v1144_v60 = vld [vmem:[#allocation2 + $0x108] sm:$0xff] }
 0x1b6   : > { %1541 = vmatprep.subr.mxu1 %v1307_v52  ;;  %1381 = vmatpush2.msra.mxu0 %v1242_v16  ;;  %v1147_v11 = vld [vmem:[#allocation2 + $0x188] sm:$0xff]  ;;  %v1149_v10 = vld [vmem:[#allocation2 + $0x140] sm:$0xff]  ;;  %v1148_v50 = vld [vmem:[#allocation2 + $0x138] sm:$0xff] }
 0x1b7   : > { %1542 = vmatpush2.msra.mxu1 %v1306_v2  ;;  %1382 = vmatprep.subr.mxu0 %v1241_v24  ;;  %v1146_v43 = vld [vmem:[#allocation2 + $0xe0] sm:$0xff]  ;;  %v1151_v12 = vld [vmem:[#allocation2 + $0x1a8] sm:$0xff]  ;;  %v1152_v62 = vld [vmem:[#allocation2 + $0x1b8] sm:$0xff] }
 0x1b8   : > { %1543 = vmatprep.subr.mxu1 %v1305_v13  ;;  %1383 = vmatpush2.msra.mxu0 %v1240_v36  ;;  %v1153_v61 = vld [vmem:[#allocation2 + $0x28] sm:$0xff]  ;;  %v1150_v14 = vld [vmem:[#allocation2 + $0x80] sm:$0xff]  ;;  %v1155_v18 = vld [vmem:[#allocation2 + $0xf8] sm:$0xff] }
 0x1b9   : > { %1544 = vmatpush2.msra.mxu1 %v1304_v58  ;;  %1384 = vmatprep.subr.mxu0 %v1239_v37  ;;  %v1157_v20 = vld [vmem:[#allocation2 + $0x30] sm:$0xff]  ;;  %v1154_v25 = vld [vmem:[#allocation2 + $0x1e8] sm:$0xff]  ;;  %v1156_v30 = vld [vmem:[#allocation2 + $0x160] sm:$0xff] }
 0x1ba   : > { %1545 = vmatprep.subr.mxu1 %v1303_v34  ;;  %1385 = vmatpush2.msra.mxu0 %v1238_v21  ;;  %v1159_v9 = vld [vmem:[#allocation2] sm:$0xff]  ;;  %v1161_v52 = vld [vmem:[#allocation2 + $0x8] sm:$0xff]  ;;  %v1160_v2 = vld [vmem:[#allocation2 + $0xf0] sm:$0xff] }
 0x1bb   : > { %1546 = vmatpush2.msra.mxu1 %v1302_v26  ;;  %1386 = vmatprep.subr.mxu0 %v1237_v32  ;;  %v1158_v16 = vld [vmem:[#allocation2 + $0x1e0] sm:$0xff]  ;;  %v1163_v24 = vld [vmem:[#allocation2 + $0x1d0] sm:$0xff]  ;;  %v1165_v13 = vld [vmem:[#allocation2 + $0xc8] sm:$0xff] }
 0x1bc   : > { %1547 = vmatprep.subr.mxu1 %v1301_v1  ;;  %1387 = vmatpush2.msra.mxu0 %v1236_v38  ;;  %v1162_v36 = vld [vmem:[#allocation2 + $0x148] sm:$0xff]  ;;  %v1164_v58 = vld [vmem:[#allocation2 + $0x100] sm:$0xff]  ;;  %v1167_v37 = vld [vmem:[#allocation2 + $0x1f8] sm:$0xff] }
 0x1bd   : > { %1548 = vmatpush2.msra.mxu1 %v1300_v29  ;;  %1388 = vmatprep.subr.mxu0 %v1235_v4  ;;  %v1169_v34 = vld [vmem:[#allocation2 + $0x128] sm:$0xff]  ;;  %v1166_v21 = vld [vmem:[#allocation2 + $0x40] sm:$0xff]  ;;  %v1171_v32 = vld [vmem:[#allocation2 + $0x1f0] sm:$0xff] }
 0x1be   : > { %1549 = vmatprep.subr.mxu1 %v1299_v33  ;;  %1389 = vmatpush2.msra.mxu0 %v1234_v17  ;;  %v1168_v26 = vld [vmem:[#allocation2 + $0x20] sm:$0xff]  ;;  %v1173_v1 = vld [vmem:[#allocation2 + $0x78] sm:$0xff]  ;;  %v1172_v29 = vld [vmem:[#allocation2 + $0xe8] sm:$0xff] }
 0x1bf   : > { %1550 = vmatpush2.msra.mxu1 %v1298_v0  ;;  %1390 = vmatprep.subr.mxu0 %v1233_v44  ;;  %v1170_v38 = vld [vmem:[#allocation2 + $0x1a0] sm:$0xff]  ;;  %v1175_v4 = vld [vmem:[#allocation2 + $0x90] sm:$0xff]  ;;  %v1176_v0 = vld [vmem:[#allocation2 + $0x1d8] sm:$0xff] }
 0x1c0   : > { %1551 = vmatprep.subr.mxu1 %v1297_v35  ;;  %1391 = vmatpush2.msra.mxu0 %v1232_v39  ;;  %v1177_v33 = vld [vmem:[#allocation2 + $0xd0] sm:$0xff]  ;;  %v1179_v44 = vld [vmem:[#allocation2 + $0x88] sm:$0xff]  ;;  %v1178_v39 = vld [vmem:[#allocation2 + $0xb8] sm:$0xff] }
 0x1c1   : > { %1552 = vmatpush2.msra.mxu1 %v1296_v19  ;;  %1392 = vmatprep.subr.mxu0 %v1231_v49  ;;  %v1174_v17 = vld [vmem:[#allocation2 + $0x70] sm:$0xff]  ;;  %v1181_v35 = vld [vmem:[#allocation2 + $0x1c8] sm:$0xff]  ;;  %v1183_v49 = vld [vmem:[#allocation2 + $0x178] sm:$0xff] }
 0x1c2   : > { %1553 = vmatprep.subr.mxu1 %v1295_v27  ;;  %1393 = vmatpush2.msra.mxu0 %v1230_v45  ;;  %v1180_v19 = vld [vmem:[#allocation2 + $0xa8] sm:$0xff]  ;;  %v1185_v27 = vld [vmem:[#allocation2 + $0x190] sm:$0xff] }
 0x1c3   : > { %1554 = vmatpush2.msra.mxu1 %v1294_v54  ;;  %1394 = vmatprep.subr.mxu0 %v1229_v56  ;;  %v1182_v45 = vld [vmem:[#allocation2 + $0x170] sm:$0xff]  ;;  %v1184_v54 = vld [vmem:[#allocation2 + $0x68] sm:$0xff]  ;;  %v1187_v56 = vld [vmem:[#allocation2 + $0x38] sm:$0xff] }
 0x1c4   : > { %1555 = vmatprep.subr.mxu1 %v1293_v5  ;;  %1395 = vmatpush2.msra.mxu0 %v1228_v23  ;;  %v1189_v5 = vld [vmem:[#allocation2 + $0x1c0] sm:$0xff]  ;;  %v1186_v23 = vld [vmem:[#allocation2 + $0x198] sm:$0xff] }
 0x1c5   : > { %1556 = vmatpush2.msra.mxu1 %v1292_v59  ;;  %1396 = vmatprep.subr.mxu0 %v1227_v63  ;;  %v1188_v59 = vld [vmem:[#allocation2 + $0xc0] sm:$0xff]  ;;  %v1191_v63 = vld [vmem:[#allocation2 + $0x10] sm:$0xff] }
 0x1c6   : > { %1557 = vmatprep.subr.mxu1 %v1291_v48  ;;  %1397 = vmatpush2.msra.mxu0 %v1226_v15  ;;  %v1193_v48 = vld [vmem:[#allocation2 + $0xa0] sm:$0xff]  ;;  %v1190_v15 = vld [vmem:[#allocation2 + $0x158] sm:$0xff] }
 0x1c7   : > { %1398 = vmatprep.mubr.f32.mxu0 %v1131_v40  ;;  %1558 = vmatpush2.msra.mxu1 %v1290_v31  ;;  %v1192_v40 = vld [vmem:[#allocation2 + $0x58] sm:$0xff]  ;;  %v1324_v31 = vlaneseq }
 0x1c8   : > { %1559 = vmatprep.mubr.f32.mxu1 %v1133_v57  ;;  %1399 = vmatmul.mubr.f32.vlgmr.msra.gmra.mxu0 %v1130_v41 }
 0x1c9   : > { %1560 = vmatmul.mubr.f32.vlgmr.msra.gmra.mxu1 %v1132_v3  ;;  %1404 = vmatprep.mubr.f32.mxu0 %v1135_v47  ;;  %v1325_v57 = vshrl.u32 %v1324_v31, 7  ;;  %v1322_v3 = vld [vmem:[%s297_s26] sm:$0x3]  ;;  %s1702_s26 = sadd.s32 %s1867_s6, %s2422_s29 }
 0x1ca   : > { %1565 = vmatprep.mubr.f32.mxu1 %v1137_v22  ;;  %s1863_s25 = sshll.u32 %s1702_s26, 7 }
 0x1cb   : > { %v1326_v41 = vsub.s32 0, %v1325_v57  ;;  %v1330_v47 = vsub.s32 1, %v1325_v57  ;;  %s3185_s24 = scalar_lea.hbm %s3258_s5, %s1863_s25 }
 0x1cc   : > { %1405 = vmatmul.mubr.f32.gmra.mxu0 %v1134_v42 }
 0x1cd   : > { %1566 = vmatmul.mubr.f32.gmra.mxu1 %v1136_v46  ;;  %1410 = vmatprep.mubr.f32.mxu0 %v1139_v53  ;;  %v3113_v22 = vrot.slane %v1322_v3, %v1326_v41  ;;  %v3115_v42 = vrot.slane %v1322_v3, %v1330_v47 }
 0x1ce   : > { %1571 = vmatprep.mubr.f32.mxu1 %v1141_v55 }
 0x1d0   : > { %1411 = vmatmul.mubr.f32.gmra.mxu0 %v1138_v7 }
 0x1d1   : > { %1572 = vmatmul.mubr.f32.gmra.mxu1 %v1140_v51  ;;  %1416 = vmatprep.mubr.f32.mxu0 %v1143_v28 }
 0x1d2   : > { %1577 = vmatprep.mubr.f32.mxu1 %v1145_v8 }
 0x1d4   : > { %1417 = vmatmul.mubr.f32.gmra.mxu0 %v1142_v6 }
 0x1d5   : > { %1578 = vmatmul.mubr.f32.gmra.mxu1 %v1144_v60  ;;  %1422 = vmatprep.mubr.f32.mxu0 %v1147_v11 }
 0x1d6   : > { %1583 = vmatprep.mubr.f32.mxu1 %v1149_v10 }
 0x1d8   : > { %1423 = vmatmul.mubr.f32.gmra.mxu0 %v1146_v43 }
 0x1d9   : > { %1584 = vmatmul.mubr.f32.gmra.mxu1 %v1148_v50  ;;  %1428 = vmatprep.mubr.f32.mxu0 %v1151_v12 }
 0x1da   : > { %1589 = vmatprep.mubr.f32.mxu1 %v1153_v61 }
 0x1dc   : > { %1429 = vmatmul.mubr.f32.gmra.mxu0 %v1150_v14 }
 0x1dd   : > { %1590 = vmatmul.mubr.f32.gmra.mxu1 %v1152_v62  ;;  %1434 = vmatprep.mubr.f32.mxu0 %v1155_v18 }
 0x1de   : > { %1595 = vmatprep.mubr.f32.mxu1 %v1157_v20 }
 0x1e0   : > { %1435 = vmatmul.mubr.f32.gmra.mxu0 %v1154_v25 }
 0x1e1   : > { %1596 = vmatmul.mubr.f32.gmra.mxu1 %v1156_v30  ;;  %1440 = vmatprep.mubr.f32.mxu0 %v1159_v9 }
 0x1e2   : > { %1601 = vmatprep.mubr.f32.mxu1 %v1161_v52 }
 0x1e4   : > { %1441 = vmatmul.mubr.f32.gmra.mxu0 %v1158_v16 }
 0x1e5   : > { %1602 = vmatmul.mubr.f32.gmra.mxu1 %v1160_v2  ;;  %1446 = vmatprep.mubr.f32.mxu0 %v1163_v24 }
 0x1e6   : > { %1607 = vmatprep.mubr.f32.mxu1 %v1165_v13 }
 0x1e8   : > { %1447 = vmatmul.mubr.f32.gmra.mxu0 %v1162_v36 }
 0x1e9   : > { %1608 = vmatmul.mubr.f32.gmra.mxu1 %v1164_v58  ;;  %1452 = vmatprep.mubr.f32.mxu0 %v1167_v37 }
 0x1ea   : > { %1613 = vmatprep.mubr.f32.mxu1 %v1169_v34 }
 0x1ec   : > { %1453 = vmatmul.mubr.f32.gmra.mxu0 %v1166_v21 }
 0x1ed   : > { %1614 = vmatmul.mubr.f32.gmra.mxu1 %v1168_v26  ;;  %1458 = vmatprep.mubr.f32.mxu0 %v1171_v32 }
 0x1ee   : > { %1619 = vmatprep.mubr.f32.mxu1 %v1173_v1 }
 0x1f0   : > { %1459 = vmatmul.mubr.f32.gmra.mxu0 %v1170_v38 }
 0x1f1   : > { %1620 = vmatmul.mubr.f32.gmra.mxu1 %v1172_v29  ;;  %1464 = vmatprep.mubr.f32.mxu0 %v1175_v4 }
 0x1f2   : > { %1625 = vmatprep.mubr.f32.mxu1 %v1177_v33 }
 0x1f4   : > { %1465 = vmatmul.mubr.f32.gmra.mxu0 %v1174_v17 }
 0x1f5   : > { %1626 = vmatmul.mubr.f32.gmra.mxu1 %v1176_v0  ;;  %1470 = vmatprep.mubr.f32.mxu0 %v1179_v44 }
 0x1f6   : > { %1631 = vmatprep.mubr.f32.mxu1 %v1181_v35 }
 0x1f8   : > { %1471 = vmatmul.mubr.f32.gmra.mxu0 %v1178_v39 }
 0x1f9   : > { %1632 = vmatmul.mubr.f32.gmra.mxu1 %v1180_v19  ;;  %1476 = vmatprep.mubr.f32.mxu0 %v1183_v49 }
 0x1fa   : > { %1637 = vmatprep.mubr.f32.mxu1 %v1185_v27 }
 0x1fc   : > { %1477 = vmatmul.mubr.f32.gmra.mxu0 %v1182_v45 }
 0x1fd   : > { %1638 = vmatmul.mubr.f32.gmra.mxu1 %v1184_v54  ;;  %1482 = vmatprep.mubr.f32.mxu0 %v1187_v56 }
 0x1fe   : > { %1643 = vmatprep.mubr.f32.mxu1 %v1189_v5 }
 0x200   : > { %1483 = vmatmul.mubr.f32.gmra.mxu0 %v1186_v23 }
 0x201   : > { %1644 = vmatmul.mubr.f32.gmra.mxu1 %v1188_v59  ;;  %1488 = vmatprep.mubr.f32.mxu0 %v1191_v63 }
 0x202   : > { %1649 = vmatprep.mubr.f32.mxu1 %v1193_v48 }
 0x204   : > { %1489 = vmatmul.mubr.f32.gmra.mxu0 %v1190_v15 }
 0x205   : > { %1650 = vmatmul.mubr.f32.gmra.mxu1 %v1192_v40 }
 0x288   : > { %v1400_v46 = vpop.f32.mrf.mxu0 }
 0x289   : > { %v1561_v53 = vpop.f32.mrf.mxu1  ;;  %v1401_v55 = vadd.f32 %v1400_v46, %v3113_v22 }
 0x28a   : > { %v1402_v7 = vpop.f32.mrf.mxu0 }
 0x28b   : > { %v1563_v51 = vpop.f32.mrf.mxu1  ;;  %v1562_v28 = vadd.f32 %v1561_v53, %v1401_v55  ;;  %v1403_v8 = vadd.f32 %v1402_v7, %v3115_v42 }
 0x28c   : > { %v1406_v6 = vpop.f32.mrf.mxu0 }
 0x28d   : > { %v1567_v60 = vpop.f32.mrf.mxu1  ;;  %1656 = vst [vmem:[%s2437_s23] sm:$0xff] %v1562_v28  ;;  %v1564_v11 = vadd.f32 %v1563_v51, %v1403_v8  ;;  %v1407_v10 = vadd.f32 %v1406_v6, %v3113_v22 }
 0x28e   : > { %v1408_v43 = vpop.f32.mrf.mxu0 }
 0x28f   : > { %v1569_v50 = vpop.f32.mrf.mxu1  ;;  %1657 = vst [vmem:[%s2437_s23 + $0x8] sm:$0xff] %v1564_v11  ;;  %v1568_v12 = vadd.f32 %v1567_v60, %v1407_v10  ;;  %v1409_v61 = vadd.f32 %v1408_v43, %v3115_v42 }
 0x290   : > { %v1412_v14 = vpop.f32.mrf.mxu0 }
 0x291   : > { %v1573_v62 = vpop.f32.mrf.mxu1  ;;  %1658 = vst [vmem:[%s2437_s23 + $0x10] sm:$0xff] %v1568_v12  ;;  %v1570_v18 = vadd.f32 %v1569_v50, %v1409_v61  ;;  %v1413_v20 = vadd.f32 %v1412_v14, %v3113_v22 }
 0x292   : > { %v1414_v25 = vpop.f32.mrf.mxu0 }
 0x293   : > { %v1575_v30 = vpop.f32.mrf.mxu1  ;;  %1659 = vst [vmem:[%s2437_s23 + $0x18] sm:$0xff] %v1570_v18  ;;  %v1574_v9 = vadd.f32 %v1573_v62, %v1413_v20  ;;  %v1415_v52 = vadd.f32 %v1414_v25, %v3115_v42 }
 0x294   : > { %v1418_v16 = vpop.f32.mrf.mxu0 }
 0x295   : > { %v1579_v2 = vpop.f32.mrf.mxu1  ;;  %1660 = vst [vmem:[%s2437_s23 + $0x20] sm:$0xff] %v1574_v9  ;;  %v1576_v24 = vadd.f32 %v1575_v30, %v1415_v52  ;;  %v1419_v13 = vadd.f32 %v1418_v16, %v3113_v22 }
 0x296   : > { %v1420_v36 = vpop.f32.mrf.mxu0 }
 0x297   : > { %v1581_v58 = vpop.f32.mrf.mxu1  ;;  %1661 = vst [vmem:[%s2437_s23 + $0x28] sm:$0xff] %v1576_v24  ;;  %v1580_v37 = vadd.f32 %v1579_v2, %v1419_v13  ;;  %v1421_v34 = vadd.f32 %v1420_v36, %v3115_v42 }
 0x298   : > { %v1424_v21 = vpop.f32.mrf.mxu0 }
 0x299   : > { %v1585_v26 = vpop.f32.mrf.mxu1  ;;  %1662 = vst [vmem:[%s2437_s23 + $0x30] sm:$0xff] %v1580_v37  ;;  %v1582_v32 = vadd.f32 %v1581_v58, %v1421_v34  ;;  %v1425_v1 = vadd.f32 %v1424_v21, %v3113_v22 }
 0x29a   : > { %v1426_v38 = vpop.f32.mrf.mxu0 }
 0x29b   : > { %v1587_v29 = vpop.f32.mrf.mxu1  ;;  %1663 = vst [vmem:[%s2437_s23 + $0x38] sm:$0xff] %v1582_v32  ;;  %v1586_v4 = vadd.f32 %v1585_v26, %v1425_v1  ;;  %v1427_v33 = vadd.f32 %v1426_v38, %v3115_v42 }
 0x29c   : > { %v1430_v17 = vpop.f32.mrf.mxu0 }
 0x29d   : > { %v1591_v0 = vpop.f32.mrf.mxu1  ;;  %1664 = vst [vmem:[%s2437_s23 + $0x40] sm:$0xff] %v1586_v4  ;;  %v1588_v44 = vadd.f32 %v1587_v29, %v1427_v33  ;;  %v1431_v35 = vadd.f32 %v1430_v17, %v3113_v22 }
 0x29e   : > { %v1432_v39 = vpop.f32.mrf.mxu0 }
 0x29f   : > { %v1593_v19 = vpop.f32.mrf.mxu1  ;;  %1665 = vst [vmem:[%s2437_s23 + $0x48] sm:$0xff] %v1588_v44  ;;  %v1592_v49 = vadd.f32 %v1591_v0, %v1431_v35  ;;  %v1433_v27 = vadd.f32 %v1432_v39, %v3115_v42 }
 0x2a0   : > { %v1436_v45 = vpop.f32.mrf.mxu0 }
 0x2a1   : > { %v1597_v54 = vpop.f32.mrf.mxu1  ;;  %1666 = vst [vmem:[%s2437_s23 + $0x50] sm:$0xff] %v1592_v49  ;;  %v1594_v56 = vadd.f32 %v1593_v19, %v1433_v27  ;;  %v1437_v5 = vadd.f32 %v1436_v45, %v3113_v22 }
 0x2a2   : > { %v1438_v23 = vpop.f32.mrf.mxu0 }
 0x2a3   : > { %v1599_v59 = vpop.f32.mrf.mxu1  ;;  %1667 = vst [vmem:[%s2437_s23 + $0x58] sm:$0xff] %v1594_v56  ;;  %v1598_v63 = vadd.f32 %v1597_v54, %v1437_v5  ;;  %v1439_v48 = vadd.f32 %v1438_v23, %v3115_v42 }
 0x2a4   : > { %v1442_v15 = vpop.f32.mrf.mxu0 }
 0x2a5   : > { %v1603_v40 = vpop.f32.mrf.mxu1  ;;  %1668 = vst [vmem:[%s2437_s23 + $0x60] sm:$0xff] %v1598_v63  ;;  %v1600_v31 = vadd.f32 %v1599_v59, %v1439_v48  ;;  %v1443_v57 = vadd.f32 %v1442_v15, %v3113_v22 }
 0x2a6   : > { %v1444_v41 = vpop.f32.mrf.mxu0 }
 0x2a7   : > { %v1605_v3 = vpop.f32.mrf.mxu1  ;;  %1669 = vst [vmem:[%s2437_s23 + $0x68] sm:$0xff] %v1600_v31  ;;  %v1604_v47 = vadd.f32 %v1603_v40, %v1443_v57  ;;  %v1445_v46 = vadd.f32 %v1444_v41, %v3115_v42 }
 0x2a8   : > { %v1448_v53 = vpop.f32.mrf.mxu0 }
 0x2a9   : > { %v1609_v55 = vpop.f32.mrf.mxu1  ;;  %1670 = vst [vmem:[%s2437_s23 + $0x70] sm:$0xff] %v1604_v47  ;;  %v1606_v7 = vadd.f32 %v1605_v3, %v1445_v46  ;;  %v1449_v51 = vadd.f32 %v1448_v53, %v3113_v22 }
 0x2aa   : > { %v1450_v28 = vpop.f32.mrf.mxu0 }
 0x2ab   : > { %v1611_v8 = vpop.f32.mrf.mxu1  ;;  %1671 = vst [vmem:[%s2437_s23 + $0x78] sm:$0xff] %v1606_v7  ;;  %v1610_v6 = vadd.f32 %v1609_v55, %v1449_v51  ;;  %v1451_v60 = vadd.f32 %v1450_v28, %v3115_v42 }
 0x2ac   : > { %v1454_v11 = vpop.f32.mrf.mxu0 }
 0x2ad   : > { %v1615_v10 = vpop.f32.mrf.mxu1  ;;  %1672 = vst [vmem:[%s2437_s23 + $0x80] sm:$0xff] %v1610_v6  ;;  %v1612_v43 = vadd.f32 %v1611_v8, %v1451_v60  ;;  %v1455_v50 = vadd.f32 %v1454_v11, %v3113_v22 }
 0x2ae   : > { %v1456_v12 = vpop.f32.mrf.mxu0 }
 0x2af   : > { %v1617_v61 = vpop.f32.mrf.mxu1  ;;  %1673 = vst [vmem:[%s2437_s23 + $0x88] sm:$0xff] %v1612_v43  ;;  %v1616_v14 = vadd.f32 %v1615_v10, %v1455_v50  ;;  %v1457_v62 = vadd.f32 %v1456_v12, %v3115_v42 }
 0x2b0   : > { %v1460_v18 = vpop.f32.mrf.mxu0 }
 0x2b1   : > { %v1621_v20 = vpop.f32.mrf.mxu1  ;;  %1674 = vst [vmem:[%s2437_s23 + $0x90] sm:$0xff] %v1616_v14  ;;  %v1618_v25 = vadd.f32 %v1617_v61, %v1457_v62  ;;  %v1461_v30 = vadd.f32 %v1460_v18, %v3113_v22 }
 0x2b2   : > { %v1462_v9 = vpop.f32.mrf.mxu0 }
 0x2b3   : > { %v1623_v52 = vpop.f32.mrf.mxu1  ;;  %1675 = vst [vmem:[%s2437_s23 + $0x98] sm:$0xff] %v1618_v25  ;;  %v1622_v16 = vadd.f32 %v1621_v20, %v1461_v30  ;;  %v1463_v2 = vadd.f32 %v1462_v9, %v3115_v42 }
 0x2b4   : > { %v1466_v24 = vpop.f32.mrf.mxu0 }
 0x2b5   : > { %v1627_v13 = vpop.f32.mrf.mxu1  ;;  %1676 = vst [vmem:[%s2437_s23 + $0xa0] sm:$0xff] %v1622_v16  ;;  %v1624_v36 = vadd.f32 %v1623_v52, %v1463_v2  ;;  %v1467_v58 = vadd.f32 %v1466_v24, %v3113_v22 }
 0x2b6   : > { %v1468_v37 = vpop.f32.mrf.mxu0 }
 0x2b7   : > { %v1629_v34 = vpop.f32.mrf.mxu1  ;;  %1677 = vst [vmem:[%s2437_s23 + $0xa8] sm:$0xff] %v1624_v36  ;;  %v1628_v21 = vadd.f32 %v1627_v13, %v1467_v58  ;;  %v1469_v26 = vadd.f32 %v1468_v37, %v3115_v42 }
 0x2b8   : > { %v1472_v32 = vpop.f32.mrf.mxu0 }
 0x2b9   : > { %v1633_v1 = vpop.f32.mrf.mxu1  ;;  %1678 = vst [vmem:[%s2437_s23 + $0xb0] sm:$0xff] %v1628_v21  ;;  %v1630_v38 = vadd.f32 %v1629_v34, %v1469_v26  ;;  %v1473_v29 = vadd.f32 %v1472_v32, %v3113_v22 }
 0x2ba   : > { %v1474_v4 = vpop.f32.mrf.mxu0 }
 0x2bb   : > { %v1635_v33 = vpop.f32.mrf.mxu1  ;;  %1679 = vst [vmem:[%s2437_s23 + $0xb8] sm:$0xff] %v1630_v38  ;;  %v1634_v17 = vadd.f32 %v1633_v1, %v1473_v29  ;;  %v1475_v0 = vadd.f32 %v1474_v4, %v3115_v42 }
 0x2bc   : > { %v1478_v44 = vpop.f32.mrf.mxu0 }
 0x2bd   : > { %v1639_v35 = vpop.f32.mrf.mxu1  ;;  %1680 = vst [vmem:[%s2437_s23 + $0xc0] sm:$0xff] %v1634_v17  ;;  %v1636_v39 = vadd.f32 %v1635_v33, %v1475_v0  ;;  %v1479_v19 = vadd.f32 %v1478_v44, %v3113_v22 }
 0x2be   : > { %v1480_v49 = vpop.f32.mrf.mxu0 }
 0x2bf   : > { %v1641_v27 = vpop.f32.mrf.mxu1  ;;  %1681 = vst [vmem:[%s2437_s23 + $0xc8] sm:$0xff] %v1636_v39  ;;  %v1640_v45 = vadd.f32 %v1639_v35, %v1479_v19  ;;  %v1481_v54 = vadd.f32 %v1480_v49, %v3115_v42 }
 0x2c0   : > { %v1484_v56 = vpop.f32.mrf.mxu0 }
 0x2c1   : > { %v1645_v5 = vpop.f32.mrf.mxu1  ;;  %1682 = vst [vmem:[%s2437_s23 + $0xd0] sm:$0xff] %v1640_v45  ;;  %v1642_v23 = vadd.f32 %v1641_v27, %v1481_v54  ;;  %v1485_v59 = vadd.f32 %v1484_v56, %v3113_v22 }
 0x2c2   : > { %v1486_v63 = vpop.f32.mrf.mxu0 }
 0x2c3   : > { %v1647_v48 = vpop.f32.mrf.mxu1  ;;  %1683 = vst [vmem:[%s2437_s23 + $0xd8] sm:$0xff] %v1642_v23  ;;  %v1646_v15 = vadd.f32 %v1645_v5, %v1485_v59  ;;  %v1487_v40 = vadd.f32 %v1486_v63, %v3115_v42 }
 0x2c4   : > { %v1490_v31 = vpop.f32.mrf.mxu0 }
 0x2c5   : > { %v1651_v57 = vpop.f32.mrf.mxu1  ;;  %1684 = vst [vmem:[%s2437_s23 + $0xe0] sm:$0xff] %v1646_v15  ;;  %v1648_v41 = vadd.f32 %v1647_v48, %v1487_v40  ;;  %v1491_v3 = vadd.f32 %v1490_v31, %v3113_v22 }
 0x2c6   : > { %v1492_v47 = vpop.f32.mrf.mxu0 }
 0x2c7   : > { %1685 = vst [vmem:[%s2437_s23 + $0xe8] sm:$0xff] %v1648_v41  ;;  %v1652_v46 = vadd.f32 %v1651_v57, %v1491_v3  ;;  %v1493_v53 = vadd.f32 %v1492_v47, %v3115_v42  ;;  %v1653_v55 = vpop.f32.mrf.mxu1 }
 0x2c9   : > { %1686 = vst [vmem:[%s2437_s23 + $0xf0] sm:$0xff] %v1652_v46  ;;  %v1654_v7 = vadd.f32 %v1653_v55, %v1493_v53 }
 0x2cb   : > { %1687 = vst [vmem:[%s2437_s23 + $0xf8] sm:$0xff] %v1654_v7 }
 0x2cc   : > { %2146 = shalt.err (!%p2143_p3)
}
 0x2cd   : > { %s2147_s23 = scalar_lea.hbm %s3185_s24, 4096  ;;  %s2151_s12 = scalar_lea.hbm %s3258_s5, 24576 }
 0x2ce   : > { %p2148_p1 = scmp.ne.s32.totalorder %s3185_s24, %s2147_s23  ;;  %p2152_p6 = scmp.lt.s32.totalorder %s3185_s24, %s3258_s5 }
 0x2cf   : > { %p2153_p8 = scmp.lt.s32.totalorder %s2151_s12, %s2147_s23 }
 0x2d0   : > { %p2149_p5 = pnand %p2148_p1, %p2384_p13 }
 0x2d1   : > { %p2154_p7 = por %p2153_p8, %p2152_p6 }
 0x2d2   : > { %p2150_p4 = pneg %p2149_p5 }
 0x2d4   : > { %p2155_p9 = pnand %p2154_p7, %p2150_p4 }
 0x2d6   : > { %2158 = shalt.err (!%p2155_p9)
}
 0x2d7   : > { %s2261_s25 = smov 256   ;;  %s2262_s29 = smov 512  }
 0x2d8   : > { %s2263_s14 = smov 16  }
 0x2d9   : > { %1870 = dma.vmem_to_hbm [thread:$0]  (%p2384_p13), %s3187_s10, 4096, %s3185_s24, %s3193_s27, %s2261_s25, %s2262_s29, %s2263_s14  }
 0x2da PF: > { %p1881_p10 = scmp.ge.s32.totalorder %s2253_s28, 2  ;;  %s1720_s8 = sand.u32 1, %s2213_s18  }
 0x2db   : > { %s1721_s11 = scalar_lea.sflag [#allocation5], %s1720_s8 }
 0x2dc   : > { %p1877_p11 = pnand %p1881_p10, %p2389_p2 }
 0x2de   : > { %p1878_p12 = pneg %p1877_p11 }
 0x2e0   : > { %2208 = dma.done.wait (%p1878_p12), %s1721_s11, 4096  }
 0x2e1   : > { %2210 = vsyncadd (%p1878_p12), %s1721_s11, 4294963200  ;;  %s21_s28 = sadd.s32 1, %s2253_s28   ;;  %s3277_s17 = sld [smem:[#allocation9_spill]] }
 0x2e2   : > { %p18_p0 = scmp.ge.s32.totalorder %s21_s28, 8   ;;  %s3278_s23 = sld [smem:[#allocation14_spill]] }
 0x2e3   : > { %s3279_s24 = sld [smem:[#allocation10_spill]]  ;;  %s3283_s18 = smov %s2217_s19 }
 0x2e4   : > { %s3280_s25 = sld [smem:[#allocation11_spill]]  ;;  %s3284_s19 = smov %s2221_s20 }
 0x2e5   : > { %s3281_s26 = sld [smem:[#allocation12_spill]]  ;;  %s3285_s20 = smov %s2382_s16 }
 0x2e6   : > { %s3282_s27 = sld [smem:[#allocation13_spill]]  ;;  %s3286_s21 = smov %s2229_s22 }
 0x2e7   : > { %s3287_s22 = smov %s3277_s17  ;;  %20 = sbr.rel (!%p18_p0) target bundleno = 9 (0x9), region = 95 }
 0x2ec   :  { %1726 = vsyncpa [#allocation4], 1 }
 0x2ed   :  { %1728 = vsyncpa [#allocation4 + $0x1], 1 }
 0x2ee   :  { %1729 = vsyncpa [#allocation5], 1 }
 0x2ef   :  { %1731 = vsyncpa [#allocation5 + $0x1], 1 }

// kernel: _item_imbedder_call.1
= control target key start
LH: loop header
LB: loop body
LE: loop exit
PB: predicated region body
PF: predicated region fallthrough
CT: control target
= control target key end

     0   :  { %10 = vsyncpa [#allocation4], 0  ;;  %s3253_s0 = inlined_call_operand.vmem [shape: f32[384,64], index: 0, kind: input, shape index: {}]   ;;  %s3254_s1 = inlined_call_operand.vmem [shape: f32[64,512], index: 1, kind: input, shape index: {}]   ;;  %s3255_s2 = inlined_call_operand.vmem [shape: f32[1,512], index: 2, kind: input, shape index: {}]   ;;  %s3256_s3 = inlined_call_operand.hbm [shape: f32[512,512], index: 3, kind: input, shape index: {}]   ;;  %s3257_s4 = inlined_call_operand.vmem [shape: f32[1,512], index: 4, kind: input, shape index: {}]   ;;  %s3258_s5 = inlined_call_operand.hbm [shape: f32[384,512], index: 5, kind: output, shape index: {}]  }
   0x1   :  { %12 = vsyncpa [#allocation4 + $0x1], 0 }
   0x2   :  { %13 = vsyncpa [#allocation5], 0 }
   0x3   :  { %15 = vsyncpa [#allocation5 + $0x1], 0  ;;  %s2294_s18 = smov 0   ;;  %s2296_s19 = smov 0  }
   0x4   :  { %s2298_s20 = smov 0   ;;  %s2300_s21 = smov 0  }
   0x5   :  { %s2302_s22 = smov 0   ;;  %s2304_s23 = smov 0  }
   0x6   :  { %s2306_s24 = smov 0   ;;  %s2308_s25 = smov 0  }
   0x7   :  { %s2310_s26 = smov 0   ;;  %s2312_s27 = smov 0  }
   0x8   :  { %s2314_s28 = smov 0  }
   0x9 LB: > { %3265 = sst [smem:[#allocation9_spill]] %s2233_s23  ;;  %s1813_s29 = sadd.s32 4294967295, %s2253_s28   ;;  %s2253_s28 = sphi %s2314_s28, %s21_s28   ;;  %s2249_s27 = sphi %s2312_s27, %s3282_s27   ;;  %s2245_s26 = sphi %s2310_s26, %s3281_s26   ;;  %s2241_s25 = sphi %s2308_s25, %s3280_s25   ;;  %s2237_s24 = sphi %s2306_s24, %s3279_s24   ;;  %s2233_s23 = sphi %s2304_s23, %s3278_s23   ;;  %s2229_s22 = sphi %s2302_s22, %s3287_s22   ;;  %s2225_s21 = sphi %s2300_s21, %s3286_s21   ;;  %s2221_s20 = sphi %s2298_s20, %s3285_s20   ;;  %s2217_s19 = sphi %s2296_s19, %s3284_s19   ;;  %s2213_s18 = sphi %s2294_s18, %s3283_s18  }
   0xa   : > { %3266 = sst [smem:[#allocation10_spill]] %s2245_s26  ;;  %s1814_s30 = sadd.s32 4294967294, %s2253_s28  }
   0xb   : > { %3267 = sst [smem:[#allocation11_spill]] %s2249_s27  ;;  %s30_s6 = sadd.s32 1, %s2245_s26 }
   0xc   : > { %s33_s7 = sadd.s32 1, %s2249_s27  ;;  %p31_p0 = scmp.ge.s32.totalorder %s30_s6, 2 }
   0xd   : > { %s108_s8 = sadd.s32 1, %s2233_s23  ;;  %p115_p1 = scmp.ne.s32.totalorder %s2233_s23, %s2229_s22 }
   0xe   : > { %p116_p2 = scmp.eq.s32.totalorder %s2253_s28, 0  ;;  %s3289_s6 = smov (%p31_p0, %s30_s6), 0 }
   0xf   : > { %3268 = sst [smem:[#allocation12_spill]] %s3289_s6  ;;  %s3291_s7 = smov (!%p31_p0, %s33_s7), %s2249_s27 }
  0x10   : > { %s105_s9 = ssub.s32 %s2245_s26, %s3289_s6  ;;  %p2360_p3 = por %p116_p2, %p115_p1 }
  0x11   : > { %p35_p4 = scmp.ge.s32.totalorder %s3291_s7, 3  ;;  %p106_p5 = scmp.eq.s32.totalorder %s105_s9, 0 }
  0x12   : > { %p121_p6 = scmp.ne.s32.totalorder %s2229_s22, %s2225_s21  ;;  %p122_p7 = scmp.eq.s32.totalorder %s1813_s29, 0 }
  0x13   : > { %s3293_s7 = smov (%p35_p4, %s3291_s7), 0  ;;  %s162_s15 = sadd.s32 1, %s2221_s20 }
  0x14   : > { %3270 = sst [smem:[#allocation13_spill]] %s3293_s7  ;;  %p2370_p8 = por %p122_p7, %p121_p6 }
  0x15   : > { %s2368_s11 = scalar_select %p106_p5, %s2233_s23, %s108_s8  }
  0x16   : > { %s157_s13 = ssub.s32 %s2249_s27, %s3293_s7  ;;  %p172_p10 = scmp.ne.s32.totalorder %s2221_s20, %s2217_s19 }
  0x17   : > { %3271 = sst [smem:[#allocation14_spill]] %s2368_s11  ;;  %s159_s14 = sor.u32 %s157_s13, %s105_s9 }
  0x18   : > { %p160_p9 = scmp.eq.s32.totalorder %s159_s14, 0  ;;  %p173_p11 = scmp.eq.s32.totalorder %s1813_s29, 5 }
  0x19   : > { %p178_p12 = scmp.ne.s32.totalorder %s2217_s19, %s2213_s18  ;;  %p179_p0 = scmp.eq.s32.totalorder %s1814_s30, 5 }
  0x1a   : > { %s2382_s16 = scalar_select %p160_p9, %s2221_s20, %s162_s15  }
  0x1b   : > { %p2384_p13 = por %p173_p11, %p172_p10  ;;  %p1880_p1 = scmp.lt.s32.totalorder %s2253_s28, 6 }
  0x1c   : > { %p2389_p2 = por %p179_p0, %p178_p12  ;;  %s214_s8 = sand.u32 1, %s2233_s23  }
  0x1d   : > { %s1817_s9 = sshll.u32 %s214_s8, 10  ;;  %s1866_s13 = sshll.u32 %s2245_s26, 8 }
  0x1e   : > { %s224_s29 = scalar_lea.hbm %s3256_s3, %s1866_s13  ;;  %s218_s6 = scalar_lea.vmem [#allocation3], %s1817_s9 }
  0x1f   : > { %s225_s15 = sshll.u32 %s218_s6, 4  ;;  %p2400_p4 = pnand %p1880_p1, %p2360_p3  ;;  %s226_s15 = int_to_ptr.vmem [resolvable:$true] %s225_s15 }
  0x20   : > { %s215_s30 = scalar_lea.sflag [#allocation4], %s214_s8  ;;  %s2118_s11 = scalar_lea.vmem %s226_s15, 16384 }
  0x21   : > { %p2107_p5 = pneg %p2400_p4  ;;  %p2119_p6 = scmp.ne.s32.totalorder %s226_s15, %s2118_s11 }
  0x22   : > { %s2255_s26 = smov [#allocation3]  }
  0x23   : > { %p2121_p7 = pnand %p2119_p6, %p2107_p5  ;;  %s2123_s23 = sshll.u32 %s2255_s26, 4  ;;  %s2124_s23 = int_to_ptr.vmem [resolvable:$false] %s2123_s23 }
  0x24   : > { %s2125_s7 = scalar_lea.vmem %s2124_s23, 32768  ;;  %p2126_p10 = scmp.lt.s32.totalorder %s226_s15, %s2124_s23 }
  0x25   : > { %p2122_p9 = pneg %p2121_p7  ;;  %p2127_p11 = scmp.lt.s32.totalorder %s2125_s7, %s2118_s11 }
  0x27   : > { %p2128_p12 = por %p2127_p11, %p2126_p10 }
  0x29   : > { %p2129_p0 = pnand %p2128_p12, %p2122_p9 }
  0x2b   : > { %2132 = shalt.err (!%p2129_p0)
}
  0x2c   : > { %s2256_s6 = smov 512   ;;  %s2257_s10 = smov 256  }
  0x2d   : > { %s2258_s8 = smov 16   ;;  %p1820_p3 = scmp.ge.s32.totalorder %s2253_s28, 1 }
  0x2e   : > { %1875 = dma.hbm_to_vmem [thread:$0]  (!%p2400_p4), %s224_s29, 16384, %s226_s15, %s215_s30, %s2256_s6, %s2257_s10, %s2258_s8  }
  0x2f   : > { %p241_p1 = scmp.lt.s32.totalorder %s2253_s28, 7 }
  0x31   : > { %p242_p5 = pnand %p1820_p3, %p241_p1 }
  0x32   : > { %s247_s26 = sand.u32 (!%p242_p5), 1, %s2229_s22  }
  0x33   : > { %245 = sbr.rel (%p242_p5) target bundleno = 730 (0x2da), region = 40  ;;  %s1821_s23 = sshll.u32 (!%p242_p5), %s247_s26, 10 }
  0x34   : > { %s248_s11 = scalar_lea.sflag (!%p242_p5), [#allocation4], %s247_s26  ;;  %s2411_s9 = scalar_lea.vmem (!%p242_p5), [#allocation3], %s1821_s23 }
  0x38   : > { %2204 = dma.done.wait (%p2370_p8), %s248_s11, 16384  }
  0x39   : > { %2206 = vsyncadd (%p2370_p8), %s248_s11, 4294950912  ;;  %s3264_s27 = sand.u32 1, %s2217_s19   ;;  %s1823_s13 = sshll.u32 %s2241_s25, 4 }
  0x3a   : > { %s1822_s14 = sshll.u32 %s3264_s27, 8  ;;  %p288_p4 = scmp.lt.s32.totalorder %s1823_s13, 47 }
  0x3b   : > { %s2422_s29 = sshll.u32 %s2237_s24, 1  ;;  %s2437_s23 = scalar_lea.vmem [#allocation6], %s1822_s14 }
  0x3c   : > { %s3295_s13 = smov (!%p288_p4, %s1823_s13), 47  ;;  %p295_p6 = scmp.lt.s32.totalorder %s2422_s29, 3 }
  0x3d   : > { %s1824_s15 = sshll.u32 %s3295_s13, 3  ;;  %p1826_p8 = scmp.ne.s32.totalorder %s2237_s24, 0 }
  0x3e   : > { %s2428_s12 = scalar_lea.vmem %s3253_s0, %s1824_s15 }
  0x3f   : > { %s2431_s6 = scalar_select %p295_p6, %s2422_s29, 3 }
  0x40   : > { %304 = sbr.rel (%p1826_p8) target bundleno = 390 (0x186), region = 48 }
  0x41   : > { %s297_s26 = scalar_lea.vmem %s3257_s4, %s2431_s6 }
  0x45   : > { %v350_v0 = vld [vmem:[%s3254_s1 + $0xe8] sm:$0xff]  ;;  %v352_v1 = vld [vmem:[%s3254_s1 + $0xf8] sm:$0xff]  ;;  %v349_v2 = vld [vmem:[%s3254_s1 + $0xe0] sm:$0xff]  ;;  %vm375_vm0 = vcmask 523264   ;;  %v2259_v33 = vmov 0.0   ;;  %v355_v49 = vlaneseq }
  0x46   : > { %440 = vmatprep.subr.mxu0 %v350_v0  ;;  %601 = vmatprep.subr.mxu1 %v352_v1  ;;  %v351_v3 = vld [vmem:[%s3254_s1 + $0xf0] sm:$0xff]  ;;  %v346_v4 = vld [vmem:[%s3254_s1 + $0xc8] sm:$0xff]  ;;  %v348_v5 = vld [vmem:[%s3254_s1 + $0xd8] sm:$0xff] }
  0x47   : > { %441 = vmatpush1.msra.mxu0 %v349_v2  ;;  %602 = vmatpush1.msra.mxu1 %v351_v3  ;;  %v345_v6 = vld [vmem:[%s3254_s1 + $0xc0] sm:$0xff]  ;;  %v347_v7 = vld [vmem:[%s3254_s1 + $0xd0] sm:$0xff]  ;;  %v342_v8 = vld [vmem:[%s3254_s1 + $0xa8] sm:$0xff]  ;;  %v356_v50 = vshrl.u32 %v355_v49, 7 }
  0x48   : > { %442 = vmatprep.subr.mxu0 %v346_v4  ;;  %603 = vmatprep.subr.mxu1 %v348_v5  ;;  %v344_v9 = vld [vmem:[%s3254_s1 + $0xb8] sm:$0xff]  ;;  %v341_v10 = vld [vmem:[%s3254_s1 + $0xa0] sm:$0xff]  ;;  %v343_v11 = vld [vmem:[%s3254_s1 + $0xb0] sm:$0xff] }
  0x49   : > { %443 = vmatpush1.msra.mxu0 %v345_v6  ;;  %604 = vmatpush1.msra.mxu1 %v347_v7  ;;  %v338_v12 = vld [vmem:[%s3254_s1 + $0x88] sm:$0xff]  ;;  %v340_v13 = vld [vmem:[%s3254_s1 + $0x98] sm:$0xff]  ;;  %v337_v14 = vld [vmem:[%s3254_s1 + $0x80] sm:$0xff]  ;;  %v357_v51 = vsub.s32 0, %v356_v50  ;;  %v365_v52 = vsub.s32 2, %v356_v50  ;;  %v361_v54 = vsub.s32 1, %v356_v50 }
  0x4a   : > { %444 = vmatprep.subr.mxu0 %v342_v8  ;;  %605 = vmatprep.subr.mxu1 %v344_v9  ;;  %v339_v15 = vld [vmem:[%s3254_s1 + $0x90] sm:$0xff]  ;;  %v334_v16 = vld [vmem:[%s3254_s1 + $0x68] sm:$0xff]  ;;  %v336_v17 = vld [vmem:[%s3254_s1 + $0x78] sm:$0xff]  ;;  %v369_v55 = vsub.s32 3, %v356_v50 }
  0x4b   : > { %445 = vmatpush1.msra.mxu0 %v341_v10  ;;  %606 = vmatpush1.msra.mxu1 %v343_v11  ;;  %v333_v18 = vld [vmem:[%s3254_s1 + $0x60] sm:$0xff]  ;;  %v335_v19 = vld [vmem:[%s3254_s1 + $0x70] sm:$0xff]  ;;  %v330_v20 = vld [vmem:[%s3254_s1 + $0x48] sm:$0xff] }
  0x4c   : > { %446 = vmatprep.subr.mxu0 %v338_v12  ;;  %607 = vmatprep.subr.mxu1 %v340_v13  ;;  %v332_v21 = vld [vmem:[%s3254_s1 + $0x58] sm:$0xff]  ;;  %v329_v22 = vld [vmem:[%s3254_s1 + $0x40] sm:$0xff]  ;;  %v331_v23 = vld [vmem:[%s3254_s1 + $0x50] sm:$0xff] }
  0x4d   : > { %447 = vmatpush1.msra.mxu0 %v337_v14  ;;  %608 = vmatpush1.msra.mxu1 %v339_v15  ;;  %v326_v24 = vld [vmem:[%s3254_s1 + $0x28] sm:$0xff]  ;;  %v328_v25 = vld [vmem:[%s3254_s1 + $0x38] sm:$0xff]  ;;  %v325_v26 = vld [vmem:[%s3254_s1 + $0x20] sm:$0xff] }
  0x4e   : > { %448 = vmatprep.subr.mxu0 %v334_v16  ;;  %609 = vmatprep.subr.mxu1 %v336_v17  ;;  %v327_v27 = vld [vmem:[%s3254_s1 + $0x30] sm:$0xff]  ;;  %v322_v28 = vld [vmem:[%s3254_s1 + $0x8] sm:$0xff]  ;;  %v324_v29 = vld [vmem:[%s3254_s1 + $0x18] sm:$0xff] }
  0x4f   : > { %449 = vmatpush1.msra.mxu0 %v333_v18  ;;  %610 = vmatpush1.msra.mxu1 %v335_v19  ;;  %v321_v30 = vld [vmem:[%s3254_s1] sm:$0xff]  ;;  %v323_v31 = vld [vmem:[%s3254_s1 + $0x10] sm:$0xff]  ;;  %v306_v34 = vld [vmem:[%s2428_s12 + $0x8] sm:$0xff] }
  0x50   : > { %450 = vmatprep.subr.mxu0 %v330_v20  ;;  %611 = vmatprep.subr.mxu1 %v332_v21  ;;  %v305_v32 = vld [vmem:[%s2428_s12] sm:$0xff]  ;;  %v307_v35 = vld [vmem:[%s2428_s12 + $0x10] sm:$0xff]  ;;  %v308_v36 = vld [vmem:[%s2428_s12 + $0x18] sm:$0xff] }
  0x51   : > { %451 = vmatpush1.msra.mxu0 %v329_v22  ;;  %612 = vmatpush1.msra.mxu1 %v331_v23  ;;  %v309_v37 = vld [vmem:[%s2428_s12 + $0x20] sm:$0xff]  ;;  %v310_v38 = vld [vmem:[%s2428_s12 + $0x28] sm:$0xff]  ;;  %v311_v39 = vld [vmem:[%s2428_s12 + $0x30] sm:$0xff] }
  0x52   : > { %452 = vmatprep.subr.mxu0 %v326_v24  ;;  %613 = vmatprep.subr.mxu1 %v328_v25  ;;  %v312_v40 = vld [vmem:[%s2428_s12 + $0x38] sm:$0xff]  ;;  %v313_v41 = vld [vmem:[%s2428_s12 + $0x40] sm:$0xff]  ;;  %v314_v42 = vld [vmem:[%s2428_s12 + $0x48] sm:$0xff] }
  0x53   : > { %453 = vmatpush1.msra.mxu0 %v325_v26  ;;  %614 = vmatpush1.msra.mxu1 %v327_v27  ;;  %v315_v43 = vld [vmem:[%s2428_s12 + $0x50] sm:$0xff]  ;;  %v316_v44 = vld [vmem:[%s2428_s12 + $0x58] sm:$0xff]  ;;  %v317_v45 = vld [vmem:[%s2428_s12 + $0x60] sm:$0xff] }
  0x54   : > { %454 = vmatprep.subr.mxu0 %v322_v28  ;;  %615 = vmatprep.subr.mxu1 %v324_v29  ;;  %v318_v46 = vld [vmem:[%s2428_s12 + $0x68] sm:$0xff]  ;;  %v319_v47 = vld [vmem:[%s2428_s12 + $0x70] sm:$0xff]  ;;  %v320_v48 = vld [vmem:[%s2428_s12 + $0x78] sm:$0xff] }
  0x55   : > { %455 = vmatpush1.msra.mxu0 %v321_v30  ;;  %488 = vmatprep.mubr.f32.mxu0 %v2259_v33  ;;  %v353_v53 = vld [vmem:[%s3255_s2] sm:$0xf] }
  0x56   : > { %616 = vmatpush1.msra.mxu1 %v323_v31  ;;  %649 = vmatprep.mubr.f32.mxu1 %v2259_v33  ;;  %v2619_v56 = vrot.slane %v353_v53, %v357_v51  ;;  %v2621_v57 = vrot.slane %v353_v53, %v365_v52  ;;  %v2623_v60 = vrot.slane %v353_v53, %v361_v54 }
  0x57   : > { %1827 = vmatmul.mubr.msk.f32.vlgmr.msra.gmra.mxu0 %vm375_vm0, %v305_v32  ;;  %1843 = vmatmul.mubr.msk.f32.vlgmr.msra.gmra.mxu1 %vm375_vm0, %v305_v32  ;;  %v2625_v61 = vrot.slane %v353_v53, %v369_v55 }
  0x58   : > { %494 = vmatprep.mubr.f32.mxu0 %v2259_v33  ;;  %655 = vmatprep.mubr.f32.mxu1 %v2259_v33 }
  0x5b   : > { %1828 = vmatmul.mubr.msk.f32.gmra.mxu0 %vm375_vm0, %v306_v34  ;;  %1844 = vmatmul.mubr.msk.f32.gmra.mxu1 %vm375_vm0, %v306_v34 }
  0x5c   : > { %500 = vmatprep.mubr.f32.mxu0 %v2259_v33  ;;  %661 = vmatprep.mubr.f32.mxu1 %v2259_v33 }
  0x5f   : > { %1829 = vmatmul.mubr.msk.f32.gmra.mxu0 %vm375_vm0, %v307_v35  ;;  %1845 = vmatmul.mubr.msk.f32.gmra.mxu1 %vm375_vm0, %v307_v35 }
  0x60   : > { %506 = vmatprep.mubr.f32.mxu0 %v2259_v33  ;;  %667 = vmatprep.mubr.f32.mxu1 %v2259_v33 }
  0x63   : > { %1830 = vmatmul.mubr.msk.f32.gmra.mxu0 %vm375_vm0, %v308_v36  ;;  %1846 = vmatmul.mubr.msk.f32.gmra.mxu1 %vm375_vm0, %v308_v36 }
  0x64   : > { %512 = vmatprep.mubr.f32.mxu0 %v2259_v33  ;;  %673 = vmatprep.mubr.f32.mxu1 %v2259_v33 }
  0x67   : > { %1831 = vmatmul.mubr.msk.f32.gmra.mxu0 %vm375_vm0, %v309_v37  ;;  %1847 = vmatmul.mubr.msk.f32.gmra.mxu1 %vm375_vm0, %v309_v37 }
  0x68   : > { %518 = vmatprep.mubr.f32.mxu0 %v2259_v33  ;;  %679 = vmatprep.mubr.f32.mxu1 %v2259_v33 }
  0x6b   : > { %1832 = vmatmul.mubr.msk.f32.gmra.mxu0 %vm375_vm0, %v310_v38  ;;  %1848 = vmatmul.mubr.msk.f32.gmra.mxu1 %vm375_vm0, %v310_v38 }
  0x6c   : > { %524 = vmatprep.mubr.f32.mxu0 %v2259_v33  ;;  %685 = vmatprep.mubr.f32.mxu1 %v2259_v33 }
  0x6f   : > { %1833 = vmatmul.mubr.msk.f32.gmra.mxu0 %vm375_vm0, %v311_v39  ;;  %1849 = vmatmul.mubr.msk.f32.gmra.mxu1 %vm375_vm0, %v311_v39 }
  0x70   : > { %530 = vmatprep.mubr.f32.mxu0 %v2259_v33  ;;  %691 = vmatprep.mubr.f32.mxu1 %v2259_v33 }
  0x73   : > { %1834 = vmatmul.mubr.msk.f32.gmra.mxu0 %vm375_vm0, %v312_v40  ;;  %1850 = vmatmul.mubr.msk.f32.gmra.mxu1 %vm375_vm0, %v312_v40 }
  0x74   : > { %536 = vmatprep.mubr.f32.mxu0 %v2259_v33  ;;  %697 = vmatprep.mubr.f32.mxu1 %v2259_v33 }
  0x77   : > { %1835 = vmatmul.mubr.msk.f32.gmra.mxu0 %vm375_vm0, %v313_v41  ;;  %1851 = vmatmul.mubr.msk.f32.gmra.mxu1 %vm375_vm0, %v313_v41 }
  0x78   : > { %542 = vmatprep.mubr.f32.mxu0 %v2259_v33  ;;  %703 = vmatprep.mubr.f32.mxu1 %v2259_v33 }
  0x7b   : > { %1836 = vmatmul.mubr.msk.f32.gmra.mxu0 %vm375_vm0, %v314_v42  ;;  %1852 = vmatmul.mubr.msk.f32.gmra.mxu1 %vm375_vm0, %v314_v42 }
  0x7c   : > { %548 = vmatprep.mubr.f32.mxu0 %v2259_v33  ;;  %709 = vmatprep.mubr.f32.mxu1 %v2259_v33 }
  0x7f   : > { %1837 = vmatmul.mubr.msk.f32.gmra.mxu0 %vm375_vm0, %v315_v43  ;;  %1853 = vmatmul.mubr.msk.f32.gmra.mxu1 %vm375_vm0, %v315_v43 }
  0x80   : > { %554 = vmatprep.mubr.f32.mxu0 %v2259_v33  ;;  %715 = vmatprep.mubr.f32.mxu1 %v2259_v33 }
  0x83   : > { %1838 = vmatmul.mubr.msk.f32.gmra.mxu0 %vm375_vm0, %v316_v44  ;;  %1854 = vmatmul.mubr.msk.f32.gmra.mxu1 %vm375_vm0, %v316_v44 }
  0x84   : > { %560 = vmatprep.mubr.f32.mxu0 %v2259_v33  ;;  %721 = vmatprep.mubr.f32.mxu1 %v2259_v33 }
  0x87   : > { %1839 = vmatmul.mubr.msk.f32.gmra.mxu0 %vm375_vm0, %v317_v45  ;;  %1855 = vmatmul.mubr.msk.f32.gmra.mxu1 %vm375_vm0, %v317_v45 }
  0x88   : > { %566 = vmatprep.mubr.f32.mxu0 %v2259_v33  ;;  %727 = vmatprep.mubr.f32.mxu1 %v2259_v33 }
  0x8b   : > { %1840 = vmatmul.mubr.msk.f32.gmra.mxu0 %vm375_vm0, %v318_v46  ;;  %1856 = vmatmul.mubr.msk.f32.gmra.mxu1 %vm375_vm0, %v318_v46 }
  0x8c   : > { %572 = vmatprep.mubr.f32.mxu0 %v2259_v33  ;;  %733 = vmatprep.mubr.f32.mxu1 %v2259_v33 }
  0x8f   : > { %1841 = vmatmul.mubr.msk.f32.gmra.mxu0 %vm375_vm0, %v319_v47  ;;  %1857 = vmatmul.mubr.msk.f32.gmra.mxu1 %vm375_vm0, %v319_v47 }
  0x90   : > { %578 = vmatprep.mubr.f32.mxu0 %v2259_v33  ;;  %739 = vmatprep.mubr.f32.mxu1 %v2259_v33 }
  0x93   : > { %1842 = vmatmul.mubr.msk.f32.gmra.mxu0 %vm375_vm0, %v320_v48  ;;  %1858 = vmatmul.mubr.msk.f32.gmra.mxu1 %vm375_vm0, %v320_v48 }
 0x117   : > { %v490_v58 = vpop.f32.mrf.mxu0  ;;  %v651_v59 = vpop.f32.mrf.mxu1 }
 0x118   : > { %v491_v62 = vadd.f32 %v490_v58, %v2619_v56  ;;  %v652_v63 = vadd.f32 %v651_v59, %v2621_v57 }
 0x119   : > { %v492_v0 = vpop.f32.mrf.mxu0  ;;  %v653_v1 = vpop.f32.mrf.mxu1 }
 0x11a   : > { %v810_v2 = vmul.f32 0.70710677, %v491_v62  ;;  %v812_v3 = vmul.f32 0.70710677, %v652_v63  ;;  %v493_v4 = vadd.f32 %v492_v0, %v2623_v60  ;;  %v654_v5 = vadd.f32 %v653_v1, %v2625_v61 }
 0x11b   : > { %v496_v6 = vpop.f32.mrf.mxu0  ;;  %v657_v7 = vpop.f32.mrf.mxu1  ;;  %v746_v37 = vmul.f32 0.5, %v491_v62  ;;  %v748_v38 = vmul.f32 0.5, %v652_v63 }
 0x11c   : > { %1977 = verf.f32 %v810_v2  ;;  %v497_v8 = vadd.f32 %v496_v6, %v2619_v56  ;;  %v658_v9 = vadd.f32 %v657_v7, %v2621_v57  ;;  %v811_v10 = vmul.f32 0.70710677, %v493_v4 }
 0x11d   : > { %1979 = verf.f32 %v812_v3  ;;  %v498_v11 = vpop.f32.mrf.mxu0  ;;  %v659_v12 = vpop.f32.mrf.mxu1  ;;  %v813_v13 = vmul.f32 0.70710677, %v654_v5  ;;  %v747_v40 = vmul.f32 0.5, %v493_v4  ;;  %v749_v49 = vmul.f32 0.5, %v654_v5 }
 0x11e   : > { %v814_v14 = vmul.f32 0.70710677, %v497_v8  ;;  %1981 = verf.f32 %v811_v10  ;;  %v816_v15 = vmul.f32 0.70710677, %v658_v9  ;;  %v499_v16 = vadd.f32 %v498_v11, %v2623_v60 }
 0x11f   : > { %v660_v17 = vadd.f32 %v659_v12, %v2625_v61  ;;  %v502_v18 = vpop.f32.mrf.mxu0  ;;  %v663_v19 = vpop.f32.mrf.mxu1  ;;  %1983 = verf.f32 %v813_v13  ;;  %v750_v50 = vmul.f32 0.5, %v497_v8  ;;  %v752_v58 = vmul.f32 0.5, %v658_v9 }
 0x120   : > { %v503_v20 = vadd.f32 %v502_v18, %v2619_v56  ;;  %v2637_v21 = vadd.f32 %v663_v19, %v2621_v57  ;;  %1985 = verf.f32 %v814_v14  ;;  %v815_v22 = vmul.f32 0.70710677, %v499_v16 }
 0x121   : > { %v504_v23 = vpop.f32.mrf.mxu0  ;;  %v665_v24 = vpop.f32.mrf.mxu1  ;;  %1987 = verf.f32 %v816_v15  ;;  %v817_v25 = vmul.f32 0.70710677, %v660_v17  ;;  %v751_v63 = vmul.f32 0.5, %v499_v16  ;;  %v753_v0 = vmul.f32 0.5, %v660_v17 }
 0x122   : > { %v818_v26 = vmul.f32 0.70710677, %v503_v20  ;;  %1989 = verf.f32 %v815_v22  ;;  %v820_v27 = vmul.f32 0.70710677, %v2637_v21  ;;  %v2641_v28 = vadd.f32 %v504_v23, %v2623_v60 }
 0x123   : > { %v508_v29 = vpop.f32.mrf.mxu0  ;;  %v669_v30 = vpop.f32.mrf.mxu1  ;;  %1991 = verf.f32 %v817_v25  ;;  %v2644_v31 = vadd.f32 %v665_v24, %v2625_v61  ;;  %v754_v6 = vmul.f32 0.5, %v503_v20 }
 0x124   : > { %v2647_v32 = vadd.f32 %v508_v29, %v2619_v56  ;;  %v2650_v33 = vadd.f32 %v669_v30, %v2621_v57  ;;  %1993 = verf.f32 %v818_v26  ;;  %v819_v34 = vmul.f32 0.70710677, %v2641_v28 }
 0x125   : > { %v510_v35 = vpop.f32.mrf.mxu0  ;;  %v671_v36 = vpop.f32.mrf.mxu1  ;;  %1995 = verf.f32 %v820_v27  ;;  %v821_v39 = vmul.f32 0.70710677, %v2644_v31  ;;  %v756_v29 = vmul.f32 0.5, %v2637_v21 }
 0x126   : > { %1997 = verf.f32 %v819_v34  ;;  %v822_v41 = vmul.f32 0.70710677, %v2647_v32  ;;  %v824_v42 = vmul.f32 0.70710677, %v2650_v33  ;;  %v2657_v45 = vadd.f32 %v510_v35, %v2623_v60 }
 0x127   : > { %v514_v43 = vpop.f32.mrf.mxu0  ;;  %v675_v44 = vpop.f32.mrf.mxu1  ;;  %1999 = verf.f32 %v821_v39  ;;  %v2660_v46 = vadd.f32 %v671_v36, %v2625_v61 }
 0x128   : > { %v2663_v47 = vadd.f32 %v514_v43, %v2619_v56  ;;  %2001 = verf.f32 %v822_v41  ;;  %v2666_v51 = vadd.f32 %v675_v44, %v2621_v57  ;;  %v823_v59 = vmul.f32 0.70710677, %v2657_v45 }
 0x129   : > { %v1978_v48 = vpop.eup %1977  ;;  %v516_v52 = vpop.f32.mrf.mxu0  ;;  %2003 = verf.f32 %v824_v42  ;;  %v825_v1 = vmul.f32 0.70710677, %v2660_v46  ;;  %v757_v44 = vmul.f32 0.5, %v2644_v31 }
 0x12a   : > { %v677_v53 = vpop.f32.mrf.mxu1  ;;  %v1980_v54 = vpop.eup %1979  ;;  %v938_v55 = vadd.f32 1.0, %v1978_v48  ;;  %2005 = verf.f32 %v823_v59  ;;  %v826_v7 = vmul.f32 0.70710677, %v2663_v47  ;;  %v828_v9 = vmul.f32 0.70710677, %v2666_v51 }
 0x12b   : > { %v940_v62 = vadd.f32 1.0, %v1980_v54  ;;  %v520_v2 = vpop.f32.mrf.mxu0  ;;  %v1982_v4 = vpop.eup %1981  ;;  %2007 = verf.f32 %v825_v1  ;;  %v2673_v16 = vadd.f32 %v516_v52, %v2623_v60  ;;  %v2676_v17 = vadd.f32 %v677_v53, %v2625_v61 }
 0x12c   : > { %v681_v3 = vpop.f32.mrf.mxu1  ;;  %v1002_v5 = vmul.f32 %v938_v55, %v746_v37  ;;  %v1984_v8 = vpop.eup %1983  ;;  %v939_v11 = vadd.f32 1.0, %v1982_v4  ;;  %2009 = verf.f32 %v826_v7  ;;  %v2679_v22 = vadd.f32 %v520_v2, %v2619_v56 }
 0x12d   : > { %v1004_v10 = vmul.f32 %v940_v62, %v748_v38  ;;  %v522_v12 = vpop.f32.mrf.mxu0  ;;  %v1986_v14 = vpop.eup %1985  ;;  %v941_v15 = vadd.f32 1.0, %v1984_v8  ;;  %2011 = verf.f32 %v828_v9  ;;  %v827_v30 = vmul.f32 0.70710677, %v2673_v16 }
 0x12e   : > { %v683_v13 = vpop.f32.mrf.mxu1  ;;  %1066 = vst [vmem:[#allocation2 + $0xb0] sm:$0xff] %v1002_v5  ;;  %v1988_v18 = vpop.eup %1987  ;;  %v1003_v19 = vmul.f32 %v939_v11, %v747_v40  ;;  %v942_v20 = vadd.f32 1.0, %v1986_v14  ;;  %v755_v37 = vmul.f32 0.5, %v2641_v28  ;;  %v829_v38 = vmul.f32 0.70710677, %v2676_v17 }
 0x12f   : > { %1068 = vst [vmem:[#allocation2 + $0xd8] sm:$0xff] %v1004_v10  ;;  %v2681_v23 = vpop.f32.mrf.mxu0  ;;  %v1990_v25 = vpop.eup %1989  ;;  %v1005_v26 = vmul.f32 %v941_v15, %v749_v49  ;;  %v944_v27 = vadd.f32 1.0, %v1988_v18  ;;  %2013 = verf.f32 %v827_v30  ;;  %v2701_v31 = vadd.f32 %v522_v12, %v2623_v60 }
 0x130   : > { %v2683_v24 = vpop.f32.mrf.mxu1  ;;  %v1992_v34 = vpop.eup %1991  ;;  %1067 = vst [vmem:[#allocation2 + $0x1b0] sm:$0xff] %v1003_v19  ;;  %v1006_v35 = vmul.f32 %v942_v20, %v750_v50  ;;  %v943_v36 = vadd.f32 1.0, %v1990_v25  ;;  %2015 = verf.f32 %v829_v38  ;;  %v830_v50 = vmul.f32 0.70710677, %v2679_v22 }
 0x131   : > { %v528_v39 = vpop.f32.mrf.mxu0  ;;  %v1994_v41 = vpop.eup %1993  ;;  %1069 = vst [vmem:[#allocation2 + $0x18] sm:$0xff] %v1005_v26  ;;  %v1008_v42 = vmul.f32 %v944_v27, %v752_v58  ;;  %v945_v43 = vadd.f32 1.0, %v1992_v34  ;;  %v2698_v58 = vadd.f32 %v681_v3, %v2621_v57  ;;  %v2704_v1 = vadd.f32 %v683_v13, %v2625_v61 }
 0x132   : > { %v2689_v40 = vpop.f32.mrf.mxu1  ;;  %v1996_v21 = vpop.eup %1995  ;;  %1070 = vst [vmem:[#allocation2 + $0x50] sm:$0xff] %v1006_v35  ;;  %v1007_v48 = vmul.f32 %v943_v36, %v751_v63  ;;  %v946_v49 = vadd.f32 1.0, %v1994_v41  ;;  %2017 = verf.f32 %v830_v50  ;;  %v758_v7 = vmul.f32 0.5, %v2647_v32 }
 0x133   : > { %v2693_v28 = vpop.f32.mrf.mxu0  ;;  %v1998_v53 = vpop.eup %1997  ;;  %1072 = vst [vmem:[#allocation2 + $0x130] sm:$0xff] %v1008_v42  ;;  %v1009_v54 = vmul.f32 %v945_v43, %v753_v0  ;;  %v948_v55 = vadd.f32 1.0, %v1996_v21  ;;  %v832_v8 = vmul.f32 0.70710677, %v2698_v58  ;;  %v760_v9 = vmul.f32 0.5, %v2650_v33 }
 0x134   : > { %v2695_v52 = vpop.f32.mrf.mxu1  ;;  %v2000_v59 = vpop.eup %1999  ;;  %1071 = vst [vmem:[#allocation2 + $0x168] sm:$0xff] %v1007_v48  ;;  %v1010_v62 = vmul.f32 %v946_v49, %v754_v6  ;;  %v947_v63 = vadd.f32 1.0, %v1998_v53  ;;  %v831_v12 = vmul.f32 0.70710677, %v2701_v31  ;;  %v759_v19 = vmul.f32 0.5, %v2657_v45 }
 0x135   : > { %v2706_v2 = vpop.f32.mrf.mxu0  ;;  %v2002_v0 = vpop.eup %2001  ;;  %1073 = vst [vmem:[#allocation2 + $0x48] sm:$0xff] %v1009_v54  ;;  %v1012_v5 = vmul.f32 %v948_v55, %v756_v29  ;;  %v949_v3 = vadd.f32 1.0, %v2000_v59  ;;  %2019 = verf.f32 %v832_v8  ;;  %v833_v25 = vmul.f32 0.70710677, %v2704_v1 }
 0x136   : > { %v2708_v4 = vpop.f32.mrf.mxu1  ;;  %v2004_v10 = vpop.eup %2003  ;;  %1074 = vst [vmem:[#allocation2 + $0x180] sm:$0xff] %v1010_v62  ;;  %v1011_v6 = vmul.f32 %v947_v63, %v755_v37  ;;  %v950_v11 = vadd.f32 1.0, %v2002_v0  ;;  %2021 = verf.f32 %v831_v12  ;;  %v2722_v33 = vadd.f32 %v2681_v23, %v2619_v56 }
 0x137   : > { %v2714_v13 = vpop.f32.mrf.mxu0  ;;  %1076 = vst [vmem:[#allocation2 + $0x118] sm:$0xff] %v1012_v5  ;;  %v1013_v15 = vmul.f32 %v949_v3, %v757_v44  ;;  %v952_v18 = vadd.f32 1.0, %v2004_v10  ;;  %v2006_v32 = vpop.eup %2005  ;;  %v2730_v45 = vadd.f32 %v2683_v24, %v2621_v57  ;;  %v2733_v35 = vadd.f32 %v528_v39, %v2623_v60 }
 0x138   : > { %v2716_v14 = vpop.f32.mrf.mxu1  ;;  %1075 = vst [vmem:[#allocation2 + $0x110] sm:$0xff] %v1011_v6  ;;  %v1014_v20 = vmul.f32 %v950_v11, %v758_v7  ;;  %v2008_v29 = vpop.eup %2007  ;;  %v951_v34 = vadd.f32 1.0, %v2006_v32  ;;  %v761_v23 = vmul.f32 0.5, %v2660_v46  ;;  %2023 = verf.f32 %v833_v25 }
 0x139   : > { %v2724_v26 = vpop.f32.mrf.mxu0  ;;  %1077 = vst [vmem:[#allocation2 + $0x98] sm:$0xff] %v1013_v15  ;;  %v1016_v30 = vmul.f32 %v952_v18, %v760_v9  ;;  %v2010_v36 = vpop.eup %2009  ;;  %v953_v37 = vadd.f32 1.0, %v2008_v29  ;;  %v834_v38 = vmul.f32 0.70710677, %v2722_v33  ;;  %v762_v24 = vmul.f32 0.5, %v2663_v47 }
 0x13a   : > { %v2726_v27 = vpop.f32.mrf.mxu1  ;;  %1078 = vst [vmem:[#allocation2 + $0x120] sm:$0xff] %v1014_v20  ;;  %v2012_v43 = vpop.eup %2011  ;;  %v1015_v44 = vmul.f32 %v951_v34, %v759_v19  ;;  %v954_v21 = vadd.f32 1.0, %v2010_v36  ;;  %v836_v39 = vmul.f32 0.70710677, %v2730_v45  ;;  %v764_v49 = vmul.f32 0.5, %v2666_v51 }
 0x13b   : > { %v2737_v41 = vpop.f32.mrf.mxu0  ;;  %1080 = vst [vmem:[#allocation2 + $0x108] sm:$0xff] %v1016_v30  ;;  %v1017_v48 = vmul.f32 %v953_v37, %v761_v23  ;;  %v956_v46 = vadd.f32 1.0, %v2012_v43  ;;  %2025 = verf.f32 %v834_v38  ;;  %v835_v54 = vmul.f32 0.70710677, %v2733_v35 }
 0x13c   : > { %v2739_v42 = vpop.f32.mrf.mxu1  ;;  %1079 = vst [vmem:[#allocation2 + $0x150] sm:$0xff] %v1015_v44  ;;  %v1018_v53 = vmul.f32 %v954_v21, %v762_v24  ;;  %2027 = verf.f32 %v836_v39  ;;  %v2749_v55 = vadd.f32 %v2689_v40, %v2625_v61  ;;  %v2014_v59 = vpop.eup %2013  ;;  %v2755_v51 = vadd.f32 %v2693_v28, %v2619_v56 }
 0x13d   : > { %v2744_v50 = vpop.f32.mrf.mxu0  ;;  %1081 = vst [vmem:[#allocation2 + $0x60] sm:$0xff] %v1017_v48  ;;  %v1020_v62 = vmul.f32 %v956_v46, %v764_v49  ;;  %v2759_v63 = vadd.f32 %v2695_v52, %v2621_v57  ;;  %v2763_v0 = vadd.f32 %v2706_v2, %v2623_v60  ;;  %v2016_v5 = vpop.eup %2015  ;;  %v763_v40 = vmul.f32 0.5, %v2673_v16 }
 0x13e   : > { %v2751_v47 = vpop.f32.mrf.mxu1  ;;  %1082 = vst [vmem:[#allocation2 + $0xe0] sm:$0xff] %v1018_v53  ;;  %v955_v3 = vadd.f32 1.0, %v2014_v59  ;;  %2029 = verf.f32 %v835_v54  ;;  %v837_v7 = vmul.f32 0.70710677, %v2749_v55  ;;  %v765_v28 = vmul.f32 0.5, %v2676_v17 }
 0x13f   : > { %1084 = vst [vmem:[#allocation2 + $0x138] sm:$0xff] %v1020_v62  ;;  %v957_v8 = vadd.f32 1.0, %v2016_v5  ;;  %v838_v10 = vmul.f32 0.70710677, %v2755_v51  ;;  %v2769_v52 = vpop.f32.mrf.mxu0  ;;  %v2018_v6 = vpop.eup %2017  ;;  %v766_v2 = vmul.f32 0.5, %v2679_v22  ;;  %v2778_v17 = vadd.f32 %v2708_v4, %v2625_v61 }
 0x140   : > { %v1019_v11 = vmul.f32 %v955_v3, %v763_v40  ;;  %2031 = verf.f32 %v837_v7  ;;  %v840_v9 = vmul.f32 0.70710677, %v2759_v63  ;;  %v2773_v16 = vpop.f32.mrf.mxu1  ;;  %v958_v15 = vadd.f32 1.0, %v2018_v6 }
 0x141   : > { %v1021_v12 = vmul.f32 %v957_v8, %v765_v28  ;;  %2033 = verf.f32 %v838_v10  ;;  %v839_v18 = vmul.f32 0.70710677, %v2763_v0  ;;  %v2782_v19 = vadd.f32 %v2714_v13, %v2619_v56  ;;  %v552_v4 = vpop.f32.mrf.mxu0 }
 0x142   : > { %1083 = vst [vmem:[#allocation2 + $0x188] sm:$0xff] %v1019_v11  ;;  %2035 = verf.f32 %v840_v9  ;;  %v2786_v22 = vadd.f32 %v2716_v14, %v2621_v57  ;;  %v2020_v32 = vpop.eup %2019  ;;  %v1022_v20 = vmul.f32 %v958_v15, %v766_v2  ;;  %v768_v25 = vmul.f32 0.5, %v2698_v58  ;;  %v2799_v23 = vpop.f32.mrf.mxu1 }
 0x143   : > { %1085 = vst [vmem:[#allocation2 + $0x140] sm:$0xff] %v1021_v12  ;;  %2037 = verf.f32 %v839_v18  ;;  %v2791_v29 = vadd.f32 %v2724_v26, %v2623_v60  ;;  %v2022_v30 = vpop.eup %2021  ;;  %v960_v34 = vadd.f32 1.0, %v2020_v32  ;;  %v767_v13 = vmul.f32 0.5, %v2701_v31  ;;  %v2807_v48 = vpop.f32.mrf.mxu0 }
 0x144   : > { %v841_v36 = vmul.f32 0.70710677, %v2778_v17  ;;  %v2797_v14 = vadd.f32 %v2726_v27, %v2625_v61  ;;  %1086 = vst [vmem:[#allocation2 + $0x80] sm:$0xff] %v1022_v20  ;;  %v959_v58 = vadd.f32 1.0, %v2022_v30  ;;  %v769_v37 = vmul.f32 0.5, %v2704_v1  ;;  %v2818_v53 = vpop.f32.mrf.mxu1 }
 0x145   : > { %v842_v26 = vmul.f32 0.70710677, %v2782_v19  ;;  %v844_v38 = vmul.f32 0.70710677, %v2786_v22  ;;  %v2024_v43 = vpop.eup %2023  ;;  %v1024_v44 = vmul.f32 %v960_v34, %v768_v25  ;;  %v770_v31 = vmul.f32 0.5, %v2722_v33  ;;  %v558_v10 = vpop.f32.mrf.mxu0 }
 0x146   : > { %2039 = verf.f32 %v841_v36  ;;  %v843_v24 = vmul.f32 0.70710677, %v2791_v29  ;;  %v1023_v21 = vmul.f32 %v959_v58, %v767_v13  ;;  %v961_v27 = vadd.f32 1.0, %v2024_v43  ;;  %v2830_v2 = vpop.f32.mrf.mxu1 }
 0x147   : > { %v772_v39 = vmul.f32 0.5, %v2730_v45  ;;  %2041 = verf.f32 %v842_v26  ;;  %1088 = vst [vmem:[#allocation2 + $0x1b8] sm:$0xff] %v1024_v44  ;;  %v845_v1 = vmul.f32 0.70710677, %v2797_v14  ;;  %v2812_v46 = vadd.f32 %v2737_v41, %v2619_v56  ;;  %v2850_v34 = vpop.f32.mrf.mxu0 }
 0x148   : > { %v2026_v49 = vpop.eup %2025  ;;  %2043 = verf.f32 %v844_v38  ;;  %v2816_v33 = vadd.f32 %v2739_v42, %v2621_v57  ;;  %1087 = vst [vmem:[#allocation2 + $0x1a8] sm:$0xff] %v1023_v21  ;;  %v1025_v45 = vmul.f32 %v961_v27, %v769_v37  ;;  %v2822_v62 = vadd.f32 %v2744_v50, %v2623_v60 }
 0x149   : > { %v2028_v54 = vpop.eup %2027  ;;  %v962_v59 = vadd.f32 1.0, %v2026_v49  ;;  %2045 = verf.f32 %v843_v24  ;;  %v771_v40 = vmul.f32 0.5, %v2733_v35  ;;  %v846_v41 = vmul.f32 0.70710677, %v2812_v46  ;;  %v2865_v27 = vpop.f32.mrf.mxu0 }
 0x14a   : > { %v964_v5 = vadd.f32 1.0, %v2028_v54  ;;  %2047 = verf.f32 %v845_v1  ;;  %1089 = vst [vmem:[#allocation2 + $0x28] sm:$0xff] %v1025_v45  ;;  %v773_v7 = vmul.f32 0.5, %v2749_v55  ;;  %v774_v28 = vmul.f32 0.5, %v2755_v51 }
 0x14b   : > { %v2030_v3 = vpop.eup %2029  ;;  %v1026_v42 = vmul.f32 %v962_v59, %v770_v31  ;;  %v848_v8 = vmul.f32 0.70710677, %v2816_v33  ;;  %2049 = verf.f32 %v846_v41  ;;  %v847_v50 = vmul.f32 0.70710677, %v2822_v62 }
 0x14c   : > { %v1028_v6 = vmul.f32 %v964_v5, %v772_v39  ;;  %v963_v11 = vadd.f32 1.0, %v2030_v3  ;;  %v2834_v9 = vadd.f32 %v2751_v47, %v2625_v61  ;;  %v2838_v55 = vadd.f32 %v2769_v52, %v2619_v56 }
 0x14d   : > { %v2032_v35 = vpop.eup %2031  ;;  %1090 = vst [vmem:[#allocation2 + $0x1e8] sm:$0xff] %v1026_v42  ;;  %2051 = verf.f32 %v848_v8  ;;  %v2842_v51 = vadd.f32 %v2773_v16, %v2621_v57  ;;  %v2845_v32 = vadd.f32 %v552_v4, %v2623_v60  ;;  %v776_v47 = vmul.f32 0.5, %v2759_v63  ;;  %v723_v4 = vpop.f32.mrf.mxu1 }
 0x14e   : > { %v2034_v12 = vpop.eup %2033  ;;  %1092 = vst [vmem:[#allocation2 + $0x160] sm:$0xff] %v1028_v6  ;;  %v1027_v15 = vmul.f32 %v963_v11, %v771_v40  ;;  %v965_v18 = vadd.f32 1.0, %v2032_v35  ;;  %2053 = verf.f32 %v847_v50  ;;  %v775_v30 = vmul.f32 0.5, %v2763_v0  ;;  %v568_v6 = vpop.f32.mrf.mxu0 }
 0x14f   : > { %v2036_v20 = vpop.eup %2035  ;;  %v966_v25 = vadd.f32 1.0, %v2034_v12  ;;  %v849_v52 = vmul.f32 0.70710677, %v2834_v9  ;;  %v777_v58 = vmul.f32 0.5, %v2778_v17  ;;  %v850_v37 = vmul.f32 0.70710677, %v2838_v55  ;;  %v725_v54 = vpop.f32.mrf.mxu1 }
 0x150   : > { %v2038_v16 = vpop.eup %2037  ;;  %1091 = vst [vmem:[#allocation2 + $0xf8] sm:$0xff] %v1027_v15  ;;  %v1029_v13 = vmul.f32 %v965_v18, %v773_v7  ;;  %v968_v36 = vadd.f32 1.0, %v2036_v20  ;;  %v852_v63 = vmul.f32 0.70710677, %v2842_v51  ;;  %v778_v43 = vmul.f32 0.5, %v2782_v19 }
 0x151   : > { %v1030_v26 = vmul.f32 %v966_v25, %v774_v28  ;;  %v967_v38 = vadd.f32 1.0, %v2038_v16  ;;  %2055 = verf.f32 %v849_v52  ;;  %v851_v44 = vmul.f32 0.70710677, %v2845_v32  ;;  %v729_v50 = vpop.f32.mrf.mxu1 }
 0x152   : > { %1093 = vst [vmem:[#allocation2 + $0x30] sm:$0xff] %v1029_v13  ;;  %v1032_v0 = vmul.f32 %v968_v36, %v776_v47  ;;  %2057 = verf.f32 %v850_v37  ;;  %v2859_v17 = vadd.f32 %v2799_v23, %v2625_v61  ;;  %v2863_v21 = vadd.f32 %v2807_v48, %v2619_v56  ;;  %v570_v13 = vpop.f32.mrf.mxu0 }
 0x153   : > { %v2040_v31 = vpop.eup %2039  ;;  %1094 = vst [vmem:[#allocation2 + $0x1e0] sm:$0xff] %v1030_v26  ;;  %v1031_v24 = vmul.f32 %v967_v38, %v775_v30  ;;  %2059 = verf.f32 %v852_v63  ;;  %v780_v49 = vmul.f32 0.5, %v2786_v22  ;;  %v2870_v1 = vadd.f32 %v2818_v53, %v2621_v57  ;;  %v731_v26 = vpop.f32.mrf.mxu1 }
 0x154   : > { %v2042_v39 = vpop.eup %2041  ;;  %1096 = vst [vmem:[#allocation2 + $0xf0] sm:$0xff] %v1032_v0  ;;  %v969_v19 = vadd.f32 1.0, %v2040_v31  ;;  %2061 = verf.f32 %v851_v44  ;;  %v779_v59 = vmul.f32 0.5, %v2791_v29  ;;  %v853_v48 = vmul.f32 0.70710677, %v2859_v17 }
 0x155   : > { %v2044_v45 = vpop.eup %2043  ;;  %1095 = vst [vmem:[#allocation2] sm:$0xff] %v1031_v24  ;;  %v970_v23 = vadd.f32 1.0, %v2042_v39  ;;  %v2875_v5 = vadd.f32 %v558_v10, %v2623_v60  ;;  %v781_v22 = vmul.f32 0.5, %v2797_v14  ;;  %v854_v42 = vmul.f32 0.70710677, %v2863_v21  ;;  %v574_v39 = vpop.f32.mrf.mxu0 }
 0x156   : > { %v2046_v40 = vpop.eup %2045  ;;  %v1033_v41 = vmul.f32 %v969_v19, %v777_v58  ;;  %v972_v3 = vadd.f32 1.0, %v2044_v45  ;;  %2063 = verf.f32 %v853_v48  ;;  %v856_v8 = vmul.f32 0.70710677, %v2870_v1 }
 0x157   : > { %v2048_v53 = vpop.eup %2047  ;;  %v1034_v7 = vmul.f32 %v970_v23, %v778_v43  ;;  %v971_v28 = vadd.f32 1.0, %v2046_v40  ;;  %v782_v10 = vmul.f32 0.5, %v2812_v46  ;;  %2065 = verf.f32 %v854_v42  ;;  %v735_v23 = vpop.f32.mrf.mxu1 }
 0x158   : > { %1097 = vst [vmem:[#allocation2 + $0x8] sm:$0xff] %v1033_v41  ;;  %v1036_v29 = vmul.f32 %v972_v3, %v780_v49  ;;  %v973_v11 = vadd.f32 1.0, %v2048_v53  ;;  %v2050_v35 = vpop.eup %2049  ;;  %2067 = verf.f32 %v856_v8  ;;  %v855_v14 = vmul.f32 0.70710677, %v2875_v5 }
 0x159   : > { %1098 = vst [vmem:[#allocation2 + $0x148] sm:$0xff] %v1034_v7  ;;  %v1035_v12 = vmul.f32 %v971_v28, %v779_v59  ;;  %v2884_v15 = vadd.f32 %v2830_v2, %v2625_v61  ;;  %v974_v25 = vadd.f32 1.0, %v2050_v35  ;;  %v2888_v47 = vadd.f32 %v2850_v34, %v2619_v56  ;;  %v576_v28 = vpop.f32.mrf.mxu0 }
 0x15a   : > { %v2052_v18 = vpop.eup %2051  ;;  %1100 = vst [vmem:[#allocation2 + $0x100] sm:$0xff] %v1036_v29  ;;  %v1037_v20 = vmul.f32 %v973_v11, %v781_v22  ;;  %v2891_v46 = vadd.f32 %v723_v4, %v2621_v57  ;;  %v784_v52 = vmul.f32 0.5, %v2816_v33  ;;  %2069 = verf.f32 %v855_v14  ;;  %v737_v11 = vpop.f32.mrf.mxu1 }
 0x15b   : > { %v2054_v30 = vpop.eup %2053  ;;  %1099 = vst [vmem:[#allocation2 + $0x1d0] sm:$0xff] %v1035_v12  ;;  %v976_v16 = vadd.f32 1.0, %v2052_v18  ;;  %v857_v2 = vmul.f32 0.70710677, %v2884_v15  ;;  %v1038_v36 = vmul.f32 %v974_v25, %v782_v10  ;;  %v783_v58 = vmul.f32 0.5, %v2822_v62 }
 0x15c   : > { %1101 = vst [vmem:[#allocation2 + $0xc8] sm:$0xff] %v1037_v20  ;;  %v975_v37 = vadd.f32 1.0, %v2054_v30  ;;  %v858_v34 = vmul.f32 0.70710677, %v2888_v47  ;;  %v785_v4 = vmul.f32 0.5, %v2834_v9  ;;  %v2901_v43 = vadd.f32 %v2865_v27, %v2623_v60 }
 0x15d   : > { %v1040_v38 = vmul.f32 %v976_v16, %v784_v52  ;;  %2071 = verf.f32 %v857_v2  ;;  %v860_v63 = vmul.f32 0.70710677, %v2891_v46  ;;  %1102 = vst [vmem:[#allocation2 + $0x40] sm:$0xff] %v1038_v36  ;;  %v2904_v62 = vadd.f32 %v725_v54, %v2625_v61 }
 0x15e   : > { %v2056_v33 = vpop.eup %2055  ;;  %v1039_v0 = vmul.f32 %v975_v37, %v783_v58  ;;  %2073 = verf.f32 %v858_v34  ;;  %v2907_v9 = vadd.f32 %v568_v6, %v2619_v56  ;;  %v2910_v24 = vadd.f32 %v729_v50, %v2621_v57 }
 0x15f   : > { %v2058_v44 = vpop.eup %2057  ;;  %1104 = vst [vmem:[#allocation2 + $0x20] sm:$0xff] %v1040_v38  ;;  %v977_v31 = vadd.f32 1.0, %v2056_v33  ;;  %2075 = verf.f32 %v860_v63  ;;  %v786_v49 = vmul.f32 0.5, %v2838_v55  ;;  %v788_v45 = vmul.f32 0.5, %v2842_v51 }
 0x160   : > { %v2060_v19 = vpop.eup %2059  ;;  %1103 = vst [vmem:[#allocation2 + $0x1f8] sm:$0xff] %v1039_v0  ;;  %v978_v27 = vadd.f32 1.0, %v2058_v44  ;;  %v859_v54 = vmul.f32 0.70710677, %v2901_v43  ;;  %v787_v41 = vmul.f32 0.5, %v2845_v32  ;;  %v789_v7 = vmul.f32 0.5, %v2859_v17 }
 0x161   : > { %v2062_v59 = vpop.eup %2061  ;;  %v1041_v48 = vmul.f32 %v977_v31, %v785_v4  ;;  %v980_v40 = vadd.f32 1.0, %v2060_v19  ;;  %v861_v3 = vmul.f32 0.70710677, %v2904_v62  ;;  %v862_v53 = vmul.f32 0.70710677, %v2907_v9 }
 0x162   : > { %v1042_v22 = vmul.f32 %v978_v27, %v786_v49  ;;  %v979_v42 = vadd.f32 1.0, %v2062_v59  ;;  %2077 = verf.f32 %v859_v54  ;;  %v864_v51 = vmul.f32 0.70710677, %v2910_v24 }
 0x163   : > { %1105 = vst [vmem:[#allocation2 + $0x128] sm:$0xff] %v1041_v48  ;;  %v1044_v55 = vmul.f32 %v980_v40, %v788_v45  ;;  %2079 = verf.f32 %v861_v3  ;;  %v2064_v8 = vpop.eup %2063  ;;  %v2921_v32 = vadd.f32 %v570_v13, %v2623_v60  ;;  %v2924_v29 = vadd.f32 %v731_v26, %v2625_v61  ;;  %v580_v13 = vpop.f32.mrf.mxu0 }
 0x164   : > { %1106 = vst [vmem:[#allocation2 + $0x1a0] sm:$0xff] %v1042_v22  ;;  %v1043_v6 = vmul.f32 %v979_v42, %v787_v41  ;;  %2081 = verf.f32 %v862_v53  ;;  %v2066_v10 = vpop.eup %2065  ;;  %v981_v50 = vadd.f32 1.0, %v2064_v8  ;;  %v2927_v17 = vadd.f32 %v574_v39, %v2619_v56 }
 0x165   : > { %1108 = vst [vmem:[#allocation2 + $0xe8] sm:$0xff] %v1044_v55  ;;  %2083 = verf.f32 %v864_v51  ;;  %v2930_v35 = vadd.f32 %v735_v23, %v2621_v57  ;;  %v2068_v12 = vpop.eup %2067  ;;  %v790_v14 = vmul.f32 0.5, %v2863_v21  ;;  %v982_v18 = vadd.f32 1.0, %v2066_v10  ;;  %v741_v21 = vpop.f32.mrf.mxu1 }
 0x166   : > { %1107 = vst [vmem:[#allocation2 + $0x1f0] sm:$0xff] %v1043_v6  ;;  %v792_v20 = vmul.f32 0.5, %v2870_v1  ;;  %v863_v25 = vmul.f32 0.70710677, %v2921_v32  ;;  %v1045_v30 = vmul.f32 %v981_v50, %v789_v7  ;;  %v984_v52 = vadd.f32 1.0, %v2068_v12  ;;  %v582_v45 = vpop.f32.mrf.mxu0 }
 0x167   : > { %v791_v16 = vmul.f32 0.5, %v2875_v5  ;;  %v865_v2 = vmul.f32 0.70710677, %v2924_v29  ;;  %v2070_v36 = vpop.eup %2069  ;;  %v1046_v58 = vmul.f32 %v982_v18, %v790_v14  ;;  %v793_v37 = vmul.f32 0.5, %v2884_v15  ;;  %v743_v48 = vpop.f32.mrf.mxu1 }
 0x168   : > { %2085 = verf.f32 %v863_v25  ;;  %v866_v34 = vmul.f32 0.70710677, %v2927_v17  ;;  %1109 = vst [vmem:[#allocation2 + $0x78] sm:$0xff] %v1045_v30  ;;  %v1048_v26 = vmul.f32 %v984_v52, %v792_v20  ;;  %v983_v1 = vadd.f32 1.0, %v2070_v36 }
 0x169   : > { %2087 = verf.f32 %v865_v2  ;;  %v868_v38 = vmul.f32 0.70710677, %v2930_v35  ;;  %1110 = vst [vmem:[#allocation2 + $0x70] sm:$0xff] %v1046_v58  ;;  %v2941_v5 = vadd.f32 %v576_v28, %v2623_v60  ;;  %v2944_v63 = vadd.f32 %v737_v11, %v2625_v61 }
 0x16a   : > { %v2072_v4 = vpop.eup %2071  ;;  %2089 = verf.f32 %v866_v34  ;;  %v2947_v15 = vadd.f32 %v580_v13, %v2619_v56  ;;  %1112 = vst [vmem:[#allocation2 + $0x1d8] sm:$0xff] %v1048_v26  ;;  %v1047_v0 = vmul.f32 %v983_v1, %v791_v16  ;;  %v2950_v31 = vadd.f32 %v741_v21, %v2621_v57 }
 0x16b   : > { %v2074_v33 = vpop.eup %2073  ;;  %v985_v44 = vadd.f32 1.0, %v2072_v4  ;;  %2091 = verf.f32 %v868_v38  ;;  %v794_v19 = vmul.f32 0.5, %v2888_v47  ;;  %v867_v27 = vmul.f32 0.70710677, %v2941_v5 }
 0x16c   : > { %v2076_v39 = vpop.eup %2075  ;;  %v986_v49 = vadd.f32 1.0, %v2074_v33  ;;  %1111 = vst [vmem:[#allocation2 + $0x90] sm:$0xff] %v1047_v0  ;;  %v796_v56 = vmul.f32 0.5, %v2891_v46  ;;  %v869_v59 = vmul.f32 0.70710677, %v2944_v63  ;;  %v2959_v22 = vadd.f32 %v582_v45, %v2623_v60 }
 0x16d   : > { %v1049_v54 = vmul.f32 %v985_v44, %v793_v37  ;;  %v988_v23 = vadd.f32 1.0, %v2076_v39  ;;  %2093 = verf.f32 %v867_v27  ;;  %v870_v57 = vmul.f32 0.70710677, %v2947_v15 }
 0x16e   : > { %v1050_v40 = vmul.f32 %v986_v49, %v794_v19  ;;  %2095 = verf.f32 %v869_v59  ;;  %v872_v47 = vmul.f32 0.70710677, %v2950_v31  ;;  %v795_v46 = vmul.f32 0.5, %v2901_v43 }
 0x16f   : > { %v2078_v41 = vpop.eup %2077  ;;  %1113 = vst [vmem:[#allocation2 + $0xd0] sm:$0xff] %v1049_v54  ;;  %v1052_v3 = vmul.f32 %v988_v23, %v796_v56  ;;  %2097 = verf.f32 %v870_v57  ;;  %v2963_v55 = vadd.f32 %v743_v48, %v2625_v61  ;;  %v797_v51 = vmul.f32 0.5, %v2904_v62 }
 0x170   : > { %v2080_v42 = vpop.eup %2079  ;;  %1114 = vst [vmem:[#allocation2 + $0xb8] sm:$0xff] %v1050_v40  ;;  %v987_v53 = vadd.f32 1.0, %v2078_v41  ;;  %2099 = verf.f32 %v872_v47  ;;  %v871_v8 = vmul.f32 0.70710677, %v2959_v22  ;;  %v798_v11 = vmul.f32 0.5, %v2907_v9 }
 0x171   : > { %v2082_v7 = vpop.eup %2081  ;;  %1116 = vst [vmem:[#allocation2 + $0xa8] sm:$0xff] %v1052_v3  ;;  %v989_v28 = vadd.f32 1.0, %v2080_v42  ;;  %v873_v43 = vmul.f32 0.70710677, %v2963_v55  ;;  %v800_v12 = vmul.f32 0.5, %v2910_v24  ;;  %v799_v25 = vmul.f32 0.5, %v2921_v32 }
 0x172   : > { %v2084_v6 = vpop.eup %2083  ;;  %v1051_v60 = vmul.f32 %v987_v53, %v795_v46  ;;  %v990_v10 = vadd.f32 1.0, %v2082_v7  ;;  %2101 = verf.f32 %v871_v8  ;;  %v801_v52 = vmul.f32 0.5, %v2924_v29 }
 0x173   : > { %v1053_v50 = vmul.f32 %v989_v28, %v797_v51  ;;  %v992_v61 = vadd.f32 1.0, %v2084_v6  ;;  %2103 = verf.f32 %v873_v43  ;;  %v802_v13 = vmul.f32 0.5, %v2927_v17 }
 0x174   : > { %1115 = vst [vmem:[#allocation2 + $0x88] sm:$0xff] %v1051_v60  ;;  %v1054_v14 = vmul.f32 %v990_v10, %v798_v11  ;;  %v804_v37 = vmul.f32 0.5, %v2930_v35  ;;  %v803_v38 = vmul.f32 0.5, %v2941_v5  ;;  %v805_v33 = vmul.f32 0.5, %v2944_v63 }
 0x175   : > { %v2086_v62 = vpop.eup %2085  ;;  %1117 = vst [vmem:[#allocation2 + $0x1c8] sm:$0xff] %v1053_v50  ;;  %v1056_v18 = vmul.f32 %v992_v61, %v800_v12  ;;  %v806_v35 = vmul.f32 0.5, %v2947_v15  ;;  %v808_v49 = vmul.f32 0.5, %v2950_v31  ;;  %v807_v23 = vmul.f32 0.5, %v2959_v22 }
 0x176   : > { %v2088_v20 = vpop.eup %2087  ;;  %1118 = vst [vmem:[#allocation2 + $0x170] sm:$0xff] %v1054_v14  ;;  %v991_v30 = vadd.f32 1.0, %v2086_v62  ;;  %v809_v63 = vmul.f32 0.5, %v2963_v55 }
 0x177   : > { %v2090_v9 = vpop.eup %2089  ;;  %1120 = vst [vmem:[#allocation2 + $0x68] sm:$0xff] %v1056_v18  ;;  %v993_v16 = vadd.f32 1.0, %v2088_v20 }
 0x178   : > { %v2092_v2 = vpop.eup %2091  ;;  %v1055_v24 = vmul.f32 %v991_v30, %v799_v25  ;;  %v994_v36 = vadd.f32 1.0, %v2090_v9 }
 0x179   : > { %v1057_v58 = vmul.f32 %v993_v16, %v801_v52  ;;  %v996_v34 = vadd.f32 1.0, %v2092_v2 }
 0x17a   : > { %1119 = vst [vmem:[#allocation2 + $0x178] sm:$0xff] %v1055_v24  ;;  %v1058_v21 = vmul.f32 %v994_v36, %v802_v13  ;;  %v2094_v26 = vpop.eup %2093 }
 0x17b   : > { %1121 = vst [vmem:[#allocation2 + $0x190] sm:$0xff] %v1057_v58  ;;  %v1060_v32 = vmul.f32 %v996_v34, %v804_v37  ;;  %v2096_v1 = vpop.eup %2095  ;;  %v995_v29 = vadd.f32 1.0, %v2094_v26 }
 0x17c   : > { %1122 = vst [vmem:[#allocation2 + $0x198] sm:$0xff] %v1058_v21  ;;  %v2098_v4 = vpop.eup %2097  ;;  %v997_v17 = vadd.f32 1.0, %v2096_v1 }
 0x17d   : > { %1124 = vst [vmem:[#allocation2 + $0xc0] sm:$0xff] %v1060_v32  ;;  %v2100_v0 = vpop.eup %2099  ;;  %v1059_v44 = vmul.f32 %v995_v29, %v803_v38  ;;  %v998_v39 = vadd.f32 1.0, %v2098_v4 }
 0x17e   : > { %v1061_v19 = vmul.f32 %v997_v17, %v805_v33  ;;  %v1000_v27 = vadd.f32 1.0, %v2100_v0 }
 0x17f   : > { %v2102_v45 = vpop.eup %2101  ;;  %1123 = vst [vmem:[#allocation2 + $0x38] sm:$0xff] %v1059_v44  ;;  %v1062_v54 = vmul.f32 %v998_v39, %v806_v35 }
 0x180   : > { %v2104_v56 = vpop.eup %2103  ;;  %1125 = vst [vmem:[#allocation2 + $0x1c0] sm:$0xff] %v1061_v19  ;;  %v1064_v5 = vmul.f32 %v1000_v27, %v808_v49  ;;  %v999_v59 = vadd.f32 1.0, %v2102_v45 }
 0x181   : > { %1126 = vst [vmem:[#allocation2 + $0x158] sm:$0xff] %v1062_v54  ;;  %v1001_v48 = vadd.f32 1.0, %v2104_v56 }
 0x182   : > { %1128 = vst [vmem:[#allocation2 + $0x58] sm:$0xff] %v1064_v5  ;;  %v1063_v15 = vmul.f32 %v999_v59, %v807_v23 }
 0x183   : > { %v1065_v40 = vmul.f32 %v1001_v48, %v809_v63 }
 0x184   : > { %1127 = vst [vmem:[#allocation2 + $0x10] sm:$0xff] %v1063_v15 }
 0x185   : > { %1129 = vst [vmem:[#allocation2 + $0xa0] sm:$0xff] %v1065_v40 }
 0x186 PF: > { %v1225_v31 = vld [vmem:[%s2411_s9 + $0xf8] sm:$0xff]  ;;  %v1224_v41 = vld [vmem:[%s2411_s9 + $0xf0] sm:$0xff]  ;;  %v1223_v47 = vld [vmem:[%s2411_s9 + $0xe8] sm:$0xff]  ;;  %s1867_s6 = sshll.u32 %s2241_s25, 6  ;;  %s1705_s10 = sshll.u32 %s2437_s23, 4  ;;  %s3187_s10 = int_to_ptr.vmem [resolvable:$true] %s1705_s10 }
 0x187   : > { %v1289_v57 = vld [vmem:[%s2411_s9 + $0x2f8] sm:$0xff]  ;;  %1334 = vmatprep.subr.mxu0 %v1225_v31  ;;  %v1288_v3 = vld [vmem:[%s2411_s9 + $0x2f0] sm:$0xff]  ;;  %v1287_v22 = vld [vmem:[%s2411_s9 + $0x2e8] sm:$0xff]  ;;  %s3276_s8 = sand.u32 1, %s2217_s19   ;;  %s2133_s11 = scalar_lea.vmem %s3187_s10, 4096 }
 0x188   : > { %1495 = vmatprep.subr.mxu1 %v1289_v57  ;;  %1335 = vmatpush1.msra.mxu0 %v1224_v41  ;;  %v1222_v42 = vld [vmem:[%s2411_s9 + $0xe0] sm:$0xff]  ;;  %v1221_v53 = vld [vmem:[%s2411_s9 + $0xd8] sm:$0xff]  ;;  %v1220_v7 = vld [vmem:[%s2411_s9 + $0xd0] sm:$0xff]  ;;  %s3193_s27 = scalar_lea.sflag [#allocation5], %s3276_s8  ;;  %p2134_p7 = scmp.ne.s32.totalorder %s3187_s10, %s2133_s11 }
 0x189   : > { %1496 = vmatpush1.msra.mxu1 %v1288_v3  ;;  %v1286_v46 = vld [vmem:[%s2411_s9 + $0x2e0] sm:$0xff]  ;;  %1336 = vmatprep.subr.mxu0 %v1223_v47  ;;  %v1285_v55 = vld [vmem:[%s2411_s9 + $0x2d8] sm:$0xff]  ;;  %v1284_v51 = vld [vmem:[%s2411_s9 + $0x2d0] sm:$0xff]  ;;  %s2260_s13 = smov [#allocation6]  }
 0x18a   : > { %1497 = vmatprep.subr.mxu1 %v1287_v22  ;;  %1337 = vmatpush1.msra.mxu0 %v1222_v42  ;;  %v1219_v28 = vld [vmem:[%s2411_s9 + $0xc8] sm:$0xff]  ;;  %v1218_v6 = vld [vmem:[%s2411_s9 + $0xc0] sm:$0xff]  ;;  %v1217_v11 = vld [vmem:[%s2411_s9 + $0xb8] sm:$0xff]  ;;  %p2135_p9 = pnand %p2134_p7, %p2384_p13  ;;  %s2137_s30 = sshll.u32 %s2260_s13, 4  ;;  %s2138_s30 = int_to_ptr.vmem [resolvable:$false] %s2137_s30 }
 0x18b   : > { %1498 = vmatpush1.msra.mxu1 %v1286_v46  ;;  %v1283_v8 = vld [vmem:[%s2411_s9 + $0x2c8] sm:$0xff]  ;;  %1338 = vmatprep.subr.mxu0 %v1221_v53  ;;  %v1282_v60 = vld [vmem:[%s2411_s9 + $0x2c0] sm:$0xff]  ;;  %v1281_v10 = vld [vmem:[%s2411_s9 + $0x2b8] sm:$0xff]  ;;  %s2139_s15 = scalar_lea.vmem %s2138_s30, 8192  ;;  %p2140_p11 = scmp.lt.s32.totalorder %s3187_s10, %s2138_s30 }
 0x18c   : > { %1499 = vmatprep.subr.mxu1 %v1285_v55  ;;  %1339 = vmatpush1.msra.mxu0 %v1220_v7  ;;  %v1216_v43 = vld [vmem:[%s2411_s9 + $0xb0] sm:$0xff]  ;;  %v1215_v12 = vld [vmem:[%s2411_s9 + $0xa8] sm:$0xff]  ;;  %v1214_v14 = vld [vmem:[%s2411_s9 + $0xa0] sm:$0xff]  ;;  %p2136_p10 = pneg %p2135_p9  ;;  %p2141_p12 = scmp.lt.s32.totalorder %s2139_s15, %s2133_s11 }
 0x18d   : > { %1500 = vmatpush1.msra.mxu1 %v1284_v51  ;;  %1340 = vmatprep.subr.mxu0 %v1219_v28  ;;  %v1280_v50 = vld [vmem:[%s2411_s9 + $0x2b0] sm:$0xff]  ;;  %v1279_v61 = vld [vmem:[%s2411_s9 + $0x2a8] sm:$0xff]  ;;  %v1278_v62 = vld [vmem:[%s2411_s9 + $0x2a0] sm:$0xff] }
 0x18e   : > { %1501 = vmatprep.subr.mxu1 %v1283_v8  ;;  %1341 = vmatpush1.msra.mxu0 %v1218_v6  ;;  %v1213_v18 = vld [vmem:[%s2411_s9 + $0x98] sm:$0xff]  ;;  %v1212_v25 = vld [vmem:[%s2411_s9 + $0x90] sm:$0xff]  ;;  %v1211_v9 = vld [vmem:[%s2411_s9 + $0x88] sm:$0xff]  ;;  %p2142_p0 = por %p2141_p12, %p2140_p11 }
 0x18f   : > { %1502 = vmatpush1.msra.mxu1 %v1282_v60  ;;  %1342 = vmatprep.subr.mxu0 %v1217_v11  ;;  %v1277_v20 = vld [vmem:[%s2411_s9 + $0x298] sm:$0xff]  ;;  %v1276_v30 = vld [vmem:[%s2411_s9 + $0x290] sm:$0xff]  ;;  %v1275_v52 = vld [vmem:[%s2411_s9 + $0x288] sm:$0xff] }
 0x190   : > { %1503 = vmatprep.subr.mxu1 %v1281_v10  ;;  %1343 = vmatpush1.msra.mxu0 %v1216_v43  ;;  %v1210_v16 = vld [vmem:[%s2411_s9 + $0x80] sm:$0xff]  ;;  %v1209_v24 = vld [vmem:[%s2411_s9 + $0x78] sm:$0xff]  ;;  %v1208_v36 = vld [vmem:[%s2411_s9 + $0x70] sm:$0xff]  ;;  %p2143_p3 = pnand %p2142_p0, %p2136_p10 }
 0x191   : > { %1504 = vmatpush1.msra.mxu1 %v1280_v50  ;;  %1344 = vmatprep.subr.mxu0 %v1215_v12  ;;  %v1274_v2 = vld [vmem:[%s2411_s9 + $0x280] sm:$0xff]  ;;  %v1273_v13 = vld [vmem:[%s2411_s9 + $0x278] sm:$0xff]  ;;  %v1272_v58 = vld [vmem:[%s2411_s9 + $0x270] sm:$0xff] }
 0x192   : > { %1505 = vmatprep.subr.mxu1 %v1279_v61  ;;  %1345 = vmatpush1.msra.mxu0 %v1214_v14  ;;  %v1207_v37 = vld [vmem:[%s2411_s9 + $0x68] sm:$0xff]  ;;  %v1206_v21 = vld [vmem:[%s2411_s9 + $0x60] sm:$0xff]  ;;  %v1205_v32 = vld [vmem:[%s2411_s9 + $0x58] sm:$0xff] }
 0x193   : > { %1506 = vmatpush1.msra.mxu1 %v1278_v62  ;;  %1346 = vmatprep.subr.mxu0 %v1213_v18  ;;  %v1271_v34 = vld [vmem:[%s2411_s9 + $0x268] sm:$0xff]  ;;  %v1270_v26 = vld [vmem:[%s2411_s9 + $0x260] sm:$0xff]  ;;  %v1269_v1 = vld [vmem:[%s2411_s9 + $0x258] sm:$0xff] }
 0x194   : > { %1507 = vmatprep.subr.mxu1 %v1277_v20  ;;  %1347 = vmatpush1.msra.mxu0 %v1212_v25  ;;  %v1204_v38 = vld [vmem:[%s2411_s9 + $0x50] sm:$0xff]  ;;  %v1203_v4 = vld [vmem:[%s2411_s9 + $0x48] sm:$0xff]  ;;  %v1202_v17 = vld [vmem:[%s2411_s9 + $0x40] sm:$0xff] }
 0x195   : > { %1508 = vmatpush1.msra.mxu1 %v1276_v30  ;;  %1348 = vmatprep.subr.mxu0 %v1211_v9  ;;  %v1268_v29 = vld [vmem:[%s2411_s9 + $0x250] sm:$0xff]  ;;  %v1267_v33 = vld [vmem:[%s2411_s9 + $0x248] sm:$0xff]  ;;  %v1266_v0 = vld [vmem:[%s2411_s9 + $0x240] sm:$0xff] }
 0x196   : > { %1509 = vmatprep.subr.mxu1 %v1275_v52  ;;  %1349 = vmatpush1.msra.mxu0 %v1210_v16  ;;  %v1201_v44 = vld [vmem:[%s2411_s9 + $0x38] sm:$0xff]  ;;  %v1200_v39 = vld [vmem:[%s2411_s9 + $0x30] sm:$0xff]  ;;  %v1199_v49 = vld [vmem:[%s2411_s9 + $0x28] sm:$0xff] }
 0x197   : > { %1510 = vmatpush1.msra.mxu1 %v1274_v2  ;;  %1350 = vmatprep.subr.mxu0 %v1209_v24  ;;  %v1265_v35 = vld [vmem:[%s2411_s9 + $0x238] sm:$0xff]  ;;  %v1264_v19 = vld [vmem:[%s2411_s9 + $0x230] sm:$0xff]  ;;  %v1263_v27 = vld [vmem:[%s2411_s9 + $0x228] sm:$0xff] }
 0x198   : > { %1511 = vmatprep.subr.mxu1 %v1273_v13  ;;  %1351 = vmatpush1.msra.mxu0 %v1208_v36  ;;  %v1198_v45 = vld [vmem:[%s2411_s9 + $0x20] sm:$0xff]  ;;  %v1197_v56 = vld [vmem:[%s2411_s9 + $0x18] sm:$0xff]  ;;  %v1196_v23 = vld [vmem:[%s2411_s9 + $0x10] sm:$0xff] }
 0x199   : > { %1512 = vmatpush1.msra.mxu1 %v1272_v58  ;;  %1352 = vmatprep.subr.mxu0 %v1207_v37  ;;  %v1262_v54 = vld [vmem:[%s2411_s9 + $0x220] sm:$0xff]  ;;  %v1261_v5 = vld [vmem:[%s2411_s9 + $0x218] sm:$0xff]  ;;  %v1260_v59 = vld [vmem:[%s2411_s9 + $0x210] sm:$0xff] }
 0x19a   : > { %1513 = vmatprep.subr.mxu1 %v1271_v34  ;;  %1353 = vmatpush1.msra.mxu0 %v1206_v21  ;;  %v1195_v63 = vld [vmem:[%s2411_s9 + $0x8] sm:$0xff]  ;;  %v1194_v15 = vld [vmem:[%s2411_s9] sm:$0xff]  ;;  %v1257_v31 = vld [vmem:[%s2411_s9 + $0x1f8] sm:$0xff] }
 0x19b   : > { %1514 = vmatpush1.msra.mxu1 %v1270_v26  ;;  %1354 = vmatprep.subr.mxu0 %v1205_v32  ;;  %v1259_v48 = vld [vmem:[%s2411_s9 + $0x208] sm:$0xff]  ;;  %v1258_v40 = vld [vmem:[%s2411_s9 + $0x200] sm:$0xff]  ;;  %v1321_v57 = vld [vmem:[%s2411_s9 + $0x3f8] sm:$0xff] }
 0x19c   : > { %1515 = vmatprep.subr.mxu1 %v1269_v1  ;;  %1355 = vmatpush1.msra.mxu0 %v1204_v38  ;;  %v1256_v41 = vld [vmem:[%s2411_s9 + $0x1f0] sm:$0xff]  ;;  %v1255_v47 = vld [vmem:[%s2411_s9 + $0x1e8] sm:$0xff]  ;;  %v1254_v42 = vld [vmem:[%s2411_s9 + $0x1e0] sm:$0xff] }
 0x19d   : > { %1516 = vmatpush1.msra.mxu1 %v1268_v29  ;;  %1356 = vmatprep.subr.mxu0 %v1203_v4  ;;  %v1320_v3 = vld [vmem:[%s2411_s9 + $0x3f0] sm:$0xff]  ;;  %v1319_v22 = vld [vmem:[%s2411_s9 + $0x3e8] sm:$0xff]  ;;  %v1318_v46 = vld [vmem:[%s2411_s9 + $0x3e0] sm:$0xff] }
 0x19e   : > { %1517 = vmatprep.subr.mxu1 %v1267_v33  ;;  %1357 = vmatpush1.msra.mxu0 %v1202_v17  ;;  %v1253_v53 = vld [vmem:[%s2411_s9 + $0x1d8] sm:$0xff]  ;;  %v1252_v7 = vld [vmem:[%s2411_s9 + $0x1d0] sm:$0xff]  ;;  %v1251_v28 = vld [vmem:[%s2411_s9 + $0x1c8] sm:$0xff] }
 0x19f   : > { %1518 = vmatpush1.msra.mxu1 %v1266_v0  ;;  %1358 = vmatprep.subr.mxu0 %v1201_v44  ;;  %v1317_v55 = vld [vmem:[%s2411_s9 + $0x3d8] sm:$0xff]  ;;  %v1316_v51 = vld [vmem:[%s2411_s9 + $0x3d0] sm:$0xff]  ;;  %v1315_v8 = vld [vmem:[%s2411_s9 + $0x3c8] sm:$0xff] }
 0x1a0   : > { %1519 = vmatprep.subr.mxu1 %v1265_v35  ;;  %1359 = vmatpush1.msra.mxu0 %v1200_v39  ;;  %v1250_v6 = vld [vmem:[%s2411_s9 + $0x1c0] sm:$0xff]  ;;  %v1249_v11 = vld [vmem:[%s2411_s9 + $0x1b8] sm:$0xff]  ;;  %v1248_v43 = vld [vmem:[%s2411_s9 + $0x1b0] sm:$0xff] }
 0x1a1   : > { %1520 = vmatpush1.msra.mxu1 %v1264_v19  ;;  %1360 = vmatprep.subr.mxu0 %v1199_v49  ;;  %v1314_v60 = vld [vmem:[%s2411_s9 + $0x3c0] sm:$0xff]  ;;  %v1313_v10 = vld [vmem:[%s2411_s9 + $0x3b8] sm:$0xff]  ;;  %v1312_v50 = vld [vmem:[%s2411_s9 + $0x3b0] sm:$0xff] }
 0x1a2   : > { %1521 = vmatprep.subr.mxu1 %v1263_v27  ;;  %1361 = vmatpush1.msra.mxu0 %v1198_v45  ;;  %v1247_v12 = vld [vmem:[%s2411_s9 + $0x1a8] sm:$0xff]  ;;  %v1246_v14 = vld [vmem:[%s2411_s9 + $0x1a0] sm:$0xff]  ;;  %v1245_v18 = vld [vmem:[%s2411_s9 + $0x198] sm:$0xff] }
 0x1a3   : > { %1522 = vmatpush1.msra.mxu1 %v1262_v54  ;;  %1362 = vmatprep.subr.mxu0 %v1197_v56  ;;  %v1311_v61 = vld [vmem:[%s2411_s9 + $0x3a8] sm:$0xff]  ;;  %v1310_v62 = vld [vmem:[%s2411_s9 + $0x3a0] sm:$0xff]  ;;  %v1309_v20 = vld [vmem:[%s2411_s9 + $0x398] sm:$0xff] }
 0x1a4   : > { %1523 = vmatprep.subr.mxu1 %v1261_v5  ;;  %1363 = vmatpush1.msra.mxu0 %v1196_v23  ;;  %v1244_v25 = vld [vmem:[%s2411_s9 + $0x190] sm:$0xff]  ;;  %v1243_v9 = vld [vmem:[%s2411_s9 + $0x188] sm:$0xff]  ;;  %v1242_v16 = vld [vmem:[%s2411_s9 + $0x180] sm:$0xff] }
 0x1a5   : > { %1524 = vmatpush1.msra.mxu1 %v1260_v59  ;;  %1364 = vmatprep.subr.mxu0 %v1195_v63  ;;  %v1308_v30 = vld [vmem:[%s2411_s9 + $0x390] sm:$0xff]  ;;  %v1307_v52 = vld [vmem:[%s2411_s9 + $0x388] sm:$0xff]  ;;  %v1306_v2 = vld [vmem:[%s2411_s9 + $0x380] sm:$0xff] }
 0x1a6   : > { %1525 = vmatprep.subr.mxu1 %v1259_v48  ;;  %1365 = vmatpush1.msra.mxu0 %v1194_v15  ;;  %v1241_v24 = vld [vmem:[%s2411_s9 + $0x178] sm:$0xff]  ;;  %v1240_v36 = vld [vmem:[%s2411_s9 + $0x170] sm:$0xff]  ;;  %v1239_v37 = vld [vmem:[%s2411_s9 + $0x168] sm:$0xff] }
 0x1a7   : > { %1526 = vmatpush1.msra.mxu1 %v1258_v40  ;;  %1366 = vmatprep.subr.mxu0 %v1257_v31  ;;  %v1305_v13 = vld [vmem:[%s2411_s9 + $0x378] sm:$0xff]  ;;  %v1304_v58 = vld [vmem:[%s2411_s9 + $0x370] sm:$0xff]  ;;  %v1303_v34 = vld [vmem:[%s2411_s9 + $0x368] sm:$0xff] }
 0x1a8   : > { %1527 = vmatprep.subr.mxu1 %v1321_v57  ;;  %1367 = vmatpush2.msra.mxu0 %v1256_v41  ;;  %v1238_v21 = vld [vmem:[%s2411_s9 + $0x160] sm:$0xff]  ;;  %v1237_v32 = vld [vmem:[%s2411_s9 + $0x158] sm:$0xff]  ;;  %v1236_v38 = vld [vmem:[%s2411_s9 + $0x150] sm:$0xff] }
 0x1a9   : > { %1528 = vmatpush2.msra.mxu1 %v1320_v3  ;;  %1368 = vmatprep.subr.mxu0 %v1255_v47  ;;  %v1302_v26 = vld [vmem:[%s2411_s9 + $0x360] sm:$0xff]  ;;  %v1301_v1 = vld [vmem:[%s2411_s9 + $0x358] sm:$0xff]  ;;  %v1300_v29 = vld [vmem:[%s2411_s9 + $0x350] sm:$0xff] }
 0x1aa   : > { %1529 = vmatprep.subr.mxu1 %v1319_v22  ;;  %1369 = vmatpush2.msra.mxu0 %v1254_v42  ;;  %v1235_v4 = vld [vmem:[%s2411_s9 + $0x148] sm:$0xff]  ;;  %v1234_v17 = vld [vmem:[%s2411_s9 + $0x140] sm:$0xff]  ;;  %v1233_v44 = vld [vmem:[%s2411_s9 + $0x138] sm:$0xff] }
 0x1ab   : > { %1530 = vmatpush2.msra.mxu1 %v1318_v46  ;;  %1370 = vmatprep.subr.mxu0 %v1253_v53  ;;  %v1299_v33 = vld [vmem:[%s2411_s9 + $0x348] sm:$0xff]  ;;  %v1298_v0 = vld [vmem:[%s2411_s9 + $0x340] sm:$0xff]  ;;  %v1297_v35 = vld [vmem:[%s2411_s9 + $0x338] sm:$0xff] }
 0x1ac   : > { %1531 = vmatprep.subr.mxu1 %v1317_v55  ;;  %1371 = vmatpush2.msra.mxu0 %v1252_v7  ;;  %v1232_v39 = vld [vmem:[%s2411_s9 + $0x130] sm:$0xff]  ;;  %v1231_v49 = vld [vmem:[%s2411_s9 + $0x128] sm:$0xff]  ;;  %v1230_v45 = vld [vmem:[%s2411_s9 + $0x120] sm:$0xff] }
 0x1ad   : > { %1532 = vmatpush2.msra.mxu1 %v1316_v51  ;;  %1372 = vmatprep.subr.mxu0 %v1251_v28  ;;  %v1296_v19 = vld [vmem:[%s2411_s9 + $0x330] sm:$0xff]  ;;  %v1295_v27 = vld [vmem:[%s2411_s9 + $0x328] sm:$0xff]  ;;  %v1294_v54 = vld [vmem:[%s2411_s9 + $0x320] sm:$0xff] }
 0x1ae   : > { %1533 = vmatprep.subr.mxu1 %v1315_v8  ;;  %1373 = vmatpush2.msra.mxu0 %v1250_v6  ;;  %v1229_v56 = vld [vmem:[%s2411_s9 + $0x118] sm:$0xff]  ;;  %v1228_v23 = vld [vmem:[%s2411_s9 + $0x110] sm:$0xff]  ;;  %v1227_v63 = vld [vmem:[%s2411_s9 + $0x108] sm:$0xff] }
 0x1af   : > { %1534 = vmatpush2.msra.mxu1 %v1314_v60  ;;  %1374 = vmatprep.subr.mxu0 %v1249_v11  ;;  %v1293_v5 = vld [vmem:[%s2411_s9 + $0x318] sm:$0xff]  ;;  %v1292_v59 = vld [vmem:[%s2411_s9 + $0x310] sm:$0xff]  ;;  %v1291_v48 = vld [vmem:[%s2411_s9 + $0x308] sm:$0xff] }
 0x1b0   : > { %1535 = vmatprep.subr.mxu1 %v1313_v10  ;;  %1375 = vmatpush2.msra.mxu0 %v1248_v43  ;;  %v1226_v15 = vld [vmem:[%s2411_s9 + $0x100] sm:$0xff]  ;;  %v1131_v40 = vld [vmem:[#allocation2 + $0x1b0] sm:$0xff]  ;;  %v1133_v57 = vld [vmem:[#allocation2 + $0x18] sm:$0xff] }
 0x1b1   : > { %1536 = vmatpush2.msra.mxu1 %v1312_v50  ;;  %1376 = vmatprep.subr.mxu0 %v1247_v12  ;;  %v1290_v31 = vld [vmem:[%s2411_s9 + $0x300] sm:$0xff]  ;;  %v1130_v41 = vld [vmem:[#allocation2 + $0xb0] sm:$0xff]  ;;  %v1132_v3 = vld [vmem:[#allocation2 + $0xd8] sm:$0xff] }
 0x1b2   : > { %1537 = vmatprep.subr.mxu1 %v1311_v61  ;;  %1377 = vmatpush2.msra.mxu0 %v1246_v14  ;;  %v1135_v47 = vld [vmem:[#allocation2 + $0x168] sm:$0xff]  ;;  %v1134_v42 = vld [vmem:[#allocation2 + $0x50] sm:$0xff]  ;;  %v1141_v55 = vld [vmem:[#allocation2 + $0x98] sm:$0xff] }
 0x1b3   : > { %1538 = vmatpush2.msra.mxu1 %v1310_v62  ;;  %1378 = vmatprep.subr.mxu0 %v1245_v18  ;;  %v1137_v22 = vld [vmem:[#allocation2 + $0x48] sm:$0xff]  ;;  %v1136_v46 = vld [vmem:[#allocation2 + $0x130] sm:$0xff]  ;;  %v1138_v7 = vld [vmem:[#allocation2 + $0x180] sm:$0xff] }
 0x1b4   : > { %1539 = vmatprep.subr.mxu1 %v1309_v20  ;;  %1379 = vmatpush2.msra.mxu0 %v1244_v25  ;;  %v1139_v53 = vld [vmem:[#allocation2 + $0x110] sm:$0xff]  ;;  %v1140_v51 = vld [vmem:[#allocation2 + $0x118] sm:$0xff]  ;;  %v1145_v8 = vld [vmem:[#allocation2 + $0x60] sm:$0xff] }
 0x1b5   : > { %1540 = vmatpush2.msra.mxu1 %v1308_v30  ;;  %1380 = vmatprep.subr.mxu0 %v1243_v9  ;;  %v1143_v28 = vld [vmem:[#allocation2 + $0x150] sm:$0xff]  ;;  %v1142_v6 = vld [vmem:[#allocation2 + $0x120] sm:$0xff]  ;;  %v1144_v60 = vld [vmem:[#allocation2 + $0x108] sm:$0xff] }
 0x1b6   : > { %1541 = vmatprep.subr.mxu1 %v1307_v52  ;;  %1381 = vmatpush2.msra.mxu0 %v1242_v16  ;;  %v1147_v11 = vld [vmem:[#allocation2 + $0x188] sm:$0xff]  ;;  %v1149_v10 = vld [vmem:[#allocation2 + $0x140] sm:$0xff]  ;;  %v1148_v50 = vld [vmem:[#allocation2 + $0x138] sm:$0xff] }
 0x1b7   : > { %1542 = vmatpush2.msra.mxu1 %v1306_v2  ;;  %1382 = vmatprep.subr.mxu0 %v1241_v24  ;;  %v1146_v43 = vld [vmem:[#allocation2 + $0xe0] sm:$0xff]  ;;  %v1151_v12 = vld [vmem:[#allocation2 + $0x1a8] sm:$0xff]  ;;  %v1152_v62 = vld [vmem:[#allocation2 + $0x1b8] sm:$0xff] }
 0x1b8   : > { %1543 = vmatprep.subr.mxu1 %v1305_v13  ;;  %1383 = vmatpush2.msra.mxu0 %v1240_v36  ;;  %v1153_v61 = vld [vmem:[#allocation2 + $0x28] sm:$0xff]  ;;  %v1150_v14 = vld [vmem:[#allocation2 + $0x80] sm:$0xff]  ;;  %v1155_v18 = vld [vmem:[#allocation2 + $0xf8] sm:$0xff] }
 0x1b9   : > { %1544 = vmatpush2.msra.mxu1 %v1304_v58  ;;  %1384 = vmatprep.subr.mxu0 %v1239_v37  ;;  %v1157_v20 = vld [vmem:[#allocation2 + $0x30] sm:$0xff]  ;;  %v1154_v25 = vld [vmem:[#allocation2 + $0x1e8] sm:$0xff]  ;;  %v1156_v30 = vld [vmem:[#allocation2 + $0x160] sm:$0xff] }
 0x1ba   : > { %1545 = vmatprep.subr.mxu1 %v1303_v34  ;;  %1385 = vmatpush2.msra.mxu0 %v1238_v21  ;;  %v1159_v9 = vld [vmem:[#allocation2] sm:$0xff]  ;;  %v1161_v52 = vld [vmem:[#allocation2 + $0x8] sm:$0xff]  ;;  %v1160_v2 = vld [vmem:[#allocation2 + $0xf0] sm:$0xff] }
 0x1bb   : > { %1546 = vmatpush2.msra.mxu1 %v1302_v26  ;;  %1386 = vmatprep.subr.mxu0 %v1237_v32  ;;  %v1158_v16 = vld [vmem:[#allocation2 + $0x1e0] sm:$0xff]  ;;  %v1163_v24 = vld [vmem:[#allocation2 + $0x1d0] sm:$0xff]  ;;  %v1165_v13 = vld [vmem:[#allocation2 + $0xc8] sm:$0xff] }
 0x1bc   : > { %1547 = vmatprep.subr.mxu1 %v1301_v1  ;;  %1387 = vmatpush2.msra.mxu0 %v1236_v38  ;;  %v1162_v36 = vld [vmem:[#allocation2 + $0x148] sm:$0xff]  ;;  %v1164_v58 = vld [vmem:[#allocation2 + $0x100] sm:$0xff]  ;;  %v1167_v37 = vld [vmem:[#allocation2 + $0x1f8] sm:$0xff] }
 0x1bd   : > { %1548 = vmatpush2.msra.mxu1 %v1300_v29  ;;  %1388 = vmatprep.subr.mxu0 %v1235_v4  ;;  %v1169_v34 = vld [vmem:[#allocation2 + $0x128] sm:$0xff]  ;;  %v1166_v21 = vld [vmem:[#allocation2 + $0x40] sm:$0xff]  ;;  %v1171_v32 = vld [vmem:[#allocation2 + $0x1f0] sm:$0xff] }
 0x1be   : > { %1549 = vmatprep.subr.mxu1 %v1299_v33  ;;  %1389 = vmatpush2.msra.mxu0 %v1234_v17  ;;  %v1168_v26 = vld [vmem:[#allocation2 + $0x20] sm:$0xff]  ;;  %v1173_v1 = vld [vmem:[#allocation2 + $0x78] sm:$0xff]  ;;  %v1172_v29 = vld [vmem:[#allocation2 + $0xe8] sm:$0xff] }
 0x1bf   : > { %1550 = vmatpush2.msra.mxu1 %v1298_v0  ;;  %1390 = vmatprep.subr.mxu0 %v1233_v44  ;;  %v1170_v38 = vld [vmem:[#allocation2 + $0x1a0] sm:$0xff]  ;;  %v1175_v4 = vld [vmem:[#allocation2 + $0x90] sm:$0xff]  ;;  %v1176_v0 = vld [vmem:[#allocation2 + $0x1d8] sm:$0xff] }
 0x1c0   : > { %1551 = vmatprep.subr.mxu1 %v1297_v35  ;;  %1391 = vmatpush2.msra.mxu0 %v1232_v39  ;;  %v1177_v33 = vld [vmem:[#allocation2 + $0xd0] sm:$0xff]  ;;  %v1179_v44 = vld [vmem:[#allocation2 + $0x88] sm:$0xff]  ;;  %v1178_v39 = vld [vmem:[#allocation2 + $0xb8] sm:$0xff] }
 0x1c1   : > { %1552 = vmatpush2.msra.mxu1 %v1296_v19  ;;  %1392 = vmatprep.subr.mxu0 %v1231_v49  ;;  %v1174_v17 = vld [vmem:[#allocation2 + $0x70] sm:$0xff]  ;;  %v1181_v35 = vld [vmem:[#allocation2 + $0x1c8] sm:$0xff]  ;;  %v1183_v49 = vld [vmem:[#allocation2 + $0x178] sm:$0xff] }
 0x1c2   : > { %1553 = vmatprep.subr.mxu1 %v1295_v27  ;;  %1393 = vmatpush2.msra.mxu0 %v1230_v45  ;;  %v1180_v19 = vld [vmem:[#allocation2 + $0xa8] sm:$0xff]  ;;  %v1185_v27 = vld [vmem:[#allocation2 + $0x190] sm:$0xff] }
 0x1c3   : > { %1554 = vmatpush2.msra.mxu1 %v1294_v54  ;;  %1394 = vmatprep.subr.mxu0 %v1229_v56  ;;  %v1182_v45 = vld [vmem:[#allocation2 + $0x170] sm:$0xff]  ;;  %v1184_v54 = vld [vmem:[#allocation2 + $0x68] sm:$0xff]  ;;  %v1187_v56 = vld [vmem:[#allocation2 + $0x38] sm:$0xff] }
 0x1c4   : > { %1555 = vmatprep.subr.mxu1 %v1293_v5  ;;  %1395 = vmatpush2.msra.mxu0 %v1228_v23  ;;  %v1189_v5 = vld [vmem:[#allocation2 + $0x1c0] sm:$0xff]  ;;  %v1186_v23 = vld [vmem:[#allocation2 + $0x198] sm:$0xff] }
 0x1c5   : > { %1556 = vmatpush2.msra.mxu1 %v1292_v59  ;;  %1396 = vmatprep.subr.mxu0 %v1227_v63  ;;  %v1188_v59 = vld [vmem:[#allocation2 + $0xc0] sm:$0xff]  ;;  %v1191_v63 = vld [vmem:[#allocation2 + $0x10] sm:$0xff] }
 0x1c6   : > { %1557 = vmatprep.subr.mxu1 %v1291_v48  ;;  %1397 = vmatpush2.msra.mxu0 %v1226_v15  ;;  %v1193_v48 = vld [vmem:[#allocation2 + $0xa0] sm:$0xff]  ;;  %v1190_v15 = vld [vmem:[#allocation2 + $0x158] sm:$0xff] }
 0x1c7   : > { %1398 = vmatprep.mubr.f32.mxu0 %v1131_v40  ;;  %1558 = vmatpush2.msra.mxu1 %v1290_v31  ;;  %v1192_v40 = vld [vmem:[#allocation2 + $0x58] sm:$0xff]  ;;  %v1324_v31 = vlaneseq }
 0x1c8   : > { %1559 = vmatprep.mubr.f32.mxu1 %v1133_v57  ;;  %1399 = vmatmul.mubr.f32.vlgmr.msra.gmra.mxu0 %v1130_v41 }
 0x1c9   : > { %1560 = vmatmul.mubr.f32.vlgmr.msra.gmra.mxu1 %v1132_v3  ;;  %1404 = vmatprep.mubr.f32.mxu0 %v1135_v47  ;;  %v1325_v57 = vshrl.u32 %v1324_v31, 7  ;;  %v1322_v3 = vld [vmem:[%s297_s26] sm:$0x3]  ;;  %s1702_s26 = sadd.s32 %s1867_s6, %s2422_s29 }
 0x1ca   : > { %1565 = vmatprep.mubr.f32.mxu1 %v1137_v22  ;;  %s1863_s25 = sshll.u32 %s1702_s26, 7 }
 0x1cb   : > { %v1326_v41 = vsub.s32 0, %v1325_v57  ;;  %v1330_v47 = vsub.s32 1, %v1325_v57  ;;  %s3185_s24 = scalar_lea.hbm %s3258_s5, %s1863_s25 }
 0x1cc   : > { %1405 = vmatmul.mubr.f32.gmra.mxu0 %v1134_v42 }
 0x1cd   : > { %1566 = vmatmul.mubr.f32.gmra.mxu1 %v1136_v46  ;;  %1410 = vmatprep.mubr.f32.mxu0 %v1139_v53  ;;  %v3113_v22 = vrot.slane %v1322_v3, %v1326_v41  ;;  %v3115_v42 = vrot.slane %v1322_v3, %v1330_v47 }
 0x1ce   : > { %1571 = vmatprep.mubr.f32.mxu1 %v1141_v55 }
 0x1d0   : > { %1411 = vmatmul.mubr.f32.gmra.mxu0 %v1138_v7 }
 0x1d1   : > { %1572 = vmatmul.mubr.f32.gmra.mxu1 %v1140_v51  ;;  %1416 = vmatprep.mubr.f32.mxu0 %v1143_v28 }
 0x1d2   : > { %1577 = vmatprep.mubr.f32.mxu1 %v1145_v8 }
 0x1d4   : > { %1417 = vmatmul.mubr.f32.gmra.mxu0 %v1142_v6 }
 0x1d5   : > { %1578 = vmatmul.mubr.f32.gmra.mxu1 %v1144_v60  ;;  %1422 = vmatprep.mubr.f32.mxu0 %v1147_v11 }
 0x1d6   : > { %1583 = vmatprep.mubr.f32.mxu1 %v1149_v10 }
 0x1d8   : > { %1423 = vmatmul.mubr.f32.gmra.mxu0 %v1146_v43 }
 0x1d9   : > { %1584 = vmatmul.mubr.f32.gmra.mxu1 %v1148_v50  ;;  %1428 = vmatprep.mubr.f32.mxu0 %v1151_v12 }
 0x1da   : > { %1589 = vmatprep.mubr.f32.mxu1 %v1153_v61 }
 0x1dc   : > { %1429 = vmatmul.mubr.f32.gmra.mxu0 %v1150_v14 }
 0x1dd   : > { %1590 = vmatmul.mubr.f32.gmra.mxu1 %v1152_v62  ;;  %1434 = vmatprep.mubr.f32.mxu0 %v1155_v18 }
 0x1de   : > { %1595 = vmatprep.mubr.f32.mxu1 %v1157_v20 }
 0x1e0   : > { %1435 = vmatmul.mubr.f32.gmra.mxu0 %v1154_v25 }
 0x1e1   : > { %1596 = vmatmul.mubr.f32.gmra.mxu1 %v1156_v30  ;;  %1440 = vmatprep.mubr.f32.mxu0 %v1159_v9 }
 0x1e2   : > { %1601 = vmatprep.mubr.f32.mxu1 %v1161_v52 }
 0x1e4   : > { %1441 = vmatmul.mubr.f32.gmra.mxu0 %v1158_v16 }
 0x1e5   : > { %1602 = vmatmul.mubr.f32.gmra.mxu1 %v1160_v2  ;;  %1446 = vmatprep.mubr.f32.mxu0 %v1163_v24 }
 0x1e6   : > { %1607 = vmatprep.mubr.f32.mxu1 %v1165_v13 }
 0x1e8   : > { %1447 = vmatmul.mubr.f32.gmra.mxu0 %v1162_v36 }
 0x1e9   : > { %1608 = vmatmul.mubr.f32.gmra.mxu1 %v1164_v58  ;;  %1452 = vmatprep.mubr.f32.mxu0 %v1167_v37 }
 0x1ea   : > { %1613 = vmatprep.mubr.f32.mxu1 %v1169_v34 }
 0x1ec   : > { %1453 = vmatmul.mubr.f32.gmra.mxu0 %v1166_v21 }
 0x1ed   : > { %1614 = vmatmul.mubr.f32.gmra.mxu1 %v1168_v26  ;;  %1458 = vmatprep.mubr.f32.mxu0 %v1171_v32 }
 0x1ee   : > { %1619 = vmatprep.mubr.f32.mxu1 %v1173_v1 }
 0x1f0   : > { %1459 = vmatmul.mubr.f32.gmra.mxu0 %v1170_v38 }
 0x1f1   : > { %1620 = vmatmul.mubr.f32.gmra.mxu1 %v1172_v29  ;;  %1464 = vmatprep.mubr.f32.mxu0 %v1175_v4 }
 0x1f2   : > { %1625 = vmatprep.mubr.f32.mxu1 %v1177_v33 }
 0x1f4   : > { %1465 = vmatmul.mubr.f32.gmra.mxu0 %v1174_v17 }
 0x1f5   : > { %1626 = vmatmul.mubr.f32.gmra.mxu1 %v1176_v0  ;;  %1470 = vmatprep.mubr.f32.mxu0 %v1179_v44 }
 0x1f6   : > { %1631 = vmatprep.mubr.f32.mxu1 %v1181_v35 }
 0x1f8   : > { %1471 = vmatmul.mubr.f32.gmra.mxu0 %v1178_v39 }
 0x1f9   : > { %1632 = vmatmul.mubr.f32.gmra.mxu1 %v1180_v19  ;;  %1476 = vmatprep.mubr.f32.mxu0 %v1183_v49 }
 0x1fa   : > { %1637 = vmatprep.mubr.f32.mxu1 %v1185_v27 }
 0x1fc   : > { %1477 = vmatmul.mubr.f32.gmra.mxu0 %v1182_v45 }
 0x1fd   : > { %1638 = vmatmul.mubr.f32.gmra.mxu1 %v1184_v54  ;;  %1482 = vmatprep.mubr.f32.mxu0 %v1187_v56 }
 0x1fe   : > { %1643 = vmatprep.mubr.f32.mxu1 %v1189_v5 }
 0x200   : > { %1483 = vmatmul.mubr.f32.gmra.mxu0 %v1186_v23 }
 0x201   : > { %1644 = vmatmul.mubr.f32.gmra.mxu1 %v1188_v59  ;;  %1488 = vmatprep.mubr.f32.mxu0 %v1191_v63 }
 0x202   : > { %1649 = vmatprep.mubr.f32.mxu1 %v1193_v48 }
 0x204   : > { %1489 = vmatmul.mubr.f32.gmra.mxu0 %v1190_v15 }
 0x205   : > { %1650 = vmatmul.mubr.f32.gmra.mxu1 %v1192_v40 }
 0x288   : > { %v1400_v46 = vpop.f32.mrf.mxu0 }
 0x289   : > { %v1561_v53 = vpop.f32.mrf.mxu1  ;;  %v1401_v55 = vadd.f32 %v1400_v46, %v3113_v22 }
 0x28a   : > { %v1402_v7 = vpop.f32.mrf.mxu0 }
 0x28b   : > { %v1563_v51 = vpop.f32.mrf.mxu1  ;;  %v1562_v28 = vadd.f32 %v1561_v53, %v1401_v55  ;;  %v1403_v8 = vadd.f32 %v1402_v7, %v3115_v42 }
 0x28c   : > { %v1406_v6 = vpop.f32.mrf.mxu0 }
 0x28d   : > { %v1567_v60 = vpop.f32.mrf.mxu1  ;;  %1656 = vst [vmem:[%s2437_s23] sm:$0xff] %v1562_v28  ;;  %v1564_v11 = vadd.f32 %v1563_v51, %v1403_v8  ;;  %v1407_v10 = vadd.f32 %v1406_v6, %v3113_v22 }
 0x28e   : > { %v1408_v43 = vpop.f32.mrf.mxu0 }
 0x28f   : > { %v1569_v50 = vpop.f32.mrf.mxu1  ;;  %1657 = vst [vmem:[%s2437_s23 + $0x8] sm:$0xff] %v1564_v11  ;;  %v1568_v12 = vadd.f32 %v1567_v60, %v1407_v10  ;;  %v1409_v61 = vadd.f32 %v1408_v43, %v3115_v42 }
 0x290   : > { %v1412_v14 = vpop.f32.mrf.mxu0 }
 0x291   : > { %v1573_v62 = vpop.f32.mrf.mxu1  ;;  %1658 = vst [vmem:[%s2437_s23 + $0x10] sm:$0xff] %v1568_v12  ;;  %v1570_v18 = vadd.f32 %v1569_v50, %v1409_v61  ;;  %v1413_v20 = vadd.f32 %v1412_v14, %v3113_v22 }
 0x292   : > { %v1414_v25 = vpop.f32.mrf.mxu0 }
 0x293   : > { %v1575_v30 = vpop.f32.mrf.mxu1  ;;  %1659 = vst [vmem:[%s2437_s23 + $0x18] sm:$0xff] %v1570_v18  ;;  %v1574_v9 = vadd.f32 %v1573_v62, %v1413_v20  ;;  %v1415_v52 = vadd.f32 %v1414_v25, %v3115_v42 }
 0x294   : > { %v1418_v16 = vpop.f32.mrf.mxu0 }
 0x295   : > { %v1579_v2 = vpop.f32.mrf.mxu1  ;;  %1660 = vst [vmem:[%s2437_s23 + $0x20] sm:$0xff] %v1574_v9  ;;  %v1576_v24 = vadd.f32 %v1575_v30, %v1415_v52  ;;  %v1419_v13 = vadd.f32 %v1418_v16, %v3113_v22 }
 0x296   : > { %v1420_v36 = vpop.f32.mrf.mxu0 }
 0x297   : > { %v1581_v58 = vpop.f32.mrf.mxu1  ;;  %1661 = vst [vmem:[%s2437_s23 + $0x28] sm:$0xff] %v1576_v24  ;;  %v1580_v37 = vadd.f32 %v1579_v2, %v1419_v13  ;;  %v1421_v34 = vadd.f32 %v1420_v36, %v3115_v42 }
 0x298   : > { %v1424_v21 = vpop.f32.mrf.mxu0 }
 0x299   : > { %v1585_v26 = vpop.f32.mrf.mxu1  ;;  %1662 = vst [vmem:[%s2437_s23 + $0x30] sm:$0xff] %v1580_v37  ;;  %v1582_v32 = vadd.f32 %v1581_v58, %v1421_v34  ;;  %v1425_v1 = vadd.f32 %v1424_v21, %v3113_v22 }
 0x29a   : > { %v1426_v38 = vpop.f32.mrf.mxu0 }
 0x29b   : > { %v1587_v29 = vpop.f32.mrf.mxu1  ;;  %1663 = vst [vmem:[%s2437_s23 + $0x38] sm:$0xff] %v1582_v32  ;;  %v1586_v4 = vadd.f32 %v1585_v26, %v1425_v1  ;;  %v1427_v33 = vadd.f32 %v1426_v38, %v3115_v42 }
 0x29c   : > { %v1430_v17 = vpop.f32.mrf.mxu0 }
 0x29d   : > { %v1591_v0 = vpop.f32.mrf.mxu1  ;;  %1664 = vst [vmem:[%s2437_s23 + $0x40] sm:$0xff] %v1586_v4  ;;  %v1588_v44 = vadd.f32 %v1587_v29, %v1427_v33  ;;  %v1431_v35 = vadd.f32 %v1430_v17, %v3113_v22 }
 0x29e   : > { %v1432_v39 = vpop.f32.mrf.mxu0 }
 0x29f   : > { %v1593_v19 = vpop.f32.mrf.mxu1  ;;  %1665 = vst [vmem:[%s2437_s23 + $0x48] sm:$0xff] %v1588_v44  ;;  %v1592_v49 = vadd.f32 %v1591_v0, %v1431_v35  ;;  %v1433_v27 = vadd.f32 %v1432_v39, %v3115_v42 }
 0x2a0   : > { %v1436_v45 = vpop.f32.mrf.mxu0 }
 0x2a1   : > { %v1597_v54 = vpop.f32.mrf.mxu1  ;;  %1666 = vst [vmem:[%s2437_s23 + $0x50] sm:$0xff] %v1592_v49  ;;  %v1594_v56 = vadd.f32 %v1593_v19, %v1433_v27  ;;  %v1437_v5 = vadd.f32 %v1436_v45, %v3113_v22 }
 0x2a2   : > { %v1438_v23 = vpop.f32.mrf.mxu0 }
 0x2a3   : > { %v1599_v59 = vpop.f32.mrf.mxu1  ;;  %1667 = vst [vmem:[%s2437_s23 + $0x58] sm:$0xff] %v1594_v56  ;;  %v1598_v63 = vadd.f32 %v1597_v54, %v1437_v5  ;;  %v1439_v48 = vadd.f32 %v1438_v23, %v3115_v42 }
 0x2a4   : > { %v1442_v15 = vpop.f32.mrf.mxu0 }
 0x2a5   : > { %v1603_v40 = vpop.f32.mrf.mxu1  ;;  %1668 = vst [vmem:[%s2437_s23 + $0x60] sm:$0xff] %v1598_v63  ;;  %v1600_v31 = vadd.f32 %v1599_v59, %v1439_v48  ;;  %v1443_v57 = vadd.f32 %v1442_v15, %v3113_v22 }
 0x2a6   : > { %v1444_v41 = vpop.f32.mrf.mxu0 }
 0x2a7   : > { %v1605_v3 = vpop.f32.mrf.mxu1  ;;  %1669 = vst [vmem:[%s2437_s23 + $0x68] sm:$0xff] %v1600_v31  ;;  %v1604_v47 = vadd.f32 %v1603_v40, %v1443_v57  ;;  %v1445_v46 = vadd.f32 %v1444_v41, %v3115_v42 }
 0x2a8   : > { %v1448_v53 = vpop.f32.mrf.mxu0 }
 0x2a9   : > { %v1609_v55 = vpop.f32.mrf.mxu1  ;;  %1670 = vst [vmem:[%s2437_s23 + $0x70] sm:$0xff] %v1604_v47  ;;  %v1606_v7 = vadd.f32 %v1605_v3, %v1445_v46  ;;  %v1449_v51 = vadd.f32 %v1448_v53, %v3113_v22 }
 0x2aa   : > { %v1450_v28 = vpop.f32.mrf.mxu0 }
 0x2ab   : > { %v1611_v8 = vpop.f32.mrf.mxu1  ;;  %1671 = vst [vmem:[%s2437_s23 + $0x78] sm:$0xff] %v1606_v7  ;;  %v1610_v6 = vadd.f32 %v1609_v55, %v1449_v51  ;;  %v1451_v60 = vadd.f32 %v1450_v28, %v3115_v42 }
 0x2ac   : > { %v1454_v11 = vpop.f32.mrf.mxu0 }
 0x2ad   : > { %v1615_v10 = vpop.f32.mrf.mxu1  ;;  %1672 = vst [vmem:[%s2437_s23 + $0x80] sm:$0xff] %v1610_v6  ;;  %v1612_v43 = vadd.f32 %v1611_v8, %v1451_v60  ;;  %v1455_v50 = vadd.f32 %v1454_v11, %v3113_v22 }
 0x2ae   : > { %v1456_v12 = vpop.f32.mrf.mxu0 }
 0x2af   : > { %v1617_v61 = vpop.f32.mrf.mxu1  ;;  %1673 = vst [vmem:[%s2437_s23 + $0x88] sm:$0xff] %v1612_v43  ;;  %v1616_v14 = vadd.f32 %v1615_v10, %v1455_v50  ;;  %v1457_v62 = vadd.f32 %v1456_v12, %v3115_v42 }
 0x2b0   : > { %v1460_v18 = vpop.f32.mrf.mxu0 }
 0x2b1   : > { %v1621_v20 = vpop.f32.mrf.mxu1  ;;  %1674 = vst [vmem:[%s2437_s23 + $0x90] sm:$0xff] %v1616_v14  ;;  %v1618_v25 = vadd.f32 %v1617_v61, %v1457_v62  ;;  %v1461_v30 = vadd.f32 %v1460_v18, %v3113_v22 }
 0x2b2   : > { %v1462_v9 = vpop.f32.mrf.mxu0 }
 0x2b3   : > { %v1623_v52 = vpop.f32.mrf.mxu1  ;;  %1675 = vst [vmem:[%s2437_s23 + $0x98] sm:$0xff] %v1618_v25  ;;  %v1622_v16 = vadd.f32 %v1621_v20, %v1461_v30  ;;  %v1463_v2 = vadd.f32 %v1462_v9, %v3115_v42 }
 0x2b4   : > { %v1466_v24 = vpop.f32.mrf.mxu0 }
 0x2b5   : > { %v1627_v13 = vpop.f32.mrf.mxu1  ;;  %1676 = vst [vmem:[%s2437_s23 + $0xa0] sm:$0xff] %v1622_v16  ;;  %v1624_v36 = vadd.f32 %v1623_v52, %v1463_v2  ;;  %v1467_v58 = vadd.f32 %v1466_v24, %v3113_v22 }
 0x2b6   : > { %v1468_v37 = vpop.f32.mrf.mxu0 }
 0x2b7   : > { %v1629_v34 = vpop.f32.mrf.mxu1  ;;  %1677 = vst [vmem:[%s2437_s23 + $0xa8] sm:$0xff] %v1624_v36  ;;  %v1628_v21 = vadd.f32 %v1627_v13, %v1467_v58  ;;  %v1469_v26 = vadd.f32 %v1468_v37, %v3115_v42 }
 0x2b8   : > { %v1472_v32 = vpop.f32.mrf.mxu0 }
 0x2b9   : > { %v1633_v1 = vpop.f32.mrf.mxu1  ;;  %1678 = vst [vmem:[%s2437_s23 + $0xb0] sm:$0xff] %v1628_v21  ;;  %v1630_v38 = vadd.f32 %v1629_v34, %v1469_v26  ;;  %v1473_v29 = vadd.f32 %v1472_v32, %v3113_v22 }
 0x2ba   : > { %v1474_v4 = vpop.f32.mrf.mxu0 }
 0x2bb   : > { %v1635_v33 = vpop.f32.mrf.mxu1  ;;  %1679 = vst [vmem:[%s2437_s23 + $0xb8] sm:$0xff] %v1630_v38  ;;  %v1634_v17 = vadd.f32 %v1633_v1, %v1473_v29  ;;  %v1475_v0 = vadd.f32 %v1474_v4, %v3115_v42 }
 0x2bc   : > { %v1478_v44 = vpop.f32.mrf.mxu0 }
 0x2bd   : > { %v1639_v35 = vpop.f32.mrf.mxu1  ;;  %1680 = vst [vmem:[%s2437_s23 + $0xc0] sm:$0xff] %v1634_v17  ;;  %v1636_v39 = vadd.f32 %v1635_v33, %v1475_v0  ;;  %v1479_v19 = vadd.f32 %v1478_v44, %v3113_v22 }
 0x2be   : > { %v1480_v49 = vpop.f32.mrf.mxu0 }
 0x2bf   : > { %v1641_v27 = vpop.f32.mrf.mxu1  ;;  %1681 = vst [vmem:[%s2437_s23 + $0xc8] sm:$0xff] %v1636_v39  ;;  %v1640_v45 = vadd.f32 %v1639_v35, %v1479_v19  ;;  %v1481_v54 = vadd.f32 %v1480_v49, %v3115_v42 }
 0x2c0   : > { %v1484_v56 = vpop.f32.mrf.mxu0 }
 0x2c1   : > { %v1645_v5 = vpop.f32.mrf.mxu1  ;;  %1682 = vst [vmem:[%s2437_s23 + $0xd0] sm:$0xff] %v1640_v45  ;;  %v1642_v23 = vadd.f32 %v1641_v27, %v1481_v54  ;;  %v1485_v59 = vadd.f32 %v1484_v56, %v3113_v22 }
 0x2c2   : > { %v1486_v63 = vpop.f32.mrf.mxu0 }
 0x2c3   : > { %v1647_v48 = vpop.f32.mrf.mxu1  ;;  %1683 = vst [vmem:[%s2437_s23 + $0xd8] sm:$0xff] %v1642_v23  ;;  %v1646_v15 = vadd.f32 %v1645_v5, %v1485_v59  ;;  %v1487_v40 = vadd.f32 %v1486_v63, %v3115_v42 }
 0x2c4   : > { %v1490_v31 = vpop.f32.mrf.mxu0 }
 0x2c5   : > { %v1651_v57 = vpop.f32.mrf.mxu1  ;;  %1684 = vst [vmem:[%s2437_s23 + $0xe0] sm:$0xff] %v1646_v15  ;;  %v1648_v41 = vadd.f32 %v1647_v48, %v1487_v40  ;;  %v1491_v3 = vadd.f32 %v1490_v31, %v3113_v22 }
 0x2c6   : > { %v1492_v47 = vpop.f32.mrf.mxu0 }
 0x2c7   : > { %1685 = vst [vmem:[%s2437_s23 + $0xe8] sm:$0xff] %v1648_v41  ;;  %v1652_v46 = vadd.f32 %v1651_v57, %v1491_v3  ;;  %v1493_v53 = vadd.f32 %v1492_v47, %v3115_v42  ;;  %v1653_v55 = vpop.f32.mrf.mxu1 }
 0x2c9   : > { %1686 = vst [vmem:[%s2437_s23 + $0xf0] sm:$0xff] %v1652_v46  ;;  %v1654_v7 = vadd.f32 %v1653_v55, %v1493_v53 }
 0x2cb   : > { %1687 = vst [vmem:[%s2437_s23 + $0xf8] sm:$0xff] %v1654_v7 }
 0x2cc   : > { %2146 = shalt.err (!%p2143_p3)
}
 0x2cd   : > { %s2147_s23 = scalar_lea.hbm %s3185_s24, 4096  ;;  %s2151_s12 = scalar_lea.hbm %s3258_s5, 24576 }
 0x2ce   : > { %p2148_p1 = scmp.ne.s32.totalorder %s3185_s24, %s2147_s23  ;;  %p2152_p6 = scmp.lt.s32.totalorder %s3185_s24, %s3258_s5 }
 0x2cf   : > { %p2153_p8 = scmp.lt.s32.totalorder %s2151_s12, %s2147_s23 }
 0x2d0   : > { %p2149_p5 = pnand %p2148_p1, %p2384_p13 }
 0x2d1   : > { %p2154_p7 = por %p2153_p8, %p2152_p6 }
 0x2d2   : > { %p2150_p4 = pneg %p2149_p5 }
 0x2d4   : > { %p2155_p9 = pnand %p2154_p7, %p2150_p4 }
 0x2d6   : > { %2158 = shalt.err (!%p2155_p9)
}
 0x2d7   : > { %s2261_s25 = smov 256   ;;  %s2262_s29 = smov 512  }
 0x2d8   : > { %s2263_s14 = smov 16  }
 0x2d9   : > { %1870 = dma.vmem_to_hbm [thread:$0]  (%p2384_p13), %s3187_s10, 4096, %s3185_s24, %s3193_s27, %s2261_s25, %s2262_s29, %s2263_s14  }
 0x2da PF: > { %p1881_p10 = scmp.ge.s32.totalorder %s2253_s28, 2  ;;  %s1720_s8 = sand.u32 1, %s2213_s18  }
 0x2db   : > { %s1721_s11 = scalar_lea.sflag [#allocation5], %s1720_s8 }
 0x2dc   : > { %p1877_p11 = pnand %p1881_p10, %p2389_p2 }
 0x2de   : > { %p1878_p12 = pneg %p1877_p11 }
 0x2e0   : > { %2208 = dma.done.wait (%p1878_p12), %s1721_s11, 4096  }
 0x2e1   : > { %2210 = vsyncadd (%p1878_p12), %s1721_s11, 4294963200  ;;  %s21_s28 = sadd.s32 1, %s2253_s28   ;;  %s3277_s17 = sld [smem:[#allocation9_spill]] }
 0x2e2   : > { %p18_p0 = scmp.ge.s32.totalorder %s21_s28, 8   ;;  %s3278_s23 = sld [smem:[#allocation14_spill]] }
 0x2e3   : > { %s3279_s24 = sld [smem:[#allocation10_spill]]  ;;  %s3283_s18 = smov %s2217_s19 }
 0x2e4   : > { %s3280_s25 = sld [smem:[#allocation11_spill]]  ;;  %s3284_s19 = smov %s2221_s20 }
 0x2e5   : > { %s3281_s26 = sld [smem:[#allocation12_spill]]  ;;  %s3285_s20 = smov %s2382_s16 }
 0x2e6   : > { %s3282_s27 = sld [smem:[#allocation13_spill]]  ;;  %s3286_s21 = smov %s2229_s22 }
 0x2e7   : > { %s3287_s22 = smov %s3277_s17  ;;  %20 = sbr.rel (!%p18_p0) target bundleno = 9 (0x9), region = 95 }
 0x2ec   :  { %1726 = vsyncpa [#allocation4], 1 }
 0x2ed   :  { %1728 = vsyncpa [#allocation4 + $0x1], 1 }
 0x2ee   :  { %1729 = vsyncpa [#allocation5], 1 }
 0x2ef   :  { %1731 = vsyncpa [#allocation5 + $0x1], 1 }

</bundles_post_ra>
